<compile_context>
chip_gen: v6e
topology: v6e:2x2x1
jax: 0.10.0
libtpu: 0.0.40
codegen_flags: <defaults>
</compile_context>

<pallas_src>
import jax
import jax.numpy as jnp
from jax.experimental import pallas as pl
from jax.experimental.pallas import tpu as pltpu

_SMALL_N = 64 * 1024                       # below this, plain jnp.log wins
_TARGET_BLOCK_BYTES = 2 * 1024 * 1024      # ~2 MiB per block buffer


def _log_kernel(x_ref, o_ref):
    # Elementwise natural log on the whole VMEM tile (VPU/EUP path).
    x = x_ref[...]
    o_ref[...] = jnp.log(x.astype(jnp.float32)).astype(o_ref.dtype)


def _sublane_multiple(dtype):
    # f32 -> 8 sublanes, bf16/f16 -> 16, 1-byte types -> 32.
    return max(8, 32 // jnp.dtype(dtype).itemsize)


def log_model(x):
    """Pallas equivalent of LogModel.forward: torch.log(x), elementwise."""
    x = jnp.asarray(x)
    if not jnp.issubdtype(x.dtype, jnp.floating):
        x = x.astype(jnp.float32)          # torch.log promotes ints to float
    orig_shape = x.shape
    flat = x.reshape(-1)
    n = flat.shape[0]

    # Tiny inputs (including the scalar case): XLA's fused log is strictly better.
    if n < _SMALL_N:
        return jnp.log(x)

    dtype = x.dtype
    itemsize = jnp.dtype(dtype).itemsize
    sub = _sublane_multiple(dtype)

    # Widest lane-dense width (multiple of 128) that divides n exactly:
    # fewer, larger unmasked stores / DMA transactions and no pad copy.
    width = None
    for cand in (8192, 4096, 2048, 1024, 512, 256, 128):
        if n % cand == 0:
            width = cand
            break

    needs_slice = False
    if width is None:
        # Rare ragged case: pad up to a clean tile (log(1)=0 keeps padding benign).
        # TODO(synk): split main/tail instead of a full-array pad to avoid the copy.
        width = 1024
        tile = width * sub
        padded = -(-n // tile) * tile
        flat = jnp.pad(flat, (0, padded - n), constant_values=1)
        needs_slice = True

    total = flat.shape[0]
    rows = total // width
    x2d = flat.reshape(rows, width)

    # Multi-MiB row blocks; multiple of the sublane tile, or full extent.
    block_rows = max(sub, (_TARGET_BLOCK_BYTES // (width * itemsize)) // sub * sub)
    if block_rows >= rows:
        block_rows = rows                  # full-extent block is always layout-legal
    grid = (pl.cdiv(rows, block_rows),)    # partial last block is masked by Pallas

    out2d = pl.pallas_call(
        _log_kernel,
        out_shape=jax.ShapeDtypeStruct((rows, width), dtype),
        grid_spec=pltpu.PrefetchScalarGridSpec(
            num_scalar_prefetch=0,
            grid=grid,
            in_specs=[pl.BlockSpec((block_rows, width), lambda i: (i, 0))],
            out_specs=pl.BlockSpec((block_rows, width), lambda i: (i, 0)),
        ),
        compiler_params=pltpu.CompilerParams(
            dimension_semantics=("parallel",),
        ),
        cost_estimate=pl.CostEstimate(
            flops=0,
            transcendentals=rows * width,
            bytes_accessed=2 * rows * width * itemsize,
        ),
    )(x2d)

    out_flat = out2d.reshape(-1)
    if needs_slice:
        out_flat = out_flat[:n]
    return out_flat.reshape(orig_shape)


if __name__ == "__main__":
    key = jax.random.PRNGKey(0)
    k0, k1, k2, k3 = jax.random.split(key, 4)

    # Scalar input matching the reference snippet (x = tensor(5.0)).
    y_scalar = jax.block_until_ready(log_model(jnp.float32(5.0)))
    assert jnp.allclose(y_scalar, jnp.log(5.0), atol=1e-6)

    # Small array consistent with the module (elementwise, any shape).
    x_small = jax.random.uniform(k0, (2, 4, 16, 16), jnp.float32, 0.1, 10.0)
    y_small = jax.block_until_ready(log_model(x_small))
    assert y_small.shape == x_small.shape
    assert jnp.allclose(y_small, jnp.log(x_small), atol=1e-6, rtol=1e-6)

    # Larger f32 array exercising the wide-lane Pallas path (no pad, no slice).
    x_big = jax.random.uniform(k1, (8, 512, 256), jnp.float32, 0.1, 10.0)
    y_big = jax.block_until_ready(log_model(x_big))
    assert jnp.allclose(y_big, jnp.log(x_big), atol=1e-6, rtol=1e-6)

    # Non-128-divisible size exercising the rare tail-pad path.
    x_odd = jax.random.uniform(k2, (3, 127, 257), jnp.float32, 0.1, 10.0)
    y_odd = jax.block_until_ready(log_model(x_odd))
    assert jnp.allclose(y_odd, jnp.log(x_odd), atol=1e-6, rtol=1e-6)

    # bf16 input: dtype preserved (matches torch.log dtype behaviour), narrow I/O.
    x_bf = jax.random.uniform(k3, (16, 128, 64), jnp.float32, 0.1, 10.0).astype(
        jnp.bfloat16)
    y_bf = jax.block_until_ready(log_model(x_bf))
    assert y_bf.dtype == jnp.bfloat16
    assert jnp.allclose(y_bf.astype(jnp.float32),
                        jnp.log(x_bf.astype(jnp.float32)), atol=2e-2, rtol=2e-2)

    print("KERNEL_OK")
</pallas_src>

<mosaic_0001>
module attributes {stable_mosaic.version = 11 : i64} {
  func.func @_log_kernel(%arg0: i32, %arg1: memref<64x8192xf32, #tpu.memory_space<vmem>>, %arg2: memref<64x8192xf32, #tpu.memory_space<vmem>>) attributes {dimension_semantics = [#tpu.dimension_semantics<parallel>], iteration_bounds = array<i64: 2>, scalar_prefetch = 0 : i64, scratch_operands = 0 : i64, tpu.core_type = #tpu.core_type<tc>, window_params = [{transform_indices = @transform_0, window_bounds = array<i64: 64, 8192>}, {transform_indices = @transform_1, window_bounds = array<i64: 64, 8192>}]} {
    %c0 = arith.constant 0 : index
    %c0_0 = arith.constant 0 : index
    %0 = vector.load %arg1[%c0, %c0_0] : memref<64x8192xf32, #tpu.memory_space<vmem>>, vector<64x8192xf32>
    %1 = math.log %0 : vector<64x8192xf32>
    %c0_1 = arith.constant 0 : index
    %c0_2 = arith.constant 0 : index
    %2 = vector.load %arg2[%c0_1, %c0_2] : memref<64x8192xf32, #tpu.memory_space<vmem>>, vector<64x8192xf32>
    tpu.vector_store %arg2[%c0_1, %c0_2], %1 {strides = array<i32>} : memref<64x8192xf32, #tpu.memory_space<vmem>>, vector<64x8192xf32>,
    return
  }
  func.func @transform_0(%arg0: i32) -> (i32, i32) {
    %c0_i32 = arith.constant 0 : i32
    %c0_i32_0 = arith.constant 0 : i32
    return %arg0, %c0_i32 : i32, i32
  }
  func.func @transform_1(%arg0: i32) -> (i32, i32) {
    %c0_i32 = arith.constant 0 : i32
    %c0_i32_0 = arith.constant 0 : i32
    return %arg0, %c0_i32 : i32, i32
  }
}

</mosaic_0001>

<bundles_post_ra>
// kernel: tpu_custom_call.1
= control target key start
LH: loop header
LB: loop body
LE: loop exit
PB: predicated region body
PF: predicated region fallthrough
CT: control target
= control target key end

     0   :  { %6 = vsyncpa [#allocation3], 0  ;;  %s4665_s0 = inlined_call_operand.hbm [shape: f32[128,8192], index: 0, kind: input, shape index: {}]   ;;  %s4666_s1 = inlined_call_operand.hbm [shape: f32[128,8192], index: 1, kind: output, shape index: {}]  }
   0x1   :  { %8 = vsyncpa [#allocation3 + $0x1], 0 }
   0x2   :  { %9 = vsyncpa [#allocation4], 0 }
   0x3   :  { %11 = vsyncpa [#allocation4 + $0x1], 0  ;;  %s3478_s6 = smov 0   ;;  %s3480_s7 = smov 0  }
   0x4   :  { %s3482_s8 = smov 0   ;;  %s3484_s9 = smov 0  }
   0x5 LB: > { %s3499_s10 = sadd.s32 4294967295, %s3460_s9   ;;  %s2274_s11 = sadd.s32 4294967294, %s3460_s9   ;;  %s3460_s9 = sphi %s3484_s9, %s4681_s9   ;;  %s3456_s8 = sphi %s3482_s8, %s4680_s8   ;;  %s3452_s7 = sphi %s3480_s7, %s4679_s7   ;;  %s3448_s6 = sphi %s3478_s6, %s4678_s6  }
   0x6   : > { %s3503_s12 = sadd.s32 1, %s3460_s9   ;;  %s24_s13 = sadd.s32 1, %s3456_s8 }
   0x7   : > { %s21_s14 = ssub.s32 %s3460_s9, %s3503_s12  ;;  %p31_p0 = scmp.ne.s32.totalorder %s3456_s8, %s3452_s7 }
   0x8   : > { %p22_p1 = scmp.eq.s32.totalorder %s21_s14, 0  ;;  %p32_p2 = scmp.eq.s32.totalorder %s3460_s9, 0 }
   0x9   : > { %p37_p3 = scmp.ne.s32.totalorder %s3452_s7, %s3448_s6  ;;  %p38_p4 = scmp.eq.s32.totalorder %s3499_s10, 0 }
   0xa   : > { %s3515_s15 = scalar_select %p22_p1, %s3456_s8, %s24_s13  }
   0xb   : > { %p3517_p5 = por %p32_p2, %p31_p0  ;;  %p3521_p6 = por %p38_p4, %p37_p3 }
   0xc   : > { %p61_p7 = scmp.eq.s32.totalorder %s3499_s10, 1  ;;  %p67_p8 = scmp.eq.s32.totalorder %s2274_s11, 1 }
   0xd   : > { %s4670_s17 = scalar_select %p3521_p6, 1, 0 }
   0xe   : > { %p2306_p10 = scmp.lt.s32.totalorder %s3460_s9, 2  ;;  %p3528_p11 = por %p61_p7, %p31_p0 }
   0xf   : > { %p3532_p12 = por %p67_p8, %p37_p3  ;;  %s87_s20 = sand.u32 1, %s3456_s8  }
  0x10   : > { %s4671_s18 = scalar_select %p3528_p11, 1, 0 }
  0x11   : > { %s4672_s19 = scalar_select %p3532_p12, 1, 0 }
  0x12   : > { %s2291_s21 = sshll.u32 %s3460_s9, 16  ;;  %s2277_s22 = sshll.u32 %s87_s20, 12 }
  0x13   : > { %s3541_s25 = scalar_lea.hbm %s4665_s0, %s2291_s21  ;;  %s91_s26 = scalar_lea.vmem [#allocation2], %s2277_s22 }
  0x14   : > { %s99_s27 = sshll.u32 %s91_s26, 4  ;;  %p3545_p13 = pnand %p2306_p10, %p3517_p5  ;;  %s3549_s27 = int_to_ptr.vmem [resolvable:$true] %s99_s27 }
  0x15   : > { %s3551_s29 = scalar_lea.sflag [#allocation3], %s87_s20  ;;  %s3368_s30 = scalar_lea.hbm %s3541_s25, 65536 }
  0x16   : > { %p3369_p0 = scmp.ne.s32.totalorder %s3541_s25, %s3368_s30  ;;  %p3370_p1 = pneg %p3545_p13 }
  0x17   : > { %s3373_s4 = scalar_lea.hbm %s4665_s0, 131072  ;;  %p3374_p4 = scmp.lt.s32.totalorder %s3541_s25, %s4665_s0 }
  0x18   : > { %p3371_p2 = pnand %p3370_p1, %p3369_p0  ;;  %p3375_p5 = scmp.lt.s32.totalorder %s3373_s4, %s3368_s30 }
  0x1a   : > { %p3372_p3 = pneg %p3371_p2  ;;  %p3376_p7 = por %p3375_p5, %p3374_p4 }
  0x1c   : > { %p3377_p8 = pnand %p3376_p7, %p3372_p3 }
  0x1e   : > { %3380 = shalt.err (!%p3377_p8)
}
  0x1f   : > { %s3381_s13 = scalar_lea.vmem %s3549_s27, 65536  ;;  %s3462_s14 = smov [#allocation2]  }
  0x20   : > { %p3382_p10 = scmp.ne.s32.totalorder %s3549_s27, %s3381_s13  ;;  %s3386_s16 = sshll.u32 %s3462_s14, 4  ;;  %s3387_s16 = int_to_ptr.vmem [resolvable:$false] %s3386_s16 }
  0x21   : > { %s3388_s20 = scalar_lea.vmem %s3387_s16, 131072  ;;  %p3389_p2 = scmp.lt.s32.totalorder %s3549_s27, %s3387_s16 }
  0x22   : > { %p3384_p9 = pnand %p3382_p10, %p3370_p1  ;;  %p3390_p12 = scmp.lt.s32.totalorder %s3388_s20, %s3381_s13 }
  0x24   : > { %p3385_p0 = pneg %p3384_p9  ;;  %p3391_p11 = por %p3390_p12, %p3389_p2 }
  0x26   : > { %p3392_p6 = pnand %p3391_p11, %p3385_p0 }
  0x28   : > { %3395 = shalt.err (!%p3392_p6)
}
  0x29   : > { %s3463_s21 = smov 8192   ;;  %s3464_s22 = smov 512  }
  0x2a   : > { %2301 = dma.hbm_to_vmem [thread:$0]  (!%p3545_p13), %s3541_s25, 65536, %s3549_s27, %s3551_s29, %s3463_s21, %s3463_s21, %s3464_s22  }
  0x2b   : > { %p2281_p9 = scmp.ge.s32.totalorder %s3460_s9, 1  ;;  %p107_p1 = scmp.lt.s32.totalorder %s3460_s9, 3 }
  0x2d   : > { %p108_p3 = pnand %p2281_p9, %p107_p1 }
  0x2e   : > { %s3575_s23 = sand.u32 (!%p108_p3), 1, %s3452_s7   ;;  %p4674_p6 = scmp.ne.s32.totalorder (!%p108_p3), %s4670_s17, 0 }
  0x2f   : > { %111 = sbr.rel (%p108_p3) target bundleno = 595 (0x253), region = 24  ;;  %s2282_s24 = sshll.u32 (!%p108_p3), %s3575_s23, 12 }
  0x30   : > { %s114_s26 = scalar_lea.sflag (!%p108_p3), [#allocation3], %s3575_s23  ;;  %s3581_s30 = scalar_lea.vmem (!%p108_p3), [#allocation2], %s2282_s24 }
  0x34   : > { %3439 = dma.done.wait (%p4674_p6), %s114_s26, 65536  }
  0x35   : > { %3441 = vsyncadd (%p4674_p6), %s114_s26, 4294901760  ;;  %v138_v0 = vld [vmem:[%s3581_s30] sm:$0xff]  ;;  %v139_v1 = vld [vmem:[%s3581_s30 + $0x8] sm:$0xff]  ;;  %s3608_s17 = scalar_lea.vmem [#allocation5], %s2282_s24  ;;  %s2293_s25 = sshll.u32 %s3499_s10, 16 }
  0x36   : > { %v140_v2 = vld [vmem:[%s3581_s30 + $0x10] sm:$0xff]  ;;  %2344 = vlog2.f32 %v138_v0  ;;  %v141_v3 = vld [vmem:[%s3581_s30 + $0x18] sm:$0xff]  ;;  %v142_v4 = vld [vmem:[%s3581_s30 + $0x20] sm:$0xff]  ;;  %s2201_s27 = sshll.u32 %s3608_s17, 4  ;;  %s4617_s2 = scalar_lea.hbm %s4666_s1, %s2293_s25  ;;  %s4619_s27 = int_to_ptr.vmem [resolvable:$true] %s2201_s27 }
  0x37   : > { %2346 = vlog2.f32 %v139_v1  ;;  %v143_v5 = vld [vmem:[%s3581_s30 + $0x28] sm:$0xff]  ;;  %v144_v6 = vld [vmem:[%s3581_s30 + $0x30] sm:$0xff]  ;;  %v145_v7 = vld [vmem:[%s3581_s30 + $0x38] sm:$0xff]  ;;  %s2187_s10 = scalar_lea.sflag [#allocation4], %s3575_s23  ;;  %s3396_s3 = scalar_lea.vmem %s4619_s27, 65536 }
  0x38   : > { %2348 = vlog2.f32 %v140_v2  ;;  %v146_v8 = vld [vmem:[%s3581_s30 + $0x40] sm:$0xff]  ;;  %v147_v9 = vld [vmem:[%s3581_s30 + $0x48] sm:$0xff]  ;;  %v148_v10 = vld [vmem:[%s3581_s30 + $0x50] sm:$0xff]  ;;  %p3397_p11 = scmp.ne.s32.totalorder %s4619_s27, %s3396_s3  ;;  %p4675_p12 = scmp.ne.s32.totalorder %s4671_s18, 0 }
  0x39   : > { %2350 = vlog2.f32 %v141_v3  ;;  %v149_v11 = vld [vmem:[%s3581_s30 + $0x58] sm:$0xff]  ;;  %v150_v12 = vld [vmem:[%s3581_s30 + $0x60] sm:$0xff]  ;;  %v151_v13 = vld [vmem:[%s3581_s30 + $0x68] sm:$0xff]  ;;  %s3465_s4 = smov [#allocation5]  }
  0x3a   : > { %2352 = vlog2.f32 %v142_v4  ;;  %v152_v14 = vld [vmem:[%s3581_s30 + $0x70] sm:$0xff]  ;;  %v153_v15 = vld [vmem:[%s3581_s30 + $0x78] sm:$0xff]  ;;  %v154_v17 = vld [vmem:[%s3581_s30 + $0x80] sm:$0xff]  ;;  %p3398_p13 = pnand %p3397_p11, %p4675_p12  ;;  %s3400_s5 = sshll.u32 %s3465_s4, 4  ;;  %s3401_s5 = int_to_ptr.vmem [resolvable:$false] %s3400_s5 }
  0x3b   : > { %2354 = vlog2.f32 %v143_v5  ;;  %v155_v20 = vld [vmem:[%s3581_s30 + $0x88] sm:$0xff]  ;;  %v156_v23 = vld [vmem:[%s3581_s30 + $0x90] sm:$0xff]  ;;  %v157_v26 = vld [vmem:[%s3581_s30 + $0x98] sm:$0xff]  ;;  %s3402_s11 = scalar_lea.vmem %s3401_s5, 131072  ;;  %p3403_p5 = scmp.lt.s32.totalorder %s4619_s27, %s3401_s5 }
  0x3c   : > { %2356 = vlog2.f32 %v144_v6  ;;  %v158_v29 = vld [vmem:[%s3581_s30 + $0xa0] sm:$0xff]  ;;  %v159_v32 = vld [vmem:[%s3581_s30 + $0xa8] sm:$0xff]  ;;  %v160_v35 = vld [vmem:[%s3581_s30 + $0xb0] sm:$0xff]  ;;  %p3399_p4 = pneg %p3398_p13  ;;  %p3404_p7 = scmp.lt.s32.totalorder %s3402_s11, %s3396_s3 }
  0x3d   : > { %2358 = vlog2.f32 %v145_v7  ;;  %v161_v38 = vld [vmem:[%s3581_s30 + $0xb8] sm:$0xff]  ;;  %v162_v41 = vld [vmem:[%s3581_s30 + $0xc0] sm:$0xff]  ;;  %v163_v44 = vld [vmem:[%s3581_s30 + $0xc8] sm:$0xff] }
  0x3e   : > { %2360 = vlog2.f32 %v146_v8  ;;  %v164_v47 = vld [vmem:[%s3581_s30 + $0xd0] sm:$0xff]  ;;  %v165_v50 = vld [vmem:[%s3581_s30 + $0xd8] sm:$0xff]  ;;  %v166_v53 = vld [vmem:[%s3581_s30 + $0xe0] sm:$0xff]  ;;  %p3405_p8 = por %p3404_p7, %p3403_p5 }
  0x3f   : > { %2362 = vlog2.f32 %v147_v9  ;;  %v167_v56 = vld [vmem:[%s3581_s30 + $0xe8] sm:$0xff]  ;;  %v168_v59 = vld [vmem:[%s3581_s30 + $0xf0] sm:$0xff]  ;;  %v169_v62 = vld [vmem:[%s3581_s30 + $0xf8] sm:$0xff] }
  0x40   : > { %2364 = vlog2.f32 %v148_v10  ;;  %v170_v1 = vld [vmem:[%s3581_s30 + $0x100] sm:$0xff]  ;;  %v171_v4 = vld [vmem:[%s3581_s30 + $0x108] sm:$0xff]  ;;  %v172_v7 = vld [vmem:[%s3581_s30 + $0x110] sm:$0xff]  ;;  %p3406_p10 = pnand %p3405_p8, %p3399_p4 }
  0x41   : > { %2366 = vlog2.f32 %v149_v11  ;;  %v173_v10 = vld [vmem:[%s3581_s30 + $0x118] sm:$0xff] }
  0x42   : > { %2368 = vlog2.f32 %v150_v12 }
  0x43   : > { %v2345_v16 = vpop.eup %2344  ;;  %2370 = vlog2.f32 %v151_v13  ;;  %v174_v13 = vld [vmem:[%s3581_s30 + $0x120] sm:$0xff] }
  0x44   : > { %v2347_v18 = vpop.eup %2346  ;;  %v651_v19 = vmul.f32 0.6931472, %v2345_v16  ;;  %2372 = vlog2.f32 %v152_v14  ;;  %v175_v16 = vld [vmem:[%s3581_s30 + $0x128] sm:$0xff] }
  0x45   : > { %v2349_v21 = vpop.eup %2348  ;;  %v653_v22 = vmul.f32 0.6931472, %v2347_v18  ;;  %2374 = vlog2.f32 %v153_v15 }
  0x46   : > { %v2351_v24 = vpop.eup %2350  ;;  %1674 = vst [vmem:[%s3608_s17] sm:$0xff] %v651_v19  ;;  %v655_v25 = vmul.f32 0.6931472, %v2349_v21  ;;  %2376 = vlog2.f32 %v154_v17  ;;  %v176_v19 = vld [vmem:[%s3581_s30 + $0x130] sm:$0xff] }
  0x47   : > { %v2353_v27 = vpop.eup %2352  ;;  %1675 = vst [vmem:[%s3608_s17 + $0x8] sm:$0xff] %v653_v22  ;;  %v657_v28 = vmul.f32 0.6931472, %v2351_v24  ;;  %2378 = vlog2.f32 %v155_v20  ;;  %v177_v22 = vld [vmem:[%s3581_s30 + $0x138] sm:$0xff] }
  0x48   : > { %v2355_v30 = vpop.eup %2354  ;;  %1676 = vst [vmem:[%s3608_s17 + $0x10] sm:$0xff] %v655_v25  ;;  %v659_v31 = vmul.f32 0.6931472, %v2353_v27  ;;  %2380 = vlog2.f32 %v156_v23  ;;  %v178_v25 = vld [vmem:[%s3581_s30 + $0x140] sm:$0xff] }
  0x49   : > { %v2357_v33 = vpop.eup %2356  ;;  %1677 = vst [vmem:[%s3608_s17 + $0x18] sm:$0xff] %v657_v28  ;;  %v661_v34 = vmul.f32 0.6931472, %v2355_v30  ;;  %2382 = vlog2.f32 %v157_v26  ;;  %v179_v28 = vld [vmem:[%s3581_s30 + $0x148] sm:$0xff] }
  0x4a   : > { %v2359_v36 = vpop.eup %2358  ;;  %1678 = vst [vmem:[%s3608_s17 + $0x20] sm:$0xff] %v659_v31  ;;  %v663_v37 = vmul.f32 0.6931472, %v2357_v33  ;;  %2384 = vlog2.f32 %v158_v29  ;;  %v180_v31 = vld [vmem:[%s3581_s30 + $0x150] sm:$0xff] }
  0x4b   : > { %v2361_v39 = vpop.eup %2360  ;;  %1679 = vst [vmem:[%s3608_s17 + $0x28] sm:$0xff] %v661_v34  ;;  %v665_v40 = vmul.f32 0.6931472, %v2359_v36  ;;  %2386 = vlog2.f32 %v159_v32  ;;  %v181_v34 = vld [vmem:[%s3581_s30 + $0x158] sm:$0xff] }
  0x4c   : > { %v2363_v42 = vpop.eup %2362  ;;  %1680 = vst [vmem:[%s3608_s17 + $0x30] sm:$0xff] %v663_v37  ;;  %v667_v43 = vmul.f32 0.6931472, %v2361_v39  ;;  %2388 = vlog2.f32 %v160_v35  ;;  %v182_v37 = vld [vmem:[%s3581_s30 + $0x160] sm:$0xff] }
  0x4d   : > { %v2365_v45 = vpop.eup %2364  ;;  %1681 = vst [vmem:[%s3608_s17 + $0x38] sm:$0xff] %v665_v40  ;;  %v669_v46 = vmul.f32 0.6931472, %v2363_v42  ;;  %2390 = vlog2.f32 %v161_v38  ;;  %v183_v40 = vld [vmem:[%s3581_s30 + $0x168] sm:$0xff] }
  0x4e   : > { %v2367_v48 = vpop.eup %2366  ;;  %1682 = vst [vmem:[%s3608_s17 + $0x40] sm:$0xff] %v667_v43  ;;  %v671_v49 = vmul.f32 0.6931472, %v2365_v45  ;;  %2392 = vlog2.f32 %v162_v41  ;;  %v184_v43 = vld [vmem:[%s3581_s30 + $0x170] sm:$0xff] }
  0x4f   : > { %v2369_v51 = vpop.eup %2368  ;;  %1683 = vst [vmem:[%s3608_s17 + $0x48] sm:$0xff] %v669_v46  ;;  %v673_v52 = vmul.f32 0.6931472, %v2367_v48  ;;  %2394 = vlog2.f32 %v163_v44  ;;  %v185_v46 = vld [vmem:[%s3581_s30 + $0x178] sm:$0xff] }
  0x50   : > { %v2371_v54 = vpop.eup %2370  ;;  %1684 = vst [vmem:[%s3608_s17 + $0x50] sm:$0xff] %v671_v49  ;;  %v675_v55 = vmul.f32 0.6931472, %v2369_v51  ;;  %2396 = vlog2.f32 %v164_v47  ;;  %v186_v49 = vld [vmem:[%s3581_s30 + $0x180] sm:$0xff] }
  0x51   : > { %v2373_v57 = vpop.eup %2372  ;;  %1685 = vst [vmem:[%s3608_s17 + $0x58] sm:$0xff] %v673_v52  ;;  %v677_v58 = vmul.f32 0.6931472, %v2371_v54  ;;  %2398 = vlog2.f32 %v165_v50  ;;  %v187_v52 = vld [vmem:[%s3581_s30 + $0x188] sm:$0xff] }
  0x52   : > { %v2375_v60 = vpop.eup %2374  ;;  %1686 = vst [vmem:[%s3608_s17 + $0x60] sm:$0xff] %v675_v55  ;;  %v679_v61 = vmul.f32 0.6931472, %v2373_v57  ;;  %2400 = vlog2.f32 %v166_v53  ;;  %v188_v55 = vld [vmem:[%s3581_s30 + $0x190] sm:$0xff] }
  0x53   : > { %v2377_v63 = vpop.eup %2376  ;;  %1687 = vst [vmem:[%s3608_s17 + $0x68] sm:$0xff] %v677_v58  ;;  %v681_v0 = vmul.f32 0.6931472, %v2375_v60  ;;  %2402 = vlog2.f32 %v167_v56  ;;  %v189_v58 = vld [vmem:[%s3581_s30 + $0x198] sm:$0xff] }
  0x54   : > { %v2379_v2 = vpop.eup %2378  ;;  %1688 = vst [vmem:[%s3608_s17 + $0x70] sm:$0xff] %v679_v61  ;;  %v683_v3 = vmul.f32 0.6931472, %v2377_v63  ;;  %2404 = vlog2.f32 %v168_v59  ;;  %v190_v61 = vld [vmem:[%s3581_s30 + $0x1a0] sm:$0xff] }
  0x55   : > { %v2381_v5 = vpop.eup %2380  ;;  %1689 = vst [vmem:[%s3608_s17 + $0x78] sm:$0xff] %v681_v0  ;;  %v685_v6 = vmul.f32 0.6931472, %v2379_v2  ;;  %2406 = vlog2.f32 %v169_v62  ;;  %v191_v0 = vld [vmem:[%s3581_s30 + $0x1a8] sm:$0xff] }
  0x56   : > { %v2383_v8 = vpop.eup %2382  ;;  %1690 = vst [vmem:[%s3608_s17 + $0x80] sm:$0xff] %v683_v3  ;;  %v687_v9 = vmul.f32 0.6931472, %v2381_v5  ;;  %2408 = vlog2.f32 %v170_v1  ;;  %v192_v3 = vld [vmem:[%s3581_s30 + $0x1b0] sm:$0xff] }
  0x57   : > { %v2385_v11 = vpop.eup %2384  ;;  %1691 = vst [vmem:[%s3608_s17 + $0x88] sm:$0xff] %v685_v6  ;;  %v689_v12 = vmul.f32 0.6931472, %v2383_v8  ;;  %2410 = vlog2.f32 %v171_v4  ;;  %v193_v6 = vld [vmem:[%s3581_s30 + $0x1b8] sm:$0xff] }
  0x58   : > { %v2387_v14 = vpop.eup %2386  ;;  %1692 = vst [vmem:[%s3608_s17 + $0x90] sm:$0xff] %v687_v9  ;;  %v691_v15 = vmul.f32 0.6931472, %v2385_v11  ;;  %2412 = vlog2.f32 %v172_v7  ;;  %v194_v9 = vld [vmem:[%s3581_s30 + $0x1c0] sm:$0xff] }
  0x59   : > { %v2389_v17 = vpop.eup %2388  ;;  %1693 = vst [vmem:[%s3608_s17 + $0x98] sm:$0xff] %v689_v12  ;;  %v693_v18 = vmul.f32 0.6931472, %v2387_v14  ;;  %2414 = vlog2.f32 %v173_v10  ;;  %v195_v12 = vld [vmem:[%s3581_s30 + $0x1c8] sm:$0xff] }
  0x5a   : > { %v2391_v20 = vpop.eup %2390  ;;  %1694 = vst [vmem:[%s3608_s17 + $0xa0] sm:$0xff] %v691_v15  ;;  %v695_v21 = vmul.f32 0.6931472, %v2389_v17  ;;  %2416 = vlog2.f32 %v174_v13  ;;  %v196_v15 = vld [vmem:[%s3581_s30 + $0x1d0] sm:$0xff] }
  0x5b   : > { %v2393_v23 = vpop.eup %2392  ;;  %1695 = vst [vmem:[%s3608_s17 + $0xa8] sm:$0xff] %v693_v18  ;;  %v697_v24 = vmul.f32 0.6931472, %v2391_v20  ;;  %2418 = vlog2.f32 %v175_v16  ;;  %v197_v18 = vld [vmem:[%s3581_s30 + $0x1d8] sm:$0xff] }
  0x5c   : > { %v2395_v26 = vpop.eup %2394  ;;  %1696 = vst [vmem:[%s3608_s17 + $0xb0] sm:$0xff] %v695_v21  ;;  %v699_v27 = vmul.f32 0.6931472, %v2393_v23  ;;  %2420 = vlog2.f32 %v176_v19  ;;  %v198_v21 = vld [vmem:[%s3581_s30 + $0x1e0] sm:$0xff] }
  0x5d   : > { %v2397_v29 = vpop.eup %2396  ;;  %1697 = vst [vmem:[%s3608_s17 + $0xb8] sm:$0xff] %v697_v24  ;;  %v701_v30 = vmul.f32 0.6931472, %v2395_v26  ;;  %2422 = vlog2.f32 %v177_v22  ;;  %v199_v24 = vld [vmem:[%s3581_s30 + $0x1e8] sm:$0xff] }
  0x5e   : > { %v2399_v32 = vpop.eup %2398  ;;  %1698 = vst [vmem:[%s3608_s17 + $0xc0] sm:$0xff] %v699_v27  ;;  %v703_v33 = vmul.f32 0.6931472, %v2397_v29  ;;  %2424 = vlog2.f32 %v178_v25  ;;  %v200_v27 = vld [vmem:[%s3581_s30 + $0x1f0] sm:$0xff] }
  0x5f   : > { %v2401_v35 = vpop.eup %2400  ;;  %1699 = vst [vmem:[%s3608_s17 + $0xc8] sm:$0xff] %v701_v30  ;;  %v705_v36 = vmul.f32 0.6931472, %v2399_v32  ;;  %2426 = vlog2.f32 %v179_v28  ;;  %v201_v30 = vld [vmem:[%s3581_s30 + $0x1f8] sm:$0xff] }
  0x60   : > { %v2403_v38 = vpop.eup %2402  ;;  %1700 = vst [vmem:[%s3608_s17 + $0xd0] sm:$0xff] %v703_v33  ;;  %v707_v39 = vmul.f32 0.6931472, %v2401_v35  ;;  %2428 = vlog2.f32 %v180_v31  ;;  %v202_v33 = vld [vmem:[%s3581_s30 + $0x200] sm:$0xff] }
  0x61   : > { %v2405_v41 = vpop.eup %2404  ;;  %1701 = vst [vmem:[%s3608_s17 + $0xd8] sm:$0xff] %v705_v36  ;;  %v709_v42 = vmul.f32 0.6931472, %v2403_v38  ;;  %2430 = vlog2.f32 %v181_v34  ;;  %v203_v36 = vld [vmem:[%s3581_s30 + $0x208] sm:$0xff] }
  0x62   : > { %v2407_v44 = vpop.eup %2406  ;;  %1702 = vst [vmem:[%s3608_s17 + $0xe0] sm:$0xff] %v707_v39  ;;  %v711_v45 = vmul.f32 0.6931472, %v2405_v41  ;;  %2432 = vlog2.f32 %v182_v37  ;;  %v204_v39 = vld [vmem:[%s3581_s30 + $0x210] sm:$0xff] }
  0x63   : > { %v2409_v47 = vpop.eup %2408  ;;  %1703 = vst [vmem:[%s3608_s17 + $0xe8] sm:$0xff] %v709_v42  ;;  %v713_v48 = vmul.f32 0.6931472, %v2407_v44  ;;  %2434 = vlog2.f32 %v183_v40  ;;  %v205_v42 = vld [vmem:[%s3581_s30 + $0x218] sm:$0xff] }
  0x64   : > { %v2411_v50 = vpop.eup %2410  ;;  %1704 = vst [vmem:[%s3608_s17 + $0xf0] sm:$0xff] %v711_v45  ;;  %v715_v51 = vmul.f32 0.6931472, %v2409_v47  ;;  %2436 = vlog2.f32 %v184_v43  ;;  %v206_v45 = vld [vmem:[%s3581_s30 + $0x220] sm:$0xff] }
  0x65   : > { %v2413_v53 = vpop.eup %2412  ;;  %1705 = vst [vmem:[%s3608_s17 + $0xf8] sm:$0xff] %v713_v48  ;;  %v717_v54 = vmul.f32 0.6931472, %v2411_v50  ;;  %2438 = vlog2.f32 %v185_v46  ;;  %v207_v48 = vld [vmem:[%s3581_s30 + $0x228] sm:$0xff] }
  0x66   : > { %v2415_v56 = vpop.eup %2414  ;;  %1706 = vst [vmem:[%s3608_s17 + $0x100] sm:$0xff] %v715_v51  ;;  %v719_v57 = vmul.f32 0.6931472, %v2413_v53  ;;  %2440 = vlog2.f32 %v186_v49  ;;  %v208_v51 = vld [vmem:[%s3581_s30 + $0x230] sm:$0xff] }
  0x67   : > { %v2417_v59 = vpop.eup %2416  ;;  %1707 = vst [vmem:[%s3608_s17 + $0x108] sm:$0xff] %v717_v54  ;;  %v721_v60 = vmul.f32 0.6931472, %v2415_v56  ;;  %2442 = vlog2.f32 %v187_v52  ;;  %v209_v54 = vld [vmem:[%s3581_s30 + $0x238] sm:$0xff] }
  0x68   : > { %v2419_v62 = vpop.eup %2418  ;;  %1708 = vst [vmem:[%s3608_s17 + $0x110] sm:$0xff] %v719_v57  ;;  %v723_v63 = vmul.f32 0.6931472, %v2417_v59  ;;  %2444 = vlog2.f32 %v188_v55  ;;  %v210_v57 = vld [vmem:[%s3581_s30 + $0x240] sm:$0xff] }
  0x69   : > { %v2421_v1 = vpop.eup %2420  ;;  %1709 = vst [vmem:[%s3608_s17 + $0x118] sm:$0xff] %v721_v60  ;;  %v725_v2 = vmul.f32 0.6931472, %v2419_v62  ;;  %2446 = vlog2.f32 %v189_v58  ;;  %v211_v60 = vld [vmem:[%s3581_s30 + $0x248] sm:$0xff] }
  0x6a   : > { %v2423_v4 = vpop.eup %2422  ;;  %1710 = vst [vmem:[%s3608_s17 + $0x120] sm:$0xff] %v723_v63  ;;  %v727_v5 = vmul.f32 0.6931472, %v2421_v1  ;;  %2448 = vlog2.f32 %v190_v61  ;;  %v212_v63 = vld [vmem:[%s3581_s30 + $0x250] sm:$0xff] }
  0x6b   : > { %v2425_v7 = vpop.eup %2424  ;;  %1711 = vst [vmem:[%s3608_s17 + $0x128] sm:$0xff] %v725_v2  ;;  %v729_v8 = vmul.f32 0.6931472, %v2423_v4  ;;  %2450 = vlog2.f32 %v191_v0  ;;  %v213_v2 = vld [vmem:[%s3581_s30 + $0x258] sm:$0xff] }
  0x6c   : > { %v2427_v10 = vpop.eup %2426  ;;  %1712 = vst [vmem:[%s3608_s17 + $0x130] sm:$0xff] %v727_v5  ;;  %v731_v11 = vmul.f32 0.6931472, %v2425_v7  ;;  %2452 = vlog2.f32 %v192_v3  ;;  %v214_v5 = vld [vmem:[%s3581_s30 + $0x260] sm:$0xff] }
  0x6d   : > { %v2429_v13 = vpop.eup %2428  ;;  %1713 = vst [vmem:[%s3608_s17 + $0x138] sm:$0xff] %v729_v8  ;;  %v733_v14 = vmul.f32 0.6931472, %v2427_v10  ;;  %2454 = vlog2.f32 %v193_v6  ;;  %v215_v8 = vld [vmem:[%s3581_s30 + $0x268] sm:$0xff] }
  0x6e   : > { %v2431_v16 = vpop.eup %2430  ;;  %1714 = vst [vmem:[%s3608_s17 + $0x140] sm:$0xff] %v731_v11  ;;  %v735_v17 = vmul.f32 0.6931472, %v2429_v13  ;;  %2456 = vlog2.f32 %v194_v9  ;;  %v216_v11 = vld [vmem:[%s3581_s30 + $0x270] sm:$0xff] }
  0x6f   : > { %v2433_v19 = vpop.eup %2432  ;;  %1715 = vst [vmem:[%s3608_s17 + $0x148] sm:$0xff] %v733_v14  ;;  %v737_v20 = vmul.f32 0.6931472, %v2431_v16  ;;  %2458 = vlog2.f32 %v195_v12  ;;  %v217_v14 = vld [vmem:[%s3581_s30 + $0x278] sm:$0xff] }
  0x70   : > { %v2435_v22 = vpop.eup %2434  ;;  %1716 = vst [vmem:[%s3608_s17 + $0x150] sm:$0xff] %v735_v17  ;;  %v739_v23 = vmul.f32 0.6931472, %v2433_v19  ;;  %2460 = vlog2.f32 %v196_v15  ;;  %v218_v17 = vld [vmem:[%s3581_s30 + $0x280] sm:$0xff] }
  0x71   : > { %v2437_v25 = vpop.eup %2436  ;;  %1717 = vst [vmem:[%s3608_s17 + $0x158] sm:$0xff] %v737_v20  ;;  %v741_v26 = vmul.f32 0.6931472, %v2435_v22  ;;  %2462 = vlog2.f32 %v197_v18  ;;  %v219_v20 = vld [vmem:[%s3581_s30 + $0x288] sm:$0xff] }
  0x72   : > { %v2439_v28 = vpop.eup %2438  ;;  %1718 = vst [vmem:[%s3608_s17 + $0x160] sm:$0xff] %v739_v23  ;;  %v743_v29 = vmul.f32 0.6931472, %v2437_v25  ;;  %2464 = vlog2.f32 %v198_v21  ;;  %v220_v23 = vld [vmem:[%s3581_s30 + $0x290] sm:$0xff] }
  0x73   : > { %v2441_v31 = vpop.eup %2440  ;;  %1719 = vst [vmem:[%s3608_s17 + $0x168] sm:$0xff] %v741_v26  ;;  %v745_v32 = vmul.f32 0.6931472, %v2439_v28  ;;  %2466 = vlog2.f32 %v199_v24  ;;  %v221_v26 = vld [vmem:[%s3581_s30 + $0x298] sm:$0xff] }
  0x74   : > { %v2443_v34 = vpop.eup %2442  ;;  %1720 = vst [vmem:[%s3608_s17 + $0x170] sm:$0xff] %v743_v29  ;;  %v747_v35 = vmul.f32 0.6931472, %v2441_v31  ;;  %2468 = vlog2.f32 %v200_v27  ;;  %v222_v29 = vld [vmem:[%s3581_s30 + $0x2a0] sm:$0xff] }
  0x75   : > { %v2445_v37 = vpop.eup %2444  ;;  %1721 = vst [vmem:[%s3608_s17 + $0x178] sm:$0xff] %v745_v32  ;;  %v749_v38 = vmul.f32 0.6931472, %v2443_v34  ;;  %2470 = vlog2.f32 %v201_v30  ;;  %v223_v32 = vld [vmem:[%s3581_s30 + $0x2a8] sm:$0xff] }
  0x76   : > { %v2447_v40 = vpop.eup %2446  ;;  %1722 = vst [vmem:[%s3608_s17 + $0x180] sm:$0xff] %v747_v35  ;;  %v751_v41 = vmul.f32 0.6931472, %v2445_v37  ;;  %2472 = vlog2.f32 %v202_v33  ;;  %v224_v35 = vld [vmem:[%s3581_s30 + $0x2b0] sm:$0xff] }
  0x77   : > { %v2449_v43 = vpop.eup %2448  ;;  %1723 = vst [vmem:[%s3608_s17 + $0x188] sm:$0xff] %v749_v38  ;;  %v753_v44 = vmul.f32 0.6931472, %v2447_v40  ;;  %2474 = vlog2.f32 %v203_v36  ;;  %v225_v38 = vld [vmem:[%s3581_s30 + $0x2b8] sm:$0xff] }
  0x78   : > { %v2451_v46 = vpop.eup %2450  ;;  %1724 = vst [vmem:[%s3608_s17 + $0x190] sm:$0xff] %v751_v41  ;;  %v755_v47 = vmul.f32 0.6931472, %v2449_v43  ;;  %2476 = vlog2.f32 %v204_v39  ;;  %v226_v41 = vld [vmem:[%s3581_s30 + $0x2c0] sm:$0xff] }
  0x79   : > { %v2453_v49 = vpop.eup %2452  ;;  %1725 = vst [vmem:[%s3608_s17 + $0x198] sm:$0xff] %v753_v44  ;;  %v757_v50 = vmul.f32 0.6931472, %v2451_v46  ;;  %2478 = vlog2.f32 %v205_v42  ;;  %v227_v44 = vld [vmem:[%s3581_s30 + $0x2c8] sm:$0xff] }
  0x7a   : > { %v2455_v52 = vpop.eup %2454  ;;  %1726 = vst [vmem:[%s3608_s17 + $0x1a0] sm:$0xff] %v755_v47  ;;  %v759_v53 = vmul.f32 0.6931472, %v2453_v49  ;;  %2480 = vlog2.f32 %v206_v45  ;;  %v228_v47 = vld [vmem:[%s3581_s30 + $0x2d0] sm:$0xff] }
  0x7b   : > { %v2457_v55 = vpop.eup %2456  ;;  %1727 = vst [vmem:[%s3608_s17 + $0x1a8] sm:$0xff] %v757_v50  ;;  %v761_v56 = vmul.f32 0.6931472, %v2455_v52  ;;  %2482 = vlog2.f32 %v207_v48  ;;  %v229_v50 = vld [vmem:[%s3581_s30 + $0x2d8] sm:$0xff] }
  0x7c   : > { %v2459_v58 = vpop.eup %2458  ;;  %1728 = vst [vmem:[%s3608_s17 + $0x1b0] sm:$0xff] %v759_v53  ;;  %v763_v59 = vmul.f32 0.6931472, %v2457_v55  ;;  %2484 = vlog2.f32 %v208_v51  ;;  %v230_v53 = vld [vmem:[%s3581_s30 + $0x2e0] sm:$0xff] }
  0x7d   : > { %v2461_v61 = vpop.eup %2460  ;;  %1729 = vst [vmem:[%s3608_s17 + $0x1b8] sm:$0xff] %v761_v56  ;;  %v765_v62 = vmul.f32 0.6931472, %v2459_v58  ;;  %2486 = vlog2.f32 %v209_v54  ;;  %v231_v56 = vld [vmem:[%s3581_s30 + $0x2e8] sm:$0xff] }
  0x7e   : > { %v2463_v0 = vpop.eup %2462  ;;  %1730 = vst [vmem:[%s3608_s17 + $0x1c0] sm:$0xff] %v763_v59  ;;  %v767_v1 = vmul.f32 0.6931472, %v2461_v61  ;;  %2488 = vlog2.f32 %v210_v57  ;;  %v232_v59 = vld [vmem:[%s3581_s30 + $0x2f0] sm:$0xff] }
  0x7f   : > { %v2465_v3 = vpop.eup %2464  ;;  %1731 = vst [vmem:[%s3608_s17 + $0x1c8] sm:$0xff] %v765_v62  ;;  %v769_v4 = vmul.f32 0.6931472, %v2463_v0  ;;  %2490 = vlog2.f32 %v211_v60  ;;  %v233_v62 = vld [vmem:[%s3581_s30 + $0x2f8] sm:$0xff] }
  0x80   : > { %v2467_v6 = vpop.eup %2466  ;;  %1732 = vst [vmem:[%s3608_s17 + $0x1d0] sm:$0xff] %v767_v1  ;;  %v771_v7 = vmul.f32 0.6931472, %v2465_v3  ;;  %2492 = vlog2.f32 %v212_v63  ;;  %v234_v1 = vld [vmem:[%s3581_s30 + $0x300] sm:$0xff] }
  0x81   : > { %v2469_v9 = vpop.eup %2468  ;;  %1733 = vst [vmem:[%s3608_s17 + $0x1d8] sm:$0xff] %v769_v4  ;;  %v773_v10 = vmul.f32 0.6931472, %v2467_v6  ;;  %2494 = vlog2.f32 %v213_v2  ;;  %v235_v4 = vld [vmem:[%s3581_s30 + $0x308] sm:$0xff] }
  0x82   : > { %v2471_v12 = vpop.eup %2470  ;;  %1734 = vst [vmem:[%s3608_s17 + $0x1e0] sm:$0xff] %v771_v7  ;;  %v775_v13 = vmul.f32 0.6931472, %v2469_v9  ;;  %2496 = vlog2.f32 %v214_v5  ;;  %v236_v7 = vld [vmem:[%s3581_s30 + $0x310] sm:$0xff] }
  0x83   : > { %v2473_v15 = vpop.eup %2472  ;;  %1735 = vst [vmem:[%s3608_s17 + $0x1e8] sm:$0xff] %v773_v10  ;;  %v777_v16 = vmul.f32 0.6931472, %v2471_v12  ;;  %2498 = vlog2.f32 %v215_v8  ;;  %v237_v10 = vld [vmem:[%s3581_s30 + $0x318] sm:$0xff] }
  0x84   : > { %v2475_v18 = vpop.eup %2474  ;;  %1736 = vst [vmem:[%s3608_s17 + $0x1f0] sm:$0xff] %v775_v13  ;;  %v779_v19 = vmul.f32 0.6931472, %v2473_v15  ;;  %2500 = vlog2.f32 %v216_v11  ;;  %v238_v13 = vld [vmem:[%s3581_s30 + $0x320] sm:$0xff] }
  0x85   : > { %v2477_v21 = vpop.eup %2476  ;;  %1737 = vst [vmem:[%s3608_s17 + $0x1f8] sm:$0xff] %v777_v16  ;;  %v781_v22 = vmul.f32 0.6931472, %v2475_v18  ;;  %2502 = vlog2.f32 %v217_v14  ;;  %v239_v16 = vld [vmem:[%s3581_s30 + $0x328] sm:$0xff] }
  0x86   : > { %v2479_v24 = vpop.eup %2478  ;;  %1738 = vst [vmem:[%s3608_s17 + $0x200] sm:$0xff] %v779_v19  ;;  %v783_v25 = vmul.f32 0.6931472, %v2477_v21  ;;  %2504 = vlog2.f32 %v218_v17  ;;  %v240_v19 = vld [vmem:[%s3581_s30 + $0x330] sm:$0xff] }
  0x87   : > { %v2481_v27 = vpop.eup %2480  ;;  %1739 = vst [vmem:[%s3608_s17 + $0x208] sm:$0xff] %v781_v22  ;;  %v785_v28 = vmul.f32 0.6931472, %v2479_v24  ;;  %2506 = vlog2.f32 %v219_v20  ;;  %v241_v22 = vld [vmem:[%s3581_s30 + $0x338] sm:$0xff] }
  0x88   : > { %v2483_v30 = vpop.eup %2482  ;;  %1740 = vst [vmem:[%s3608_s17 + $0x210] sm:$0xff] %v783_v25  ;;  %v787_v31 = vmul.f32 0.6931472, %v2481_v27  ;;  %2508 = vlog2.f32 %v220_v23  ;;  %v242_v25 = vld [vmem:[%s3581_s30 + $0x340] sm:$0xff] }
  0x89   : > { %v2485_v33 = vpop.eup %2484  ;;  %1741 = vst [vmem:[%s3608_s17 + $0x218] sm:$0xff] %v785_v28  ;;  %v789_v34 = vmul.f32 0.6931472, %v2483_v30  ;;  %2510 = vlog2.f32 %v221_v26  ;;  %v243_v28 = vld [vmem:[%s3581_s30 + $0x348] sm:$0xff] }
  0x8a   : > { %v2487_v36 = vpop.eup %2486  ;;  %1742 = vst [vmem:[%s3608_s17 + $0x220] sm:$0xff] %v787_v31  ;;  %v791_v37 = vmul.f32 0.6931472, %v2485_v33  ;;  %2512 = vlog2.f32 %v222_v29  ;;  %v244_v31 = vld [vmem:[%s3581_s30 + $0x350] sm:$0xff] }
  0x8b   : > { %v2489_v39 = vpop.eup %2488  ;;  %1743 = vst [vmem:[%s3608_s17 + $0x228] sm:$0xff] %v789_v34  ;;  %v793_v40 = vmul.f32 0.6931472, %v2487_v36  ;;  %2514 = vlog2.f32 %v223_v32  ;;  %v245_v34 = vld [vmem:[%s3581_s30 + $0x358] sm:$0xff] }
  0x8c   : > { %v2491_v42 = vpop.eup %2490  ;;  %1744 = vst [vmem:[%s3608_s17 + $0x230] sm:$0xff] %v791_v37  ;;  %v795_v43 = vmul.f32 0.6931472, %v2489_v39  ;;  %2516 = vlog2.f32 %v224_v35  ;;  %v246_v37 = vld [vmem:[%s3581_s30 + $0x360] sm:$0xff] }
  0x8d   : > { %v2493_v45 = vpop.eup %2492  ;;  %1745 = vst [vmem:[%s3608_s17 + $0x238] sm:$0xff] %v793_v40  ;;  %v797_v46 = vmul.f32 0.6931472, %v2491_v42  ;;  %2518 = vlog2.f32 %v225_v38  ;;  %v247_v40 = vld [vmem:[%s3581_s30 + $0x368] sm:$0xff] }
  0x8e   : > { %v2495_v48 = vpop.eup %2494  ;;  %1746 = vst [vmem:[%s3608_s17 + $0x240] sm:$0xff] %v795_v43  ;;  %v799_v49 = vmul.f32 0.6931472, %v2493_v45  ;;  %2520 = vlog2.f32 %v226_v41  ;;  %v248_v43 = vld [vmem:[%s3581_s30 + $0x370] sm:$0xff] }
  0x8f   : > { %v2497_v51 = vpop.eup %2496  ;;  %1747 = vst [vmem:[%s3608_s17 + $0x248] sm:$0xff] %v797_v46  ;;  %v801_v52 = vmul.f32 0.6931472, %v2495_v48  ;;  %2522 = vlog2.f32 %v227_v44  ;;  %v249_v46 = vld [vmem:[%s3581_s30 + $0x378] sm:$0xff] }
  0x90   : > { %v2499_v54 = vpop.eup %2498  ;;  %1748 = vst [vmem:[%s3608_s17 + $0x250] sm:$0xff] %v799_v49  ;;  %v803_v55 = vmul.f32 0.6931472, %v2497_v51  ;;  %2524 = vlog2.f32 %v228_v47  ;;  %v250_v49 = vld [vmem:[%s3581_s30 + $0x380] sm:$0xff] }
  0x91   : > { %v2501_v57 = vpop.eup %2500  ;;  %1749 = vst [vmem:[%s3608_s17 + $0x258] sm:$0xff] %v801_v52  ;;  %v805_v58 = vmul.f32 0.6931472, %v2499_v54  ;;  %2526 = vlog2.f32 %v229_v50  ;;  %v251_v52 = vld [vmem:[%s3581_s30 + $0x388] sm:$0xff] }
  0x92   : > { %v2503_v60 = vpop.eup %2502  ;;  %1750 = vst [vmem:[%s3608_s17 + $0x260] sm:$0xff] %v803_v55  ;;  %v807_v61 = vmul.f32 0.6931472, %v2501_v57  ;;  %2528 = vlog2.f32 %v230_v53  ;;  %v252_v55 = vld [vmem:[%s3581_s30 + $0x390] sm:$0xff] }
  0x93   : > { %v2505_v63 = vpop.eup %2504  ;;  %1751 = vst [vmem:[%s3608_s17 + $0x268] sm:$0xff] %v805_v58  ;;  %v809_v0 = vmul.f32 0.6931472, %v2503_v60  ;;  %2530 = vlog2.f32 %v231_v56  ;;  %v253_v58 = vld [vmem:[%s3581_s30 + $0x398] sm:$0xff] }
  0x94   : > { %v2507_v2 = vpop.eup %2506  ;;  %1752 = vst [vmem:[%s3608_s17 + $0x270] sm:$0xff] %v807_v61  ;;  %v811_v3 = vmul.f32 0.6931472, %v2505_v63  ;;  %2532 = vlog2.f32 %v232_v59  ;;  %v254_v61 = vld [vmem:[%s3581_s30 + $0x3a0] sm:$0xff] }
  0x95   : > { %v2509_v5 = vpop.eup %2508  ;;  %1753 = vst [vmem:[%s3608_s17 + $0x278] sm:$0xff] %v809_v0  ;;  %v813_v6 = vmul.f32 0.6931472, %v2507_v2  ;;  %2534 = vlog2.f32 %v233_v62  ;;  %v255_v0 = vld [vmem:[%s3581_s30 + $0x3a8] sm:$0xff] }
  0x96   : > { %v2511_v8 = vpop.eup %2510  ;;  %1754 = vst [vmem:[%s3608_s17 + $0x280] sm:$0xff] %v811_v3  ;;  %v815_v9 = vmul.f32 0.6931472, %v2509_v5  ;;  %2536 = vlog2.f32 %v234_v1  ;;  %v256_v3 = vld [vmem:[%s3581_s30 + $0x3b0] sm:$0xff] }
  0x97   : > { %v2513_v11 = vpop.eup %2512  ;;  %1755 = vst [vmem:[%s3608_s17 + $0x288] sm:$0xff] %v813_v6  ;;  %v817_v12 = vmul.f32 0.6931472, %v2511_v8  ;;  %2538 = vlog2.f32 %v235_v4  ;;  %v257_v6 = vld [vmem:[%s3581_s30 + $0x3b8] sm:$0xff] }
  0x98   : > { %v2515_v14 = vpop.eup %2514  ;;  %1756 = vst [vmem:[%s3608_s17 + $0x290] sm:$0xff] %v815_v9  ;;  %v819_v15 = vmul.f32 0.6931472, %v2513_v11  ;;  %2540 = vlog2.f32 %v236_v7  ;;  %v258_v9 = vld [vmem:[%s3581_s30 + $0x3c0] sm:$0xff] }
  0x99   : > { %v2517_v17 = vpop.eup %2516  ;;  %1757 = vst [vmem:[%s3608_s17 + $0x298] sm:$0xff] %v817_v12  ;;  %v821_v18 = vmul.f32 0.6931472, %v2515_v14  ;;  %2542 = vlog2.f32 %v237_v10  ;;  %v259_v12 = vld [vmem:[%s3581_s30 + $0x3c8] sm:$0xff] }
  0x9a   : > { %v2519_v20 = vpop.eup %2518  ;;  %1758 = vst [vmem:[%s3608_s17 + $0x2a0] sm:$0xff] %v819_v15  ;;  %v823_v21 = vmul.f32 0.6931472, %v2517_v17  ;;  %2544 = vlog2.f32 %v238_v13  ;;  %v260_v15 = vld [vmem:[%s3581_s30 + $0x3d0] sm:$0xff] }
  0x9b   : > { %v2521_v23 = vpop.eup %2520  ;;  %1759 = vst [vmem:[%s3608_s17 + $0x2a8] sm:$0xff] %v821_v18  ;;  %v825_v24 = vmul.f32 0.6931472, %v2519_v20  ;;  %2546 = vlog2.f32 %v239_v16  ;;  %v261_v18 = vld [vmem:[%s3581_s30 + $0x3d8] sm:$0xff] }
  0x9c   : > { %v2523_v26 = vpop.eup %2522  ;;  %1760 = vst [vmem:[%s3608_s17 + $0x2b0] sm:$0xff] %v823_v21  ;;  %v827_v27 = vmul.f32 0.6931472, %v2521_v23  ;;  %2548 = vlog2.f32 %v240_v19  ;;  %v262_v21 = vld [vmem:[%s3581_s30 + $0x3e0] sm:$0xff] }
  0x9d   : > { %v2525_v29 = vpop.eup %2524  ;;  %1761 = vst [vmem:[%s3608_s17 + $0x2b8] sm:$0xff] %v825_v24  ;;  %v829_v30 = vmul.f32 0.6931472, %v2523_v26  ;;  %2550 = vlog2.f32 %v241_v22  ;;  %v263_v24 = vld [vmem:[%s3581_s30 + $0x3e8] sm:$0xff] }
  0x9e   : > { %v2527_v32 = vpop.eup %2526  ;;  %1762 = vst [vmem:[%s3608_s17 + $0x2c0] sm:$0xff] %v827_v27  ;;  %v831_v33 = vmul.f32 0.6931472, %v2525_v29  ;;  %2552 = vlog2.f32 %v242_v25  ;;  %v264_v27 = vld [vmem:[%s3581_s30 + $0x3f0] sm:$0xff] }
  0x9f   : > { %v2529_v35 = vpop.eup %2528  ;;  %1763 = vst [vmem:[%s3608_s17 + $0x2c8] sm:$0xff] %v829_v30  ;;  %v833_v36 = vmul.f32 0.6931472, %v2527_v32  ;;  %2554 = vlog2.f32 %v243_v28  ;;  %v265_v30 = vld [vmem:[%s3581_s30 + $0x3f8] sm:$0xff] }
  0xa0   : > { %v2531_v38 = vpop.eup %2530  ;;  %1764 = vst [vmem:[%s3608_s17 + $0x2d0] sm:$0xff] %v831_v33  ;;  %v835_v39 = vmul.f32 0.6931472, %v2529_v35  ;;  %2556 = vlog2.f32 %v244_v31  ;;  %v266_v33 = vld [vmem:[%s3581_s30 + $0x400] sm:$0xff] }
  0xa1   : > { %v2533_v41 = vpop.eup %2532  ;;  %1765 = vst [vmem:[%s3608_s17 + $0x2d8] sm:$0xff] %v833_v36  ;;  %v837_v42 = vmul.f32 0.6931472, %v2531_v38  ;;  %2558 = vlog2.f32 %v245_v34  ;;  %v267_v36 = vld [vmem:[%s3581_s30 + $0x408] sm:$0xff] }
  0xa2   : > { %v2535_v44 = vpop.eup %2534  ;;  %1766 = vst [vmem:[%s3608_s17 + $0x2e0] sm:$0xff] %v835_v39  ;;  %v839_v45 = vmul.f32 0.6931472, %v2533_v41  ;;  %2560 = vlog2.f32 %v246_v37  ;;  %v268_v39 = vld [vmem:[%s3581_s30 + $0x410] sm:$0xff] }
  0xa3   : > { %v2537_v47 = vpop.eup %2536  ;;  %1767 = vst [vmem:[%s3608_s17 + $0x2e8] sm:$0xff] %v837_v42  ;;  %v841_v48 = vmul.f32 0.6931472, %v2535_v44  ;;  %2562 = vlog2.f32 %v247_v40  ;;  %v269_v42 = vld [vmem:[%s3581_s30 + $0x418] sm:$0xff] }
  0xa4   : > { %v2539_v50 = vpop.eup %2538  ;;  %1768 = vst [vmem:[%s3608_s17 + $0x2f0] sm:$0xff] %v839_v45  ;;  %v843_v51 = vmul.f32 0.6931472, %v2537_v47  ;;  %2564 = vlog2.f32 %v248_v43  ;;  %v270_v45 = vld [vmem:[%s3581_s30 + $0x420] sm:$0xff] }
  0xa5   : > { %v2541_v53 = vpop.eup %2540  ;;  %1769 = vst [vmem:[%s3608_s17 + $0x2f8] sm:$0xff] %v841_v48  ;;  %v845_v54 = vmul.f32 0.6931472, %v2539_v50  ;;  %2566 = vlog2.f32 %v249_v46  ;;  %v271_v48 = vld [vmem:[%s3581_s30 + $0x428] sm:$0xff] }
  0xa6   : > { %v2543_v56 = vpop.eup %2542  ;;  %1770 = vst [vmem:[%s3608_s17 + $0x300] sm:$0xff] %v843_v51  ;;  %v847_v57 = vmul.f32 0.6931472, %v2541_v53  ;;  %2568 = vlog2.f32 %v250_v49  ;;  %v272_v51 = vld [vmem:[%s3581_s30 + $0x430] sm:$0xff] }
  0xa7   : > { %v2545_v59 = vpop.eup %2544  ;;  %1771 = vst [vmem:[%s3608_s17 + $0x308] sm:$0xff] %v845_v54  ;;  %v849_v60 = vmul.f32 0.6931472, %v2543_v56  ;;  %2570 = vlog2.f32 %v251_v52  ;;  %v273_v54 = vld [vmem:[%s3581_s30 + $0x438] sm:$0xff] }
  0xa8   : > { %v2547_v62 = vpop.eup %2546  ;;  %1772 = vst [vmem:[%s3608_s17 + $0x310] sm:$0xff] %v847_v57  ;;  %v851_v63 = vmul.f32 0.6931472, %v2545_v59  ;;  %2572 = vlog2.f32 %v252_v55  ;;  %v274_v57 = vld [vmem:[%s3581_s30 + $0x440] sm:$0xff] }
  0xa9   : > { %v2549_v1 = vpop.eup %2548  ;;  %1773 = vst [vmem:[%s3608_s17 + $0x318] sm:$0xff] %v849_v60  ;;  %v853_v2 = vmul.f32 0.6931472, %v2547_v62  ;;  %2574 = vlog2.f32 %v253_v58  ;;  %v275_v60 = vld [vmem:[%s3581_s30 + $0x448] sm:$0xff] }
  0xaa   : > { %v2551_v4 = vpop.eup %2550  ;;  %1774 = vst [vmem:[%s3608_s17 + $0x320] sm:$0xff] %v851_v63  ;;  %v855_v5 = vmul.f32 0.6931472, %v2549_v1  ;;  %2576 = vlog2.f32 %v254_v61  ;;  %v276_v63 = vld [vmem:[%s3581_s30 + $0x450] sm:$0xff] }
  0xab   : > { %v2553_v7 = vpop.eup %2552  ;;  %1775 = vst [vmem:[%s3608_s17 + $0x328] sm:$0xff] %v853_v2  ;;  %v857_v8 = vmul.f32 0.6931472, %v2551_v4  ;;  %2578 = vlog2.f32 %v255_v0  ;;  %v277_v2 = vld [vmem:[%s3581_s30 + $0x458] sm:$0xff] }
  0xac   : > { %v2555_v10 = vpop.eup %2554  ;;  %1776 = vst [vmem:[%s3608_s17 + $0x330] sm:$0xff] %v855_v5  ;;  %v859_v11 = vmul.f32 0.6931472, %v2553_v7  ;;  %2580 = vlog2.f32 %v256_v3  ;;  %v278_v5 = vld [vmem:[%s3581_s30 + $0x460] sm:$0xff] }
  0xad   : > { %v2557_v13 = vpop.eup %2556  ;;  %1777 = vst [vmem:[%s3608_s17 + $0x338] sm:$0xff] %v857_v8  ;;  %v861_v14 = vmul.f32 0.6931472, %v2555_v10  ;;  %2582 = vlog2.f32 %v257_v6  ;;  %v279_v8 = vld [vmem:[%s3581_s30 + $0x468] sm:$0xff] }
  0xae   : > { %v2559_v16 = vpop.eup %2558  ;;  %1778 = vst [vmem:[%s3608_s17 + $0x340] sm:$0xff] %v859_v11  ;;  %v863_v17 = vmul.f32 0.6931472, %v2557_v13  ;;  %2584 = vlog2.f32 %v258_v9  ;;  %v280_v11 = vld [vmem:[%s3581_s30 + $0x470] sm:$0xff] }
  0xaf   : > { %v2561_v19 = vpop.eup %2560  ;;  %1779 = vst [vmem:[%s3608_s17 + $0x348] sm:$0xff] %v861_v14  ;;  %v865_v20 = vmul.f32 0.6931472, %v2559_v16  ;;  %2586 = vlog2.f32 %v259_v12  ;;  %v281_v14 = vld [vmem:[%s3581_s30 + $0x478] sm:$0xff] }
  0xb0   : > { %v2563_v22 = vpop.eup %2562  ;;  %1780 = vst [vmem:[%s3608_s17 + $0x350] sm:$0xff] %v863_v17  ;;  %v867_v23 = vmul.f32 0.6931472, %v2561_v19  ;;  %2588 = vlog2.f32 %v260_v15  ;;  %v282_v17 = vld [vmem:[%s3581_s30 + $0x480] sm:$0xff] }
  0xb1   : > { %v2565_v25 = vpop.eup %2564  ;;  %1781 = vst [vmem:[%s3608_s17 + $0x358] sm:$0xff] %v865_v20  ;;  %v869_v26 = vmul.f32 0.6931472, %v2563_v22  ;;  %2590 = vlog2.f32 %v261_v18  ;;  %v283_v20 = vld [vmem:[%s3581_s30 + $0x488] sm:$0xff] }
  0xb2   : > { %v2567_v28 = vpop.eup %2566  ;;  %1782 = vst [vmem:[%s3608_s17 + $0x360] sm:$0xff] %v867_v23  ;;  %v871_v29 = vmul.f32 0.6931472, %v2565_v25  ;;  %2592 = vlog2.f32 %v262_v21  ;;  %v284_v23 = vld [vmem:[%s3581_s30 + $0x490] sm:$0xff] }
  0xb3   : > { %v2569_v31 = vpop.eup %2568  ;;  %1783 = vst [vmem:[%s3608_s17 + $0x368] sm:$0xff] %v869_v26  ;;  %v873_v32 = vmul.f32 0.6931472, %v2567_v28  ;;  %2594 = vlog2.f32 %v263_v24  ;;  %v285_v26 = vld [vmem:[%s3581_s30 + $0x498] sm:$0xff] }
  0xb4   : > { %v2571_v34 = vpop.eup %2570  ;;  %1784 = vst [vmem:[%s3608_s17 + $0x370] sm:$0xff] %v871_v29  ;;  %v875_v35 = vmul.f32 0.6931472, %v2569_v31  ;;  %2596 = vlog2.f32 %v264_v27  ;;  %v286_v29 = vld [vmem:[%s3581_s30 + $0x4a0] sm:$0xff] }
  0xb5   : > { %v2573_v37 = vpop.eup %2572  ;;  %1785 = vst [vmem:[%s3608_s17 + $0x378] sm:$0xff] %v873_v32  ;;  %v877_v38 = vmul.f32 0.6931472, %v2571_v34  ;;  %2598 = vlog2.f32 %v265_v30  ;;  %v287_v32 = vld [vmem:[%s3581_s30 + $0x4a8] sm:$0xff] }
  0xb6   : > { %v2575_v40 = vpop.eup %2574  ;;  %1786 = vst [vmem:[%s3608_s17 + $0x380] sm:$0xff] %v875_v35  ;;  %v879_v41 = vmul.f32 0.6931472, %v2573_v37  ;;  %2600 = vlog2.f32 %v266_v33  ;;  %v288_v35 = vld [vmem:[%s3581_s30 + $0x4b0] sm:$0xff] }
  0xb7   : > { %v2577_v43 = vpop.eup %2576  ;;  %1787 = vst [vmem:[%s3608_s17 + $0x388] sm:$0xff] %v877_v38  ;;  %v881_v44 = vmul.f32 0.6931472, %v2575_v40  ;;  %2602 = vlog2.f32 %v267_v36  ;;  %v289_v38 = vld [vmem:[%s3581_s30 + $0x4b8] sm:$0xff] }
  0xb8   : > { %v2579_v46 = vpop.eup %2578  ;;  %1788 = vst [vmem:[%s3608_s17 + $0x390] sm:$0xff] %v879_v41  ;;  %v883_v47 = vmul.f32 0.6931472, %v2577_v43  ;;  %2604 = vlog2.f32 %v268_v39  ;;  %v290_v41 = vld [vmem:[%s3581_s30 + $0x4c0] sm:$0xff] }
  0xb9   : > { %v2581_v49 = vpop.eup %2580  ;;  %1789 = vst [vmem:[%s3608_s17 + $0x398] sm:$0xff] %v881_v44  ;;  %v885_v50 = vmul.f32 0.6931472, %v2579_v46  ;;  %2606 = vlog2.f32 %v269_v42  ;;  %v291_v44 = vld [vmem:[%s3581_s30 + $0x4c8] sm:$0xff] }
  0xba   : > { %v2583_v52 = vpop.eup %2582  ;;  %1790 = vst [vmem:[%s3608_s17 + $0x3a0] sm:$0xff] %v883_v47  ;;  %v887_v53 = vmul.f32 0.6931472, %v2581_v49  ;;  %2608 = vlog2.f32 %v270_v45  ;;  %v292_v47 = vld [vmem:[%s3581_s30 + $0x4d0] sm:$0xff] }
  0xbb   : > { %v2585_v55 = vpop.eup %2584  ;;  %1791 = vst [vmem:[%s3608_s17 + $0x3a8] sm:$0xff] %v885_v50  ;;  %v889_v56 = vmul.f32 0.6931472, %v2583_v52  ;;  %2610 = vlog2.f32 %v271_v48  ;;  %v293_v50 = vld [vmem:[%s3581_s30 + $0x4d8] sm:$0xff] }
  0xbc   : > { %v2587_v58 = vpop.eup %2586  ;;  %1792 = vst [vmem:[%s3608_s17 + $0x3b0] sm:$0xff] %v887_v53  ;;  %v891_v59 = vmul.f32 0.6931472, %v2585_v55  ;;  %2612 = vlog2.f32 %v272_v51  ;;  %v294_v53 = vld [vmem:[%s3581_s30 + $0x4e0] sm:$0xff] }
  0xbd   : > { %v2589_v61 = vpop.eup %2588  ;;  %1793 = vst [vmem:[%s3608_s17 + $0x3b8] sm:$0xff] %v889_v56  ;;  %v893_v62 = vmul.f32 0.6931472, %v2587_v58  ;;  %2614 = vlog2.f32 %v273_v54  ;;  %v295_v56 = vld [vmem:[%s3581_s30 + $0x4e8] sm:$0xff] }
  0xbe   : > { %v2591_v0 = vpop.eup %2590  ;;  %1794 = vst [vmem:[%s3608_s17 + $0x3c0] sm:$0xff] %v891_v59  ;;  %v895_v1 = vmul.f32 0.6931472, %v2589_v61  ;;  %2616 = vlog2.f32 %v274_v57  ;;  %v296_v59 = vld [vmem:[%s3581_s30 + $0x4f0] sm:$0xff] }
  0xbf   : > { %v2593_v3 = vpop.eup %2592  ;;  %1795 = vst [vmem:[%s3608_s17 + $0x3c8] sm:$0xff] %v893_v62  ;;  %v897_v4 = vmul.f32 0.6931472, %v2591_v0  ;;  %2618 = vlog2.f32 %v275_v60  ;;  %v297_v62 = vld [vmem:[%s3581_s30 + $0x4f8] sm:$0xff] }
  0xc0   : > { %v2595_v6 = vpop.eup %2594  ;;  %1796 = vst [vmem:[%s3608_s17 + $0x3d0] sm:$0xff] %v895_v1  ;;  %v899_v7 = vmul.f32 0.6931472, %v2593_v3  ;;  %2620 = vlog2.f32 %v276_v63  ;;  %v298_v1 = vld [vmem:[%s3581_s30 + $0x500] sm:$0xff] }
  0xc1   : > { %v2597_v9 = vpop.eup %2596  ;;  %1797 = vst [vmem:[%s3608_s17 + $0x3d8] sm:$0xff] %v897_v4  ;;  %v901_v10 = vmul.f32 0.6931472, %v2595_v6  ;;  %2622 = vlog2.f32 %v277_v2  ;;  %v299_v4 = vld [vmem:[%s3581_s30 + $0x508] sm:$0xff] }
  0xc2   : > { %v2599_v12 = vpop.eup %2598  ;;  %1798 = vst [vmem:[%s3608_s17 + $0x3e0] sm:$0xff] %v899_v7  ;;  %v903_v13 = vmul.f32 0.6931472, %v2597_v9  ;;  %2624 = vlog2.f32 %v278_v5  ;;  %v300_v7 = vld [vmem:[%s3581_s30 + $0x510] sm:$0xff] }
  0xc3   : > { %v2601_v15 = vpop.eup %2600  ;;  %1799 = vst [vmem:[%s3608_s17 + $0x3e8] sm:$0xff] %v901_v10  ;;  %v905_v16 = vmul.f32 0.6931472, %v2599_v12  ;;  %2626 = vlog2.f32 %v279_v8  ;;  %v301_v10 = vld [vmem:[%s3581_s30 + $0x518] sm:$0xff] }
  0xc4   : > { %v2603_v18 = vpop.eup %2602  ;;  %1800 = vst [vmem:[%s3608_s17 + $0x3f0] sm:$0xff] %v903_v13  ;;  %v907_v19 = vmul.f32 0.6931472, %v2601_v15  ;;  %2628 = vlog2.f32 %v280_v11  ;;  %v302_v13 = vld [vmem:[%s3581_s30 + $0x520] sm:$0xff] }
  0xc5   : > { %v2605_v21 = vpop.eup %2604  ;;  %1801 = vst [vmem:[%s3608_s17 + $0x3f8] sm:$0xff] %v905_v16  ;;  %v909_v22 = vmul.f32 0.6931472, %v2603_v18  ;;  %2630 = vlog2.f32 %v281_v14  ;;  %v303_v16 = vld [vmem:[%s3581_s30 + $0x528] sm:$0xff] }
  0xc6   : > { %v2607_v24 = vpop.eup %2606  ;;  %1802 = vst [vmem:[%s3608_s17 + $0x400] sm:$0xff] %v907_v19  ;;  %v911_v25 = vmul.f32 0.6931472, %v2605_v21  ;;  %2632 = vlog2.f32 %v282_v17  ;;  %v304_v19 = vld [vmem:[%s3581_s30 + $0x530] sm:$0xff] }
  0xc7   : > { %v2609_v27 = vpop.eup %2608  ;;  %1803 = vst [vmem:[%s3608_s17 + $0x408] sm:$0xff] %v909_v22  ;;  %v913_v28 = vmul.f32 0.6931472, %v2607_v24  ;;  %2634 = vlog2.f32 %v283_v20  ;;  %v305_v22 = vld [vmem:[%s3581_s30 + $0x538] sm:$0xff] }
  0xc8   : > { %v2611_v30 = vpop.eup %2610  ;;  %1804 = vst [vmem:[%s3608_s17 + $0x410] sm:$0xff] %v911_v25  ;;  %v915_v31 = vmul.f32 0.6931472, %v2609_v27  ;;  %2636 = vlog2.f32 %v284_v23  ;;  %v306_v25 = vld [vmem:[%s3581_s30 + $0x540] sm:$0xff] }
  0xc9   : > { %v2613_v33 = vpop.eup %2612  ;;  %1805 = vst [vmem:[%s3608_s17 + $0x418] sm:$0xff] %v913_v28  ;;  %v917_v34 = vmul.f32 0.6931472, %v2611_v30  ;;  %2638 = vlog2.f32 %v285_v26  ;;  %v307_v28 = vld [vmem:[%s3581_s30 + $0x548] sm:$0xff] }
  0xca   : > { %v2615_v36 = vpop.eup %2614  ;;  %1806 = vst [vmem:[%s3608_s17 + $0x420] sm:$0xff] %v915_v31  ;;  %v919_v37 = vmul.f32 0.6931472, %v2613_v33  ;;  %2640 = vlog2.f32 %v286_v29  ;;  %v308_v31 = vld [vmem:[%s3581_s30 + $0x550] sm:$0xff] }
  0xcb   : > { %v2617_v39 = vpop.eup %2616  ;;  %1807 = vst [vmem:[%s3608_s17 + $0x428] sm:$0xff] %v917_v34  ;;  %v921_v40 = vmul.f32 0.6931472, %v2615_v36  ;;  %2642 = vlog2.f32 %v287_v32  ;;  %v309_v34 = vld [vmem:[%s3581_s30 + $0x558] sm:$0xff] }
  0xcc   : > { %v2619_v42 = vpop.eup %2618  ;;  %1808 = vst [vmem:[%s3608_s17 + $0x430] sm:$0xff] %v919_v37  ;;  %v923_v43 = vmul.f32 0.6931472, %v2617_v39  ;;  %2644 = vlog2.f32 %v288_v35  ;;  %v310_v37 = vld [vmem:[%s3581_s30 + $0x560] sm:$0xff] }
  0xcd   : > { %v2621_v45 = vpop.eup %2620  ;;  %1809 = vst [vmem:[%s3608_s17 + $0x438] sm:$0xff] %v921_v40  ;;  %v925_v46 = vmul.f32 0.6931472, %v2619_v42  ;;  %2646 = vlog2.f32 %v289_v38  ;;  %v311_v40 = vld [vmem:[%s3581_s30 + $0x568] sm:$0xff] }
  0xce   : > { %v2623_v48 = vpop.eup %2622  ;;  %1810 = vst [vmem:[%s3608_s17 + $0x440] sm:$0xff] %v923_v43  ;;  %v927_v49 = vmul.f32 0.6931472, %v2621_v45  ;;  %2648 = vlog2.f32 %v290_v41  ;;  %v312_v43 = vld [vmem:[%s3581_s30 + $0x570] sm:$0xff] }
  0xcf   : > { %v2625_v51 = vpop.eup %2624  ;;  %1811 = vst [vmem:[%s3608_s17 + $0x448] sm:$0xff] %v925_v46  ;;  %v929_v52 = vmul.f32 0.6931472, %v2623_v48  ;;  %2650 = vlog2.f32 %v291_v44  ;;  %v313_v46 = vld [vmem:[%s3581_s30 + $0x578] sm:$0xff] }
  0xd0   : > { %v2627_v54 = vpop.eup %2626  ;;  %1812 = vst [vmem:[%s3608_s17 + $0x450] sm:$0xff] %v927_v49  ;;  %v931_v55 = vmul.f32 0.6931472, %v2625_v51  ;;  %2652 = vlog2.f32 %v292_v47  ;;  %v314_v49 = vld [vmem:[%s3581_s30 + $0x580] sm:$0xff] }
  0xd1   : > { %v2629_v57 = vpop.eup %2628  ;;  %1813 = vst [vmem:[%s3608_s17 + $0x458] sm:$0xff] %v929_v52  ;;  %v933_v58 = vmul.f32 0.6931472, %v2627_v54  ;;  %2654 = vlog2.f32 %v293_v50  ;;  %v315_v52 = vld [vmem:[%s3581_s30 + $0x588] sm:$0xff] }
  0xd2   : > { %v2631_v60 = vpop.eup %2630  ;;  %1814 = vst [vmem:[%s3608_s17 + $0x460] sm:$0xff] %v931_v55  ;;  %v935_v61 = vmul.f32 0.6931472, %v2629_v57  ;;  %2656 = vlog2.f32 %v294_v53  ;;  %v316_v55 = vld [vmem:[%s3581_s30 + $0x590] sm:$0xff] }
  0xd3   : > { %v2633_v63 = vpop.eup %2632  ;;  %1815 = vst [vmem:[%s3608_s17 + $0x468] sm:$0xff] %v933_v58  ;;  %v937_v0 = vmul.f32 0.6931472, %v2631_v60  ;;  %2658 = vlog2.f32 %v295_v56  ;;  %v317_v58 = vld [vmem:[%s3581_s30 + $0x598] sm:$0xff] }
  0xd4   : > { %v2635_v2 = vpop.eup %2634  ;;  %1816 = vst [vmem:[%s3608_s17 + $0x470] sm:$0xff] %v935_v61  ;;  %v939_v3 = vmul.f32 0.6931472, %v2633_v63  ;;  %2660 = vlog2.f32 %v296_v59  ;;  %v318_v61 = vld [vmem:[%s3581_s30 + $0x5a0] sm:$0xff] }
  0xd5   : > { %v2637_v5 = vpop.eup %2636  ;;  %1817 = vst [vmem:[%s3608_s17 + $0x478] sm:$0xff] %v937_v0  ;;  %v941_v6 = vmul.f32 0.6931472, %v2635_v2  ;;  %2662 = vlog2.f32 %v297_v62  ;;  %v319_v0 = vld [vmem:[%s3581_s30 + $0x5a8] sm:$0xff] }
  0xd6   : > { %v2639_v8 = vpop.eup %2638  ;;  %1818 = vst [vmem:[%s3608_s17 + $0x480] sm:$0xff] %v939_v3  ;;  %v943_v9 = vmul.f32 0.6931472, %v2637_v5  ;;  %2664 = vlog2.f32 %v298_v1  ;;  %v320_v3 = vld [vmem:[%s3581_s30 + $0x5b0] sm:$0xff] }
  0xd7   : > { %v2641_v11 = vpop.eup %2640  ;;  %1819 = vst [vmem:[%s3608_s17 + $0x488] sm:$0xff] %v941_v6  ;;  %v945_v12 = vmul.f32 0.6931472, %v2639_v8  ;;  %2666 = vlog2.f32 %v299_v4  ;;  %v321_v6 = vld [vmem:[%s3581_s30 + $0x5b8] sm:$0xff] }
  0xd8   : > { %v2643_v14 = vpop.eup %2642  ;;  %1820 = vst [vmem:[%s3608_s17 + $0x490] sm:$0xff] %v943_v9  ;;  %v947_v15 = vmul.f32 0.6931472, %v2641_v11  ;;  %2668 = vlog2.f32 %v300_v7  ;;  %v322_v9 = vld [vmem:[%s3581_s30 + $0x5c0] sm:$0xff] }
  0xd9   : > { %v2645_v17 = vpop.eup %2644  ;;  %1821 = vst [vmem:[%s3608_s17 + $0x498] sm:$0xff] %v945_v12  ;;  %v949_v18 = vmul.f32 0.6931472, %v2643_v14  ;;  %2670 = vlog2.f32 %v301_v10  ;;  %v323_v12 = vld [vmem:[%s3581_s30 + $0x5c8] sm:$0xff] }
  0xda   : > { %v2647_v20 = vpop.eup %2646  ;;  %1822 = vst [vmem:[%s3608_s17 + $0x4a0] sm:$0xff] %v947_v15  ;;  %v951_v21 = vmul.f32 0.6931472, %v2645_v17  ;;  %2672 = vlog2.f32 %v302_v13  ;;  %v324_v15 = vld [vmem:[%s3581_s30 + $0x5d0] sm:$0xff] }
  0xdb   : > { %v2649_v23 = vpop.eup %2648  ;;  %1823 = vst [vmem:[%s3608_s17 + $0x4a8] sm:$0xff] %v949_v18  ;;  %v953_v24 = vmul.f32 0.6931472, %v2647_v20  ;;  %2674 = vlog2.f32 %v303_v16  ;;  %v325_v18 = vld [vmem:[%s3581_s30 + $0x5d8] sm:$0xff] }
  0xdc   : > { %v2651_v26 = vpop.eup %2650  ;;  %1824 = vst [vmem:[%s3608_s17 + $0x4b0] sm:$0xff] %v951_v21  ;;  %v955_v27 = vmul.f32 0.6931472, %v2649_v23  ;;  %2676 = vlog2.f32 %v304_v19  ;;  %v326_v21 = vld [vmem:[%s3581_s30 + $0x5e0] sm:$0xff] }
  0xdd   : > { %v2653_v29 = vpop.eup %2652  ;;  %1825 = vst [vmem:[%s3608_s17 + $0x4b8] sm:$0xff] %v953_v24  ;;  %v957_v30 = vmul.f32 0.6931472, %v2651_v26  ;;  %2678 = vlog2.f32 %v305_v22  ;;  %v327_v24 = vld [vmem:[%s3581_s30 + $0x5e8] sm:$0xff] }
  0xde   : > { %v2655_v32 = vpop.eup %2654  ;;  %1826 = vst [vmem:[%s3608_s17 + $0x4c0] sm:$0xff] %v955_v27  ;;  %v959_v33 = vmul.f32 0.6931472, %v2653_v29  ;;  %2680 = vlog2.f32 %v306_v25  ;;  %v328_v27 = vld [vmem:[%s3581_s30 + $0x5f0] sm:$0xff] }
  0xdf   : > { %v2657_v35 = vpop.eup %2656  ;;  %1827 = vst [vmem:[%s3608_s17 + $0x4c8] sm:$0xff] %v957_v30  ;;  %v961_v36 = vmul.f32 0.6931472, %v2655_v32  ;;  %2682 = vlog2.f32 %v307_v28  ;;  %v329_v30 = vld [vmem:[%s3581_s30 + $0x5f8] sm:$0xff] }
  0xe0   : > { %v2659_v38 = vpop.eup %2658  ;;  %1828 = vst [vmem:[%s3608_s17 + $0x4d0] sm:$0xff] %v959_v33  ;;  %v963_v39 = vmul.f32 0.6931472, %v2657_v35  ;;  %2684 = vlog2.f32 %v308_v31  ;;  %v330_v33 = vld [vmem:[%s3581_s30 + $0x600] sm:$0xff] }
  0xe1   : > { %v2661_v41 = vpop.eup %2660  ;;  %1829 = vst [vmem:[%s3608_s17 + $0x4d8] sm:$0xff] %v961_v36  ;;  %v965_v42 = vmul.f32 0.6931472, %v2659_v38  ;;  %2686 = vlog2.f32 %v309_v34  ;;  %v331_v36 = vld [vmem:[%s3581_s30 + $0x608] sm:$0xff] }
  0xe2   : > { %v2663_v44 = vpop.eup %2662  ;;  %1830 = vst [vmem:[%s3608_s17 + $0x4e0] sm:$0xff] %v963_v39  ;;  %v967_v45 = vmul.f32 0.6931472, %v2661_v41  ;;  %2688 = vlog2.f32 %v310_v37  ;;  %v332_v39 = vld [vmem:[%s3581_s30 + $0x610] sm:$0xff] }
  0xe3   : > { %v2665_v47 = vpop.eup %2664  ;;  %1831 = vst [vmem:[%s3608_s17 + $0x4e8] sm:$0xff] %v965_v42  ;;  %v969_v48 = vmul.f32 0.6931472, %v2663_v44  ;;  %2690 = vlog2.f32 %v311_v40  ;;  %v333_v42 = vld [vmem:[%s3581_s30 + $0x618] sm:$0xff] }
  0xe4   : > { %v2667_v50 = vpop.eup %2666  ;;  %1832 = vst [vmem:[%s3608_s17 + $0x4f0] sm:$0xff] %v967_v45  ;;  %v971_v51 = vmul.f32 0.6931472, %v2665_v47  ;;  %2692 = vlog2.f32 %v312_v43  ;;  %v334_v45 = vld [vmem:[%s3581_s30 + $0x620] sm:$0xff] }
  0xe5   : > { %v2669_v53 = vpop.eup %2668  ;;  %1833 = vst [vmem:[%s3608_s17 + $0x4f8] sm:$0xff] %v969_v48  ;;  %v973_v54 = vmul.f32 0.6931472, %v2667_v50  ;;  %2694 = vlog2.f32 %v313_v46  ;;  %v335_v48 = vld [vmem:[%s3581_s30 + $0x628] sm:$0xff] }
  0xe6   : > { %v2671_v56 = vpop.eup %2670  ;;  %1834 = vst [vmem:[%s3608_s17 + $0x500] sm:$0xff] %v971_v51  ;;  %v975_v57 = vmul.f32 0.6931472, %v2669_v53  ;;  %2696 = vlog2.f32 %v314_v49  ;;  %v336_v51 = vld [vmem:[%s3581_s30 + $0x630] sm:$0xff] }
  0xe7   : > { %v2673_v59 = vpop.eup %2672  ;;  %1835 = vst [vmem:[%s3608_s17 + $0x508] sm:$0xff] %v973_v54  ;;  %v977_v60 = vmul.f32 0.6931472, %v2671_v56  ;;  %2698 = vlog2.f32 %v315_v52  ;;  %v337_v54 = vld [vmem:[%s3581_s30 + $0x638] sm:$0xff] }
  0xe8   : > { %v2675_v62 = vpop.eup %2674  ;;  %1836 = vst [vmem:[%s3608_s17 + $0x510] sm:$0xff] %v975_v57  ;;  %v979_v63 = vmul.f32 0.6931472, %v2673_v59  ;;  %2700 = vlog2.f32 %v316_v55  ;;  %v338_v57 = vld [vmem:[%s3581_s30 + $0x640] sm:$0xff] }
  0xe9   : > { %v2677_v1 = vpop.eup %2676  ;;  %1837 = vst [vmem:[%s3608_s17 + $0x518] sm:$0xff] %v977_v60  ;;  %v981_v2 = vmul.f32 0.6931472, %v2675_v62  ;;  %2702 = vlog2.f32 %v317_v58  ;;  %v339_v60 = vld [vmem:[%s3581_s30 + $0x648] sm:$0xff] }
  0xea   : > { %v2679_v4 = vpop.eup %2678  ;;  %1838 = vst [vmem:[%s3608_s17 + $0x520] sm:$0xff] %v979_v63  ;;  %v983_v5 = vmul.f32 0.6931472, %v2677_v1  ;;  %2704 = vlog2.f32 %v318_v61  ;;  %v340_v63 = vld [vmem:[%s3581_s30 + $0x650] sm:$0xff] }
  0xeb   : > { %v2681_v7 = vpop.eup %2680  ;;  %1839 = vst [vmem:[%s3608_s17 + $0x528] sm:$0xff] %v981_v2  ;;  %v985_v8 = vmul.f32 0.6931472, %v2679_v4  ;;  %2706 = vlog2.f32 %v319_v0  ;;  %v341_v2 = vld [vmem:[%s3581_s30 + $0x658] sm:$0xff] }
  0xec   : > { %v2683_v10 = vpop.eup %2682  ;;  %1840 = vst [vmem:[%s3608_s17 + $0x530] sm:$0xff] %v983_v5  ;;  %v987_v11 = vmul.f32 0.6931472, %v2681_v7  ;;  %2708 = vlog2.f32 %v320_v3  ;;  %v342_v5 = vld [vmem:[%s3581_s30 + $0x660] sm:$0xff] }
  0xed   : > { %v2685_v13 = vpop.eup %2684  ;;  %1841 = vst [vmem:[%s3608_s17 + $0x538] sm:$0xff] %v985_v8  ;;  %v989_v14 = vmul.f32 0.6931472, %v2683_v10  ;;  %2710 = vlog2.f32 %v321_v6  ;;  %v343_v8 = vld [vmem:[%s3581_s30 + $0x668] sm:$0xff] }
  0xee   : > { %v2687_v16 = vpop.eup %2686  ;;  %1842 = vst [vmem:[%s3608_s17 + $0x540] sm:$0xff] %v987_v11  ;;  %v991_v17 = vmul.f32 0.6931472, %v2685_v13  ;;  %2712 = vlog2.f32 %v322_v9  ;;  %v344_v11 = vld [vmem:[%s3581_s30 + $0x670] sm:$0xff] }
  0xef   : > { %v2689_v19 = vpop.eup %2688  ;;  %1843 = vst [vmem:[%s3608_s17 + $0x548] sm:$0xff] %v989_v14  ;;  %v993_v20 = vmul.f32 0.6931472, %v2687_v16  ;;  %2714 = vlog2.f32 %v323_v12  ;;  %v345_v14 = vld [vmem:[%s3581_s30 + $0x678] sm:$0xff] }
  0xf0   : > { %v2691_v22 = vpop.eup %2690  ;;  %1844 = vst [vmem:[%s3608_s17 + $0x550] sm:$0xff] %v991_v17  ;;  %v995_v23 = vmul.f32 0.6931472, %v2689_v19  ;;  %2716 = vlog2.f32 %v324_v15  ;;  %v346_v17 = vld [vmem:[%s3581_s30 + $0x680] sm:$0xff] }
  0xf1   : > { %v2693_v25 = vpop.eup %2692  ;;  %1845 = vst [vmem:[%s3608_s17 + $0x558] sm:$0xff] %v993_v20  ;;  %v997_v26 = vmul.f32 0.6931472, %v2691_v22  ;;  %2718 = vlog2.f32 %v325_v18  ;;  %v347_v20 = vld [vmem:[%s3581_s30 + $0x688] sm:$0xff] }
  0xf2   : > { %v2695_v28 = vpop.eup %2694  ;;  %1846 = vst [vmem:[%s3608_s17 + $0x560] sm:$0xff] %v995_v23  ;;  %v999_v29 = vmul.f32 0.6931472, %v2693_v25  ;;  %2720 = vlog2.f32 %v326_v21  ;;  %v348_v23 = vld [vmem:[%s3581_s30 + $0x690] sm:$0xff] }
  0xf3   : > { %v2697_v31 = vpop.eup %2696  ;;  %1847 = vst [vmem:[%s3608_s17 + $0x568] sm:$0xff] %v997_v26  ;;  %v1001_v32 = vmul.f32 0.6931472, %v2695_v28  ;;  %2722 = vlog2.f32 %v327_v24  ;;  %v349_v26 = vld [vmem:[%s3581_s30 + $0x698] sm:$0xff] }
  0xf4   : > { %v2699_v34 = vpop.eup %2698  ;;  %1848 = vst [vmem:[%s3608_s17 + $0x570] sm:$0xff] %v999_v29  ;;  %v1003_v35 = vmul.f32 0.6931472, %v2697_v31  ;;  %2724 = vlog2.f32 %v328_v27  ;;  %v350_v29 = vld [vmem:[%s3581_s30 + $0x6a0] sm:$0xff] }
  0xf5   : > { %v2701_v37 = vpop.eup %2700  ;;  %1849 = vst [vmem:[%s3608_s17 + $0x578] sm:$0xff] %v1001_v32  ;;  %v1005_v38 = vmul.f32 0.6931472, %v2699_v34  ;;  %2726 = vlog2.f32 %v329_v30  ;;  %v351_v32 = vld [vmem:[%s3581_s30 + $0x6a8] sm:$0xff] }
  0xf6   : > { %v2703_v40 = vpop.eup %2702  ;;  %1850 = vst [vmem:[%s3608_s17 + $0x580] sm:$0xff] %v1003_v35  ;;  %v1007_v41 = vmul.f32 0.6931472, %v2701_v37  ;;  %2728 = vlog2.f32 %v330_v33  ;;  %v352_v35 = vld [vmem:[%s3581_s30 + $0x6b0] sm:$0xff] }
  0xf7   : > { %v2705_v43 = vpop.eup %2704  ;;  %1851 = vst [vmem:[%s3608_s17 + $0x588] sm:$0xff] %v1005_v38  ;;  %v1009_v44 = vmul.f32 0.6931472, %v2703_v40  ;;  %2730 = vlog2.f32 %v331_v36  ;;  %v353_v38 = vld [vmem:[%s3581_s30 + $0x6b8] sm:$0xff] }
  0xf8   : > { %v2707_v46 = vpop.eup %2706  ;;  %1852 = vst [vmem:[%s3608_s17 + $0x590] sm:$0xff] %v1007_v41  ;;  %v1011_v47 = vmul.f32 0.6931472, %v2705_v43  ;;  %2732 = vlog2.f32 %v332_v39  ;;  %v354_v41 = vld [vmem:[%s3581_s30 + $0x6c0] sm:$0xff] }
  0xf9   : > { %v2709_v49 = vpop.eup %2708  ;;  %1853 = vst [vmem:[%s3608_s17 + $0x598] sm:$0xff] %v1009_v44  ;;  %v1013_v50 = vmul.f32 0.6931472, %v2707_v46  ;;  %2734 = vlog2.f32 %v333_v42  ;;  %v355_v44 = vld [vmem:[%s3581_s30 + $0x6c8] sm:$0xff] }
  0xfa   : > { %v2711_v52 = vpop.eup %2710  ;;  %1854 = vst [vmem:[%s3608_s17 + $0x5a0] sm:$0xff] %v1011_v47  ;;  %v1015_v53 = vmul.f32 0.6931472, %v2709_v49  ;;  %2736 = vlog2.f32 %v334_v45  ;;  %v356_v47 = vld [vmem:[%s3581_s30 + $0x6d0] sm:$0xff] }
  0xfb   : > { %v2713_v55 = vpop.eup %2712  ;;  %1855 = vst [vmem:[%s3608_s17 + $0x5a8] sm:$0xff] %v1013_v50  ;;  %v1017_v56 = vmul.f32 0.6931472, %v2711_v52  ;;  %2738 = vlog2.f32 %v335_v48  ;;  %v357_v50 = vld [vmem:[%s3581_s30 + $0x6d8] sm:$0xff] }
  0xfc   : > { %v2715_v58 = vpop.eup %2714  ;;  %1856 = vst [vmem:[%s3608_s17 + $0x5b0] sm:$0xff] %v1015_v53  ;;  %v1019_v59 = vmul.f32 0.6931472, %v2713_v55  ;;  %2740 = vlog2.f32 %v336_v51  ;;  %v358_v53 = vld [vmem:[%s3581_s30 + $0x6e0] sm:$0xff] }
  0xfd   : > { %v2717_v61 = vpop.eup %2716  ;;  %1857 = vst [vmem:[%s3608_s17 + $0x5b8] sm:$0xff] %v1017_v56  ;;  %v1021_v62 = vmul.f32 0.6931472, %v2715_v58  ;;  %2742 = vlog2.f32 %v337_v54  ;;  %v359_v56 = vld [vmem:[%s3581_s30 + $0x6e8] sm:$0xff] }
  0xfe   : > { %v2719_v0 = vpop.eup %2718  ;;  %1858 = vst [vmem:[%s3608_s17 + $0x5c0] sm:$0xff] %v1019_v59  ;;  %v1023_v1 = vmul.f32 0.6931472, %v2717_v61  ;;  %2744 = vlog2.f32 %v338_v57  ;;  %v360_v59 = vld [vmem:[%s3581_s30 + $0x6f0] sm:$0xff] }
  0xff   : > { %v2721_v3 = vpop.eup %2720  ;;  %1859 = vst [vmem:[%s3608_s17 + $0x5c8] sm:$0xff] %v1021_v62  ;;  %v1025_v4 = vmul.f32 0.6931472, %v2719_v0  ;;  %2746 = vlog2.f32 %v339_v60  ;;  %v361_v62 = vld [vmem:[%s3581_s30 + $0x6f8] sm:$0xff] }
 0x100   : > { %v2723_v6 = vpop.eup %2722  ;;  %1860 = vst [vmem:[%s3608_s17 + $0x5d0] sm:$0xff] %v1023_v1  ;;  %v1027_v7 = vmul.f32 0.6931472, %v2721_v3  ;;  %2748 = vlog2.f32 %v340_v63  ;;  %v362_v1 = vld [vmem:[%s3581_s30 + $0x700] sm:$0xff] }
 0x101   : > { %v2725_v9 = vpop.eup %2724  ;;  %1861 = vst [vmem:[%s3608_s17 + $0x5d8] sm:$0xff] %v1025_v4  ;;  %v1029_v10 = vmul.f32 0.6931472, %v2723_v6  ;;  %2750 = vlog2.f32 %v341_v2  ;;  %v363_v4 = vld [vmem:[%s3581_s30 + $0x708] sm:$0xff] }
 0x102   : > { %v2727_v12 = vpop.eup %2726  ;;  %1862 = vst [vmem:[%s3608_s17 + $0x5e0] sm:$0xff] %v1027_v7  ;;  %v1031_v13 = vmul.f32 0.6931472, %v2725_v9  ;;  %2752 = vlog2.f32 %v342_v5  ;;  %v364_v7 = vld [vmem:[%s3581_s30 + $0x710] sm:$0xff] }
 0x103   : > { %v2729_v15 = vpop.eup %2728  ;;  %1863 = vst [vmem:[%s3608_s17 + $0x5e8] sm:$0xff] %v1029_v10  ;;  %v1033_v16 = vmul.f32 0.6931472, %v2727_v12  ;;  %2754 = vlog2.f32 %v343_v8  ;;  %v365_v10 = vld [vmem:[%s3581_s30 + $0x718] sm:$0xff] }
 0x104   : > { %v2731_v18 = vpop.eup %2730  ;;  %1864 = vst [vmem:[%s3608_s17 + $0x5f0] sm:$0xff] %v1031_v13  ;;  %v1035_v19 = vmul.f32 0.6931472, %v2729_v15  ;;  %2756 = vlog2.f32 %v344_v11  ;;  %v366_v13 = vld [vmem:[%s3581_s30 + $0x720] sm:$0xff] }
 0x105   : > { %v2733_v21 = vpop.eup %2732  ;;  %1865 = vst [vmem:[%s3608_s17 + $0x5f8] sm:$0xff] %v1033_v16  ;;  %v1037_v22 = vmul.f32 0.6931472, %v2731_v18  ;;  %2758 = vlog2.f32 %v345_v14  ;;  %v367_v16 = vld [vmem:[%s3581_s30 + $0x728] sm:$0xff] }
 0x106   : > { %v2735_v24 = vpop.eup %2734  ;;  %1866 = vst [vmem:[%s3608_s17 + $0x600] sm:$0xff] %v1035_v19  ;;  %v1039_v25 = vmul.f32 0.6931472, %v2733_v21  ;;  %2760 = vlog2.f32 %v346_v17  ;;  %v368_v19 = vld [vmem:[%s3581_s30 + $0x730] sm:$0xff] }
 0x107   : > { %v2737_v27 = vpop.eup %2736  ;;  %1867 = vst [vmem:[%s3608_s17 + $0x608] sm:$0xff] %v1037_v22  ;;  %v1041_v28 = vmul.f32 0.6931472, %v2735_v24  ;;  %2762 = vlog2.f32 %v347_v20  ;;  %v369_v22 = vld [vmem:[%s3581_s30 + $0x738] sm:$0xff] }
 0x108   : > { %v2739_v30 = vpop.eup %2738  ;;  %1868 = vst [vmem:[%s3608_s17 + $0x610] sm:$0xff] %v1039_v25  ;;  %v1043_v31 = vmul.f32 0.6931472, %v2737_v27  ;;  %2764 = vlog2.f32 %v348_v23  ;;  %v370_v25 = vld [vmem:[%s3581_s30 + $0x740] sm:$0xff] }
 0x109   : > { %v2741_v33 = vpop.eup %2740  ;;  %1869 = vst [vmem:[%s3608_s17 + $0x618] sm:$0xff] %v1041_v28  ;;  %v1045_v34 = vmul.f32 0.6931472, %v2739_v30  ;;  %2766 = vlog2.f32 %v349_v26  ;;  %v371_v28 = vld [vmem:[%s3581_s30 + $0x748] sm:$0xff] }
 0x10a   : > { %v2743_v36 = vpop.eup %2742  ;;  %1870 = vst [vmem:[%s3608_s17 + $0x620] sm:$0xff] %v1043_v31  ;;  %v1047_v37 = vmul.f32 0.6931472, %v2741_v33  ;;  %2768 = vlog2.f32 %v350_v29  ;;  %v372_v31 = vld [vmem:[%s3581_s30 + $0x750] sm:$0xff] }
 0x10b   : > { %v2745_v39 = vpop.eup %2744  ;;  %1871 = vst [vmem:[%s3608_s17 + $0x628] sm:$0xff] %v1045_v34  ;;  %v1049_v40 = vmul.f32 0.6931472, %v2743_v36  ;;  %2770 = vlog2.f32 %v351_v32  ;;  %v373_v34 = vld [vmem:[%s3581_s30 + $0x758] sm:$0xff] }
 0x10c   : > { %v2747_v42 = vpop.eup %2746  ;;  %1872 = vst [vmem:[%s3608_s17 + $0x630] sm:$0xff] %v1047_v37  ;;  %v1051_v43 = vmul.f32 0.6931472, %v2745_v39  ;;  %2772 = vlog2.f32 %v352_v35  ;;  %v374_v37 = vld [vmem:[%s3581_s30 + $0x760] sm:$0xff] }
 0x10d   : > { %v2749_v45 = vpop.eup %2748  ;;  %1873 = vst [vmem:[%s3608_s17 + $0x638] sm:$0xff] %v1049_v40  ;;  %v1053_v46 = vmul.f32 0.6931472, %v2747_v42  ;;  %2774 = vlog2.f32 %v353_v38  ;;  %v375_v40 = vld [vmem:[%s3581_s30 + $0x768] sm:$0xff] }
 0x10e   : > { %v2751_v48 = vpop.eup %2750  ;;  %1874 = vst [vmem:[%s3608_s17 + $0x640] sm:$0xff] %v1051_v43  ;;  %v1055_v49 = vmul.f32 0.6931472, %v2749_v45  ;;  %2776 = vlog2.f32 %v354_v41  ;;  %v376_v43 = vld [vmem:[%s3581_s30 + $0x770] sm:$0xff] }
 0x10f   : > { %v2753_v51 = vpop.eup %2752  ;;  %1875 = vst [vmem:[%s3608_s17 + $0x648] sm:$0xff] %v1053_v46  ;;  %v1057_v52 = vmul.f32 0.6931472, %v2751_v48  ;;  %2778 = vlog2.f32 %v355_v44  ;;  %v377_v46 = vld [vmem:[%s3581_s30 + $0x778] sm:$0xff] }
 0x110   : > { %v2755_v54 = vpop.eup %2754  ;;  %1876 = vst [vmem:[%s3608_s17 + $0x650] sm:$0xff] %v1055_v49  ;;  %v1059_v55 = vmul.f32 0.6931472, %v2753_v51  ;;  %2780 = vlog2.f32 %v356_v47  ;;  %v378_v49 = vld [vmem:[%s3581_s30 + $0x780] sm:$0xff] }
 0x111   : > { %v2757_v57 = vpop.eup %2756  ;;  %1877 = vst [vmem:[%s3608_s17 + $0x658] sm:$0xff] %v1057_v52  ;;  %v1061_v58 = vmul.f32 0.6931472, %v2755_v54  ;;  %2782 = vlog2.f32 %v357_v50  ;;  %v379_v52 = vld [vmem:[%s3581_s30 + $0x788] sm:$0xff] }
 0x112   : > { %v2759_v60 = vpop.eup %2758  ;;  %1878 = vst [vmem:[%s3608_s17 + $0x660] sm:$0xff] %v1059_v55  ;;  %v1063_v61 = vmul.f32 0.6931472, %v2757_v57  ;;  %2784 = vlog2.f32 %v358_v53  ;;  %v380_v55 = vld [vmem:[%s3581_s30 + $0x790] sm:$0xff] }
 0x113   : > { %v2761_v63 = vpop.eup %2760  ;;  %1879 = vst [vmem:[%s3608_s17 + $0x668] sm:$0xff] %v1061_v58  ;;  %v1065_v0 = vmul.f32 0.6931472, %v2759_v60  ;;  %2786 = vlog2.f32 %v359_v56  ;;  %v381_v58 = vld [vmem:[%s3581_s30 + $0x798] sm:$0xff] }
 0x114   : > { %v2763_v2 = vpop.eup %2762  ;;  %1880 = vst [vmem:[%s3608_s17 + $0x670] sm:$0xff] %v1063_v61  ;;  %v1067_v3 = vmul.f32 0.6931472, %v2761_v63  ;;  %2788 = vlog2.f32 %v360_v59  ;;  %v382_v61 = vld [vmem:[%s3581_s30 + $0x7a0] sm:$0xff] }
 0x115   : > { %v2765_v5 = vpop.eup %2764  ;;  %1881 = vst [vmem:[%s3608_s17 + $0x678] sm:$0xff] %v1065_v0  ;;  %v1069_v6 = vmul.f32 0.6931472, %v2763_v2  ;;  %2790 = vlog2.f32 %v361_v62  ;;  %v383_v0 = vld [vmem:[%s3581_s30 + $0x7a8] sm:$0xff] }
 0x116   : > { %v2767_v8 = vpop.eup %2766  ;;  %1882 = vst [vmem:[%s3608_s17 + $0x680] sm:$0xff] %v1067_v3  ;;  %v1071_v9 = vmul.f32 0.6931472, %v2765_v5  ;;  %2792 = vlog2.f32 %v362_v1  ;;  %v384_v3 = vld [vmem:[%s3581_s30 + $0x7b0] sm:$0xff] }
 0x117   : > { %v2769_v11 = vpop.eup %2768  ;;  %1883 = vst [vmem:[%s3608_s17 + $0x688] sm:$0xff] %v1069_v6  ;;  %v1073_v12 = vmul.f32 0.6931472, %v2767_v8  ;;  %2794 = vlog2.f32 %v363_v4  ;;  %v385_v6 = vld [vmem:[%s3581_s30 + $0x7b8] sm:$0xff] }
 0x118   : > { %v2771_v14 = vpop.eup %2770  ;;  %1884 = vst [vmem:[%s3608_s17 + $0x690] sm:$0xff] %v1071_v9  ;;  %v1075_v15 = vmul.f32 0.6931472, %v2769_v11  ;;  %2796 = vlog2.f32 %v364_v7  ;;  %v386_v9 = vld [vmem:[%s3581_s30 + $0x7c0] sm:$0xff] }
 0x119   : > { %v2773_v17 = vpop.eup %2772  ;;  %1885 = vst [vmem:[%s3608_s17 + $0x698] sm:$0xff] %v1073_v12  ;;  %v1077_v18 = vmul.f32 0.6931472, %v2771_v14  ;;  %2798 = vlog2.f32 %v365_v10  ;;  %v387_v12 = vld [vmem:[%s3581_s30 + $0x7c8] sm:$0xff] }
 0x11a   : > { %v2775_v20 = vpop.eup %2774  ;;  %1886 = vst [vmem:[%s3608_s17 + $0x6a0] sm:$0xff] %v1075_v15  ;;  %v1079_v21 = vmul.f32 0.6931472, %v2773_v17  ;;  %2800 = vlog2.f32 %v366_v13  ;;  %v388_v15 = vld [vmem:[%s3581_s30 + $0x7d0] sm:$0xff] }
 0x11b   : > { %v2777_v23 = vpop.eup %2776  ;;  %1887 = vst [vmem:[%s3608_s17 + $0x6a8] sm:$0xff] %v1077_v18  ;;  %v1081_v24 = vmul.f32 0.6931472, %v2775_v20  ;;  %2802 = vlog2.f32 %v367_v16  ;;  %v389_v18 = vld [vmem:[%s3581_s30 + $0x7d8] sm:$0xff] }
 0x11c   : > { %v2779_v26 = vpop.eup %2778  ;;  %1888 = vst [vmem:[%s3608_s17 + $0x6b0] sm:$0xff] %v1079_v21  ;;  %v1083_v27 = vmul.f32 0.6931472, %v2777_v23  ;;  %2804 = vlog2.f32 %v368_v19  ;;  %v390_v21 = vld [vmem:[%s3581_s30 + $0x7e0] sm:$0xff] }
 0x11d   : > { %v2781_v29 = vpop.eup %2780  ;;  %1889 = vst [vmem:[%s3608_s17 + $0x6b8] sm:$0xff] %v1081_v24  ;;  %v1085_v30 = vmul.f32 0.6931472, %v2779_v26  ;;  %2806 = vlog2.f32 %v369_v22  ;;  %v391_v24 = vld [vmem:[%s3581_s30 + $0x7e8] sm:$0xff] }
 0x11e   : > { %v2783_v32 = vpop.eup %2782  ;;  %1890 = vst [vmem:[%s3608_s17 + $0x6c0] sm:$0xff] %v1083_v27  ;;  %v1087_v33 = vmul.f32 0.6931472, %v2781_v29  ;;  %2808 = vlog2.f32 %v370_v25  ;;  %v392_v27 = vld [vmem:[%s3581_s30 + $0x7f0] sm:$0xff] }
 0x11f   : > { %v2785_v35 = vpop.eup %2784  ;;  %1891 = vst [vmem:[%s3608_s17 + $0x6c8] sm:$0xff] %v1085_v30  ;;  %v1089_v36 = vmul.f32 0.6931472, %v2783_v32  ;;  %2810 = vlog2.f32 %v371_v28  ;;  %v393_v30 = vld [vmem:[%s3581_s30 + $0x7f8] sm:$0xff] }
 0x120   : > { %v2787_v38 = vpop.eup %2786  ;;  %1892 = vst [vmem:[%s3608_s17 + $0x6d0] sm:$0xff] %v1087_v33  ;;  %v1091_v39 = vmul.f32 0.6931472, %v2785_v35  ;;  %2812 = vlog2.f32 %v372_v31  ;;  %v394_v33 = vld [vmem:[%s3581_s30 + $0x800] sm:$0xff] }
 0x121   : > { %v2789_v41 = vpop.eup %2788  ;;  %1893 = vst [vmem:[%s3608_s17 + $0x6d8] sm:$0xff] %v1089_v36  ;;  %v1093_v42 = vmul.f32 0.6931472, %v2787_v38  ;;  %2814 = vlog2.f32 %v373_v34  ;;  %v395_v36 = vld [vmem:[%s3581_s30 + $0x808] sm:$0xff] }
 0x122   : > { %v2791_v44 = vpop.eup %2790  ;;  %1894 = vst [vmem:[%s3608_s17 + $0x6e0] sm:$0xff] %v1091_v39  ;;  %v1095_v45 = vmul.f32 0.6931472, %v2789_v41  ;;  %2816 = vlog2.f32 %v374_v37  ;;  %v396_v39 = vld [vmem:[%s3581_s30 + $0x810] sm:$0xff] }
 0x123   : > { %v2793_v47 = vpop.eup %2792  ;;  %1895 = vst [vmem:[%s3608_s17 + $0x6e8] sm:$0xff] %v1093_v42  ;;  %v1097_v48 = vmul.f32 0.6931472, %v2791_v44  ;;  %2818 = vlog2.f32 %v375_v40  ;;  %v397_v42 = vld [vmem:[%s3581_s30 + $0x818] sm:$0xff] }
 0x124   : > { %v2795_v50 = vpop.eup %2794  ;;  %1896 = vst [vmem:[%s3608_s17 + $0x6f0] sm:$0xff] %v1095_v45  ;;  %v1099_v51 = vmul.f32 0.6931472, %v2793_v47  ;;  %2820 = vlog2.f32 %v376_v43  ;;  %v398_v45 = vld [vmem:[%s3581_s30 + $0x820] sm:$0xff] }
 0x125   : > { %v2797_v53 = vpop.eup %2796  ;;  %1897 = vst [vmem:[%s3608_s17 + $0x6f8] sm:$0xff] %v1097_v48  ;;  %v1101_v54 = vmul.f32 0.6931472, %v2795_v50  ;;  %2822 = vlog2.f32 %v377_v46  ;;  %v399_v48 = vld [vmem:[%s3581_s30 + $0x828] sm:$0xff] }
 0x126   : > { %v2799_v56 = vpop.eup %2798  ;;  %1898 = vst [vmem:[%s3608_s17 + $0x700] sm:$0xff] %v1099_v51  ;;  %v1103_v57 = vmul.f32 0.6931472, %v2797_v53  ;;  %2824 = vlog2.f32 %v378_v49  ;;  %v400_v51 = vld [vmem:[%s3581_s30 + $0x830] sm:$0xff] }
 0x127   : > { %v2801_v59 = vpop.eup %2800  ;;  %1899 = vst [vmem:[%s3608_s17 + $0x708] sm:$0xff] %v1101_v54  ;;  %v1105_v60 = vmul.f32 0.6931472, %v2799_v56  ;;  %2826 = vlog2.f32 %v379_v52  ;;  %v401_v54 = vld [vmem:[%s3581_s30 + $0x838] sm:$0xff] }
 0x128   : > { %v2803_v62 = vpop.eup %2802  ;;  %1900 = vst [vmem:[%s3608_s17 + $0x710] sm:$0xff] %v1103_v57  ;;  %v1107_v63 = vmul.f32 0.6931472, %v2801_v59  ;;  %2828 = vlog2.f32 %v380_v55  ;;  %v402_v57 = vld [vmem:[%s3581_s30 + $0x840] sm:$0xff] }
 0x129   : > { %v2805_v1 = vpop.eup %2804  ;;  %1901 = vst [vmem:[%s3608_s17 + $0x718] sm:$0xff] %v1105_v60  ;;  %v1109_v2 = vmul.f32 0.6931472, %v2803_v62  ;;  %2830 = vlog2.f32 %v381_v58  ;;  %v403_v60 = vld [vmem:[%s3581_s30 + $0x848] sm:$0xff] }
 0x12a   : > { %v2807_v4 = vpop.eup %2806  ;;  %1902 = vst [vmem:[%s3608_s17 + $0x720] sm:$0xff] %v1107_v63  ;;  %v1111_v5 = vmul.f32 0.6931472, %v2805_v1  ;;  %2832 = vlog2.f32 %v382_v61  ;;  %v404_v63 = vld [vmem:[%s3581_s30 + $0x850] sm:$0xff] }
 0x12b   : > { %v2809_v7 = vpop.eup %2808  ;;  %1903 = vst [vmem:[%s3608_s17 + $0x728] sm:$0xff] %v1109_v2  ;;  %v1113_v8 = vmul.f32 0.6931472, %v2807_v4  ;;  %2834 = vlog2.f32 %v383_v0  ;;  %v405_v2 = vld [vmem:[%s3581_s30 + $0x858] sm:$0xff] }
 0x12c   : > { %v2811_v10 = vpop.eup %2810  ;;  %1904 = vst [vmem:[%s3608_s17 + $0x730] sm:$0xff] %v1111_v5  ;;  %v1115_v11 = vmul.f32 0.6931472, %v2809_v7  ;;  %2836 = vlog2.f32 %v384_v3  ;;  %v406_v5 = vld [vmem:[%s3581_s30 + $0x860] sm:$0xff] }
 0x12d   : > { %v2813_v13 = vpop.eup %2812  ;;  %1905 = vst [vmem:[%s3608_s17 + $0x738] sm:$0xff] %v1113_v8  ;;  %v1117_v14 = vmul.f32 0.6931472, %v2811_v10  ;;  %2838 = vlog2.f32 %v385_v6  ;;  %v407_v8 = vld [vmem:[%s3581_s30 + $0x868] sm:$0xff] }
 0x12e   : > { %v2815_v16 = vpop.eup %2814  ;;  %1906 = vst [vmem:[%s3608_s17 + $0x740] sm:$0xff] %v1115_v11  ;;  %v1119_v17 = vmul.f32 0.6931472, %v2813_v13  ;;  %2840 = vlog2.f32 %v386_v9  ;;  %v408_v11 = vld [vmem:[%s3581_s30 + $0x870] sm:$0xff] }
 0x12f   : > { %v2817_v19 = vpop.eup %2816  ;;  %1907 = vst [vmem:[%s3608_s17 + $0x748] sm:$0xff] %v1117_v14  ;;  %v1121_v20 = vmul.f32 0.6931472, %v2815_v16  ;;  %2842 = vlog2.f32 %v387_v12  ;;  %v409_v14 = vld [vmem:[%s3581_s30 + $0x878] sm:$0xff] }
 0x130   : > { %v2819_v22 = vpop.eup %2818  ;;  %1908 = vst [vmem:[%s3608_s17 + $0x750] sm:$0xff] %v1119_v17  ;;  %v1123_v23 = vmul.f32 0.6931472, %v2817_v19  ;;  %2844 = vlog2.f32 %v388_v15  ;;  %v410_v17 = vld [vmem:[%s3581_s30 + $0x880] sm:$0xff] }
 0x131   : > { %v2821_v25 = vpop.eup %2820  ;;  %1909 = vst [vmem:[%s3608_s17 + $0x758] sm:$0xff] %v1121_v20  ;;  %v1125_v26 = vmul.f32 0.6931472, %v2819_v22  ;;  %2846 = vlog2.f32 %v389_v18  ;;  %v411_v20 = vld [vmem:[%s3581_s30 + $0x888] sm:$0xff] }
 0x132   : > { %v2823_v28 = vpop.eup %2822  ;;  %1910 = vst [vmem:[%s3608_s17 + $0x760] sm:$0xff] %v1123_v23  ;;  %v1127_v29 = vmul.f32 0.6931472, %v2821_v25  ;;  %2848 = vlog2.f32 %v390_v21  ;;  %v412_v23 = vld [vmem:[%s3581_s30 + $0x890] sm:$0xff] }
 0x133   : > { %v2825_v31 = vpop.eup %2824  ;;  %1911 = vst [vmem:[%s3608_s17 + $0x768] sm:$0xff] %v1125_v26  ;;  %v1129_v32 = vmul.f32 0.6931472, %v2823_v28  ;;  %2850 = vlog2.f32 %v391_v24  ;;  %v413_v26 = vld [vmem:[%s3581_s30 + $0x898] sm:$0xff] }
 0x134   : > { %v2827_v34 = vpop.eup %2826  ;;  %1912 = vst [vmem:[%s3608_s17 + $0x770] sm:$0xff] %v1127_v29  ;;  %v1131_v35 = vmul.f32 0.6931472, %v2825_v31  ;;  %2852 = vlog2.f32 %v392_v27  ;;  %v414_v29 = vld [vmem:[%s3581_s30 + $0x8a0] sm:$0xff] }
 0x135   : > { %v2829_v37 = vpop.eup %2828  ;;  %1913 = vst [vmem:[%s3608_s17 + $0x778] sm:$0xff] %v1129_v32  ;;  %v1133_v38 = vmul.f32 0.6931472, %v2827_v34  ;;  %2854 = vlog2.f32 %v393_v30  ;;  %v415_v32 = vld [vmem:[%s3581_s30 + $0x8a8] sm:$0xff] }
 0x136   : > { %v2831_v40 = vpop.eup %2830  ;;  %1914 = vst [vmem:[%s3608_s17 + $0x780] sm:$0xff] %v1131_v35  ;;  %v1135_v41 = vmul.f32 0.6931472, %v2829_v37  ;;  %2856 = vlog2.f32 %v394_v33  ;;  %v416_v35 = vld [vmem:[%s3581_s30 + $0x8b0] sm:$0xff] }
 0x137   : > { %v2833_v43 = vpop.eup %2832  ;;  %1915 = vst [vmem:[%s3608_s17 + $0x788] sm:$0xff] %v1133_v38  ;;  %v1137_v44 = vmul.f32 0.6931472, %v2831_v40  ;;  %2858 = vlog2.f32 %v395_v36  ;;  %v417_v38 = vld [vmem:[%s3581_s30 + $0x8b8] sm:$0xff] }
 0x138   : > { %v2835_v46 = vpop.eup %2834  ;;  %1916 = vst [vmem:[%s3608_s17 + $0x790] sm:$0xff] %v1135_v41  ;;  %v1139_v47 = vmul.f32 0.6931472, %v2833_v43  ;;  %2860 = vlog2.f32 %v396_v39  ;;  %v418_v41 = vld [vmem:[%s3581_s30 + $0x8c0] sm:$0xff] }
 0x139   : > { %v2837_v49 = vpop.eup %2836  ;;  %1917 = vst [vmem:[%s3608_s17 + $0x798] sm:$0xff] %v1137_v44  ;;  %v1141_v50 = vmul.f32 0.6931472, %v2835_v46  ;;  %2862 = vlog2.f32 %v397_v42  ;;  %v419_v44 = vld [vmem:[%s3581_s30 + $0x8c8] sm:$0xff] }
 0x13a   : > { %v2839_v52 = vpop.eup %2838  ;;  %1918 = vst [vmem:[%s3608_s17 + $0x7a0] sm:$0xff] %v1139_v47  ;;  %v1143_v53 = vmul.f32 0.6931472, %v2837_v49  ;;  %2864 = vlog2.f32 %v398_v45  ;;  %v420_v47 = vld [vmem:[%s3581_s30 + $0x8d0] sm:$0xff] }
 0x13b   : > { %v2841_v55 = vpop.eup %2840  ;;  %1919 = vst [vmem:[%s3608_s17 + $0x7a8] sm:$0xff] %v1141_v50  ;;  %v1145_v56 = vmul.f32 0.6931472, %v2839_v52  ;;  %2866 = vlog2.f32 %v399_v48  ;;  %v421_v50 = vld [vmem:[%s3581_s30 + $0x8d8] sm:$0xff] }
 0x13c   : > { %v2843_v58 = vpop.eup %2842  ;;  %1920 = vst [vmem:[%s3608_s17 + $0x7b0] sm:$0xff] %v1143_v53  ;;  %v1147_v59 = vmul.f32 0.6931472, %v2841_v55  ;;  %2868 = vlog2.f32 %v400_v51  ;;  %v422_v53 = vld [vmem:[%s3581_s30 + $0x8e0] sm:$0xff] }
 0x13d   : > { %v2845_v61 = vpop.eup %2844  ;;  %1921 = vst [vmem:[%s3608_s17 + $0x7b8] sm:$0xff] %v1145_v56  ;;  %v1149_v62 = vmul.f32 0.6931472, %v2843_v58  ;;  %2870 = vlog2.f32 %v401_v54  ;;  %v423_v56 = vld [vmem:[%s3581_s30 + $0x8e8] sm:$0xff] }
 0x13e   : > { %v2847_v0 = vpop.eup %2846  ;;  %1922 = vst [vmem:[%s3608_s17 + $0x7c0] sm:$0xff] %v1147_v59  ;;  %v1151_v1 = vmul.f32 0.6931472, %v2845_v61  ;;  %2872 = vlog2.f32 %v402_v57  ;;  %v424_v59 = vld [vmem:[%s3581_s30 + $0x8f0] sm:$0xff] }
 0x13f   : > { %v2849_v3 = vpop.eup %2848  ;;  %1923 = vst [vmem:[%s3608_s17 + $0x7c8] sm:$0xff] %v1149_v62  ;;  %v1153_v4 = vmul.f32 0.6931472, %v2847_v0  ;;  %2874 = vlog2.f32 %v403_v60  ;;  %v425_v62 = vld [vmem:[%s3581_s30 + $0x8f8] sm:$0xff] }
 0x140   : > { %v2851_v6 = vpop.eup %2850  ;;  %1924 = vst [vmem:[%s3608_s17 + $0x7d0] sm:$0xff] %v1151_v1  ;;  %v1155_v7 = vmul.f32 0.6931472, %v2849_v3  ;;  %2876 = vlog2.f32 %v404_v63  ;;  %v426_v1 = vld [vmem:[%s3581_s30 + $0x900] sm:$0xff] }
 0x141   : > { %v2853_v9 = vpop.eup %2852  ;;  %1925 = vst [vmem:[%s3608_s17 + $0x7d8] sm:$0xff] %v1153_v4  ;;  %v1157_v10 = vmul.f32 0.6931472, %v2851_v6  ;;  %2878 = vlog2.f32 %v405_v2  ;;  %v427_v4 = vld [vmem:[%s3581_s30 + $0x908] sm:$0xff] }
 0x142   : > { %v2855_v12 = vpop.eup %2854  ;;  %1926 = vst [vmem:[%s3608_s17 + $0x7e0] sm:$0xff] %v1155_v7  ;;  %v1159_v13 = vmul.f32 0.6931472, %v2853_v9  ;;  %2880 = vlog2.f32 %v406_v5  ;;  %v428_v7 = vld [vmem:[%s3581_s30 + $0x910] sm:$0xff] }
 0x143   : > { %v2857_v15 = vpop.eup %2856  ;;  %1927 = vst [vmem:[%s3608_s17 + $0x7e8] sm:$0xff] %v1157_v10  ;;  %v1161_v16 = vmul.f32 0.6931472, %v2855_v12  ;;  %2882 = vlog2.f32 %v407_v8  ;;  %v429_v10 = vld [vmem:[%s3581_s30 + $0x918] sm:$0xff] }
 0x144   : > { %v2859_v18 = vpop.eup %2858  ;;  %1928 = vst [vmem:[%s3608_s17 + $0x7f0] sm:$0xff] %v1159_v13  ;;  %v1163_v19 = vmul.f32 0.6931472, %v2857_v15  ;;  %2884 = vlog2.f32 %v408_v11  ;;  %v430_v13 = vld [vmem:[%s3581_s30 + $0x920] sm:$0xff] }
 0x145   : > { %v2861_v21 = vpop.eup %2860  ;;  %1929 = vst [vmem:[%s3608_s17 + $0x7f8] sm:$0xff] %v1161_v16  ;;  %v1165_v22 = vmul.f32 0.6931472, %v2859_v18  ;;  %2886 = vlog2.f32 %v409_v14  ;;  %v431_v16 = vld [vmem:[%s3581_s30 + $0x928] sm:$0xff] }
 0x146   : > { %v2863_v24 = vpop.eup %2862  ;;  %1930 = vst [vmem:[%s3608_s17 + $0x800] sm:$0xff] %v1163_v19  ;;  %v1167_v25 = vmul.f32 0.6931472, %v2861_v21  ;;  %2888 = vlog2.f32 %v410_v17  ;;  %v432_v19 = vld [vmem:[%s3581_s30 + $0x930] sm:$0xff] }
 0x147   : > { %v2865_v27 = vpop.eup %2864  ;;  %1931 = vst [vmem:[%s3608_s17 + $0x808] sm:$0xff] %v1165_v22  ;;  %v1169_v28 = vmul.f32 0.6931472, %v2863_v24  ;;  %2890 = vlog2.f32 %v411_v20  ;;  %v433_v22 = vld [vmem:[%s3581_s30 + $0x938] sm:$0xff] }
 0x148   : > { %v2867_v30 = vpop.eup %2866  ;;  %1932 = vst [vmem:[%s3608_s17 + $0x810] sm:$0xff] %v1167_v25  ;;  %v1171_v31 = vmul.f32 0.6931472, %v2865_v27  ;;  %2892 = vlog2.f32 %v412_v23  ;;  %v434_v25 = vld [vmem:[%s3581_s30 + $0x940] sm:$0xff] }
 0x149   : > { %v2869_v33 = vpop.eup %2868  ;;  %1933 = vst [vmem:[%s3608_s17 + $0x818] sm:$0xff] %v1169_v28  ;;  %v1173_v34 = vmul.f32 0.6931472, %v2867_v30  ;;  %2894 = vlog2.f32 %v413_v26  ;;  %v435_v28 = vld [vmem:[%s3581_s30 + $0x948] sm:$0xff] }
 0x14a   : > { %v2871_v36 = vpop.eup %2870  ;;  %1934 = vst [vmem:[%s3608_s17 + $0x820] sm:$0xff] %v1171_v31  ;;  %v1175_v37 = vmul.f32 0.6931472, %v2869_v33  ;;  %2896 = vlog2.f32 %v414_v29  ;;  %v436_v31 = vld [vmem:[%s3581_s30 + $0x950] sm:$0xff] }
 0x14b   : > { %v2873_v39 = vpop.eup %2872  ;;  %1935 = vst [vmem:[%s3608_s17 + $0x828] sm:$0xff] %v1173_v34  ;;  %v1177_v40 = vmul.f32 0.6931472, %v2871_v36  ;;  %2898 = vlog2.f32 %v415_v32  ;;  %v437_v34 = vld [vmem:[%s3581_s30 + $0x958] sm:$0xff] }
 0x14c   : > { %v2875_v42 = vpop.eup %2874  ;;  %1936 = vst [vmem:[%s3608_s17 + $0x830] sm:$0xff] %v1175_v37  ;;  %v1179_v43 = vmul.f32 0.6931472, %v2873_v39  ;;  %2900 = vlog2.f32 %v416_v35  ;;  %v438_v37 = vld [vmem:[%s3581_s30 + $0x960] sm:$0xff] }
 0x14d   : > { %v2877_v45 = vpop.eup %2876  ;;  %1937 = vst [vmem:[%s3608_s17 + $0x838] sm:$0xff] %v1177_v40  ;;  %v1181_v46 = vmul.f32 0.6931472, %v2875_v42  ;;  %2902 = vlog2.f32 %v417_v38  ;;  %v439_v40 = vld [vmem:[%s3581_s30 + $0x968] sm:$0xff] }
 0x14e   : > { %v2879_v48 = vpop.eup %2878  ;;  %1938 = vst [vmem:[%s3608_s17 + $0x840] sm:$0xff] %v1179_v43  ;;  %v1183_v49 = vmul.f32 0.6931472, %v2877_v45  ;;  %2904 = vlog2.f32 %v418_v41  ;;  %v440_v43 = vld [vmem:[%s3581_s30 + $0x970] sm:$0xff] }
 0x14f   : > { %v2881_v51 = vpop.eup %2880  ;;  %1939 = vst [vmem:[%s3608_s17 + $0x848] sm:$0xff] %v1181_v46  ;;  %v1185_v52 = vmul.f32 0.6931472, %v2879_v48  ;;  %2906 = vlog2.f32 %v419_v44  ;;  %v441_v46 = vld [vmem:[%s3581_s30 + $0x978] sm:$0xff] }
 0x150   : > { %v2883_v54 = vpop.eup %2882  ;;  %1940 = vst [vmem:[%s3608_s17 + $0x850] sm:$0xff] %v1183_v49  ;;  %v1187_v55 = vmul.f32 0.6931472, %v2881_v51  ;;  %2908 = vlog2.f32 %v420_v47  ;;  %v442_v49 = vld [vmem:[%s3581_s30 + $0x980] sm:$0xff] }
 0x151   : > { %v2885_v57 = vpop.eup %2884  ;;  %1941 = vst [vmem:[%s3608_s17 + $0x858] sm:$0xff] %v1185_v52  ;;  %v1189_v58 = vmul.f32 0.6931472, %v2883_v54  ;;  %2910 = vlog2.f32 %v421_v50  ;;  %v443_v52 = vld [vmem:[%s3581_s30 + $0x988] sm:$0xff] }
 0x152   : > { %v2887_v60 = vpop.eup %2886  ;;  %1942 = vst [vmem:[%s3608_s17 + $0x860] sm:$0xff] %v1187_v55  ;;  %v1191_v61 = vmul.f32 0.6931472, %v2885_v57  ;;  %2912 = vlog2.f32 %v422_v53  ;;  %v444_v55 = vld [vmem:[%s3581_s30 + $0x990] sm:$0xff] }
 0x153   : > { %v2889_v63 = vpop.eup %2888  ;;  %1943 = vst [vmem:[%s3608_s17 + $0x868] sm:$0xff] %v1189_v58  ;;  %v1193_v0 = vmul.f32 0.6931472, %v2887_v60  ;;  %2914 = vlog2.f32 %v423_v56  ;;  %v445_v58 = vld [vmem:[%s3581_s30 + $0x998] sm:$0xff] }
 0x154   : > { %v2891_v2 = vpop.eup %2890  ;;  %1944 = vst [vmem:[%s3608_s17 + $0x870] sm:$0xff] %v1191_v61  ;;  %v1195_v3 = vmul.f32 0.6931472, %v2889_v63  ;;  %2916 = vlog2.f32 %v424_v59  ;;  %v446_v61 = vld [vmem:[%s3581_s30 + $0x9a0] sm:$0xff] }
 0x155   : > { %v2893_v5 = vpop.eup %2892  ;;  %1945 = vst [vmem:[%s3608_s17 + $0x878] sm:$0xff] %v1193_v0  ;;  %v1197_v6 = vmul.f32 0.6931472, %v2891_v2  ;;  %2918 = vlog2.f32 %v425_v62  ;;  %v447_v0 = vld [vmem:[%s3581_s30 + $0x9a8] sm:$0xff] }
 0x156   : > { %v2895_v8 = vpop.eup %2894  ;;  %1946 = vst [vmem:[%s3608_s17 + $0x880] sm:$0xff] %v1195_v3  ;;  %v1199_v9 = vmul.f32 0.6931472, %v2893_v5  ;;  %2920 = vlog2.f32 %v426_v1  ;;  %v448_v3 = vld [vmem:[%s3581_s30 + $0x9b0] sm:$0xff] }
 0x157   : > { %v2897_v11 = vpop.eup %2896  ;;  %1947 = vst [vmem:[%s3608_s17 + $0x888] sm:$0xff] %v1197_v6  ;;  %v1201_v12 = vmul.f32 0.6931472, %v2895_v8  ;;  %2922 = vlog2.f32 %v427_v4  ;;  %v449_v6 = vld [vmem:[%s3581_s30 + $0x9b8] sm:$0xff] }
 0x158   : > { %v2899_v14 = vpop.eup %2898  ;;  %1948 = vst [vmem:[%s3608_s17 + $0x890] sm:$0xff] %v1199_v9  ;;  %v1203_v15 = vmul.f32 0.6931472, %v2897_v11  ;;  %2924 = vlog2.f32 %v428_v7  ;;  %v450_v9 = vld [vmem:[%s3581_s30 + $0x9c0] sm:$0xff] }
 0x159   : > { %v2901_v17 = vpop.eup %2900  ;;  %1949 = vst [vmem:[%s3608_s17 + $0x898] sm:$0xff] %v1201_v12  ;;  %v1205_v18 = vmul.f32 0.6931472, %v2899_v14  ;;  %2926 = vlog2.f32 %v429_v10  ;;  %v451_v12 = vld [vmem:[%s3581_s30 + $0x9c8] sm:$0xff] }
 0x15a   : > { %v2903_v20 = vpop.eup %2902  ;;  %1950 = vst [vmem:[%s3608_s17 + $0x8a0] sm:$0xff] %v1203_v15  ;;  %v1207_v21 = vmul.f32 0.6931472, %v2901_v17  ;;  %2928 = vlog2.f32 %v430_v13  ;;  %v452_v15 = vld [vmem:[%s3581_s30 + $0x9d0] sm:$0xff] }
 0x15b   : > { %v2905_v23 = vpop.eup %2904  ;;  %1951 = vst [vmem:[%s3608_s17 + $0x8a8] sm:$0xff] %v1205_v18  ;;  %v1209_v24 = vmul.f32 0.6931472, %v2903_v20  ;;  %2930 = vlog2.f32 %v431_v16  ;;  %v453_v18 = vld [vmem:[%s3581_s30 + $0x9d8] sm:$0xff] }
 0x15c   : > { %v2907_v26 = vpop.eup %2906  ;;  %1952 = vst [vmem:[%s3608_s17 + $0x8b0] sm:$0xff] %v1207_v21  ;;  %v1211_v27 = vmul.f32 0.6931472, %v2905_v23  ;;  %2932 = vlog2.f32 %v432_v19  ;;  %v454_v21 = vld [vmem:[%s3581_s30 + $0x9e0] sm:$0xff] }
 0x15d   : > { %v2909_v29 = vpop.eup %2908  ;;  %1953 = vst [vmem:[%s3608_s17 + $0x8b8] sm:$0xff] %v1209_v24  ;;  %v1213_v30 = vmul.f32 0.6931472, %v2907_v26  ;;  %2934 = vlog2.f32 %v433_v22  ;;  %v455_v24 = vld [vmem:[%s3581_s30 + $0x9e8] sm:$0xff] }
 0x15e   : > { %v2911_v32 = vpop.eup %2910  ;;  %1954 = vst [vmem:[%s3608_s17 + $0x8c0] sm:$0xff] %v1211_v27  ;;  %v1215_v33 = vmul.f32 0.6931472, %v2909_v29  ;;  %2936 = vlog2.f32 %v434_v25  ;;  %v456_v27 = vld [vmem:[%s3581_s30 + $0x9f0] sm:$0xff] }
 0x15f   : > { %v2913_v35 = vpop.eup %2912  ;;  %1955 = vst [vmem:[%s3608_s17 + $0x8c8] sm:$0xff] %v1213_v30  ;;  %v1217_v36 = vmul.f32 0.6931472, %v2911_v32  ;;  %2938 = vlog2.f32 %v435_v28  ;;  %v457_v30 = vld [vmem:[%s3581_s30 + $0x9f8] sm:$0xff] }
 0x160   : > { %v2915_v38 = vpop.eup %2914  ;;  %1956 = vst [vmem:[%s3608_s17 + $0x8d0] sm:$0xff] %v1215_v33  ;;  %v1219_v39 = vmul.f32 0.6931472, %v2913_v35  ;;  %2940 = vlog2.f32 %v436_v31  ;;  %v458_v33 = vld [vmem:[%s3581_s30 + $0xa00] sm:$0xff] }
 0x161   : > { %v2917_v41 = vpop.eup %2916  ;;  %1957 = vst [vmem:[%s3608_s17 + $0x8d8] sm:$0xff] %v1217_v36  ;;  %v1221_v42 = vmul.f32 0.6931472, %v2915_v38  ;;  %2942 = vlog2.f32 %v437_v34  ;;  %v459_v36 = vld [vmem:[%s3581_s30 + $0xa08] sm:$0xff] }
 0x162   : > { %v2919_v44 = vpop.eup %2918  ;;  %1958 = vst [vmem:[%s3608_s17 + $0x8e0] sm:$0xff] %v1219_v39  ;;  %v1223_v45 = vmul.f32 0.6931472, %v2917_v41  ;;  %2944 = vlog2.f32 %v438_v37  ;;  %v460_v39 = vld [vmem:[%s3581_s30 + $0xa10] sm:$0xff] }
 0x163   : > { %v2921_v47 = vpop.eup %2920  ;;  %1959 = vst [vmem:[%s3608_s17 + $0x8e8] sm:$0xff] %v1221_v42  ;;  %v1225_v48 = vmul.f32 0.6931472, %v2919_v44  ;;  %2946 = vlog2.f32 %v439_v40  ;;  %v461_v42 = vld [vmem:[%s3581_s30 + $0xa18] sm:$0xff] }
 0x164   : > { %v2923_v50 = vpop.eup %2922  ;;  %1960 = vst [vmem:[%s3608_s17 + $0x8f0] sm:$0xff] %v1223_v45  ;;  %v1227_v51 = vmul.f32 0.6931472, %v2921_v47  ;;  %2948 = vlog2.f32 %v440_v43  ;;  %v462_v45 = vld [vmem:[%s3581_s30 + $0xa20] sm:$0xff] }
 0x165   : > { %v2925_v53 = vpop.eup %2924  ;;  %1961 = vst [vmem:[%s3608_s17 + $0x8f8] sm:$0xff] %v1225_v48  ;;  %v1229_v54 = vmul.f32 0.6931472, %v2923_v50  ;;  %2950 = vlog2.f32 %v441_v46  ;;  %v463_v48 = vld [vmem:[%s3581_s30 + $0xa28] sm:$0xff] }
 0x166   : > { %v2927_v56 = vpop.eup %2926  ;;  %1962 = vst [vmem:[%s3608_s17 + $0x900] sm:$0xff] %v1227_v51  ;;  %v1231_v57 = vmul.f32 0.6931472, %v2925_v53  ;;  %2952 = vlog2.f32 %v442_v49  ;;  %v464_v51 = vld [vmem:[%s3581_s30 + $0xa30] sm:$0xff] }
 0x167   : > { %v2929_v59 = vpop.eup %2928  ;;  %1963 = vst [vmem:[%s3608_s17 + $0x908] sm:$0xff] %v1229_v54  ;;  %v1233_v60 = vmul.f32 0.6931472, %v2927_v56  ;;  %2954 = vlog2.f32 %v443_v52  ;;  %v465_v54 = vld [vmem:[%s3581_s30 + $0xa38] sm:$0xff] }
 0x168   : > { %v2931_v62 = vpop.eup %2930  ;;  %1964 = vst [vmem:[%s3608_s17 + $0x910] sm:$0xff] %v1231_v57  ;;  %v1235_v63 = vmul.f32 0.6931472, %v2929_v59  ;;  %2956 = vlog2.f32 %v444_v55  ;;  %v466_v57 = vld [vmem:[%s3581_s30 + $0xa40] sm:$0xff] }
 0x169   : > { %v2933_v1 = vpop.eup %2932  ;;  %1965 = vst [vmem:[%s3608_s17 + $0x918] sm:$0xff] %v1233_v60  ;;  %v1237_v2 = vmul.f32 0.6931472, %v2931_v62  ;;  %2958 = vlog2.f32 %v445_v58  ;;  %v467_v60 = vld [vmem:[%s3581_s30 + $0xa48] sm:$0xff] }
 0x16a   : > { %v2935_v4 = vpop.eup %2934  ;;  %1966 = vst [vmem:[%s3608_s17 + $0x920] sm:$0xff] %v1235_v63  ;;  %v1239_v5 = vmul.f32 0.6931472, %v2933_v1  ;;  %2960 = vlog2.f32 %v446_v61  ;;  %v468_v63 = vld [vmem:[%s3581_s30 + $0xa50] sm:$0xff] }
 0x16b   : > { %v2937_v7 = vpop.eup %2936  ;;  %1967 = vst [vmem:[%s3608_s17 + $0x928] sm:$0xff] %v1237_v2  ;;  %v1241_v8 = vmul.f32 0.6931472, %v2935_v4  ;;  %2962 = vlog2.f32 %v447_v0  ;;  %v469_v2 = vld [vmem:[%s3581_s30 + $0xa58] sm:$0xff] }
 0x16c   : > { %v2939_v10 = vpop.eup %2938  ;;  %1968 = vst [vmem:[%s3608_s17 + $0x930] sm:$0xff] %v1239_v5  ;;  %v1243_v11 = vmul.f32 0.6931472, %v2937_v7  ;;  %2964 = vlog2.f32 %v448_v3  ;;  %v470_v5 = vld [vmem:[%s3581_s30 + $0xa60] sm:$0xff] }
 0x16d   : > { %v2941_v13 = vpop.eup %2940  ;;  %1969 = vst [vmem:[%s3608_s17 + $0x938] sm:$0xff] %v1241_v8  ;;  %v1245_v14 = vmul.f32 0.6931472, %v2939_v10  ;;  %2966 = vlog2.f32 %v449_v6  ;;  %v471_v8 = vld [vmem:[%s3581_s30 + $0xa68] sm:$0xff] }
 0x16e   : > { %v2943_v16 = vpop.eup %2942  ;;  %1970 = vst [vmem:[%s3608_s17 + $0x940] sm:$0xff] %v1243_v11  ;;  %v1247_v17 = vmul.f32 0.6931472, %v2941_v13  ;;  %2968 = vlog2.f32 %v450_v9  ;;  %v472_v11 = vld [vmem:[%s3581_s30 + $0xa70] sm:$0xff] }
 0x16f   : > { %v2945_v19 = vpop.eup %2944  ;;  %1971 = vst [vmem:[%s3608_s17 + $0x948] sm:$0xff] %v1245_v14  ;;  %v1249_v20 = vmul.f32 0.6931472, %v2943_v16  ;;  %2970 = vlog2.f32 %v451_v12  ;;  %v473_v14 = vld [vmem:[%s3581_s30 + $0xa78] sm:$0xff] }
 0x170   : > { %v2947_v22 = vpop.eup %2946  ;;  %1972 = vst [vmem:[%s3608_s17 + $0x950] sm:$0xff] %v1247_v17  ;;  %v1251_v23 = vmul.f32 0.6931472, %v2945_v19  ;;  %2972 = vlog2.f32 %v452_v15  ;;  %v474_v17 = vld [vmem:[%s3581_s30 + $0xa80] sm:$0xff] }
 0x171   : > { %v2949_v25 = vpop.eup %2948  ;;  %1973 = vst [vmem:[%s3608_s17 + $0x958] sm:$0xff] %v1249_v20  ;;  %v1253_v26 = vmul.f32 0.6931472, %v2947_v22  ;;  %2974 = vlog2.f32 %v453_v18  ;;  %v475_v20 = vld [vmem:[%s3581_s30 + $0xa88] sm:$0xff] }
 0x172   : > { %v2951_v28 = vpop.eup %2950  ;;  %1974 = vst [vmem:[%s3608_s17 + $0x960] sm:$0xff] %v1251_v23  ;;  %v1255_v29 = vmul.f32 0.6931472, %v2949_v25  ;;  %2976 = vlog2.f32 %v454_v21  ;;  %v476_v23 = vld [vmem:[%s3581_s30 + $0xa90] sm:$0xff] }
 0x173   : > { %v2953_v31 = vpop.eup %2952  ;;  %1975 = vst [vmem:[%s3608_s17 + $0x968] sm:$0xff] %v1253_v26  ;;  %v1257_v32 = vmul.f32 0.6931472, %v2951_v28  ;;  %2978 = vlog2.f32 %v455_v24  ;;  %v477_v26 = vld [vmem:[%s3581_s30 + $0xa98] sm:$0xff] }
 0x174   : > { %v2955_v34 = vpop.eup %2954  ;;  %1976 = vst [vmem:[%s3608_s17 + $0x970] sm:$0xff] %v1255_v29  ;;  %v1259_v35 = vmul.f32 0.6931472, %v2953_v31  ;;  %2980 = vlog2.f32 %v456_v27  ;;  %v478_v29 = vld [vmem:[%s3581_s30 + $0xaa0] sm:$0xff] }
 0x175   : > { %v2957_v37 = vpop.eup %2956  ;;  %1977 = vst [vmem:[%s3608_s17 + $0x978] sm:$0xff] %v1257_v32  ;;  %v1261_v38 = vmul.f32 0.6931472, %v2955_v34  ;;  %2982 = vlog2.f32 %v457_v30  ;;  %v479_v32 = vld [vmem:[%s3581_s30 + $0xaa8] sm:$0xff] }
 0x176   : > { %v2959_v40 = vpop.eup %2958  ;;  %1978 = vst [vmem:[%s3608_s17 + $0x980] sm:$0xff] %v1259_v35  ;;  %v1263_v41 = vmul.f32 0.6931472, %v2957_v37  ;;  %2984 = vlog2.f32 %v458_v33  ;;  %v480_v35 = vld [vmem:[%s3581_s30 + $0xab0] sm:$0xff] }
 0x177   : > { %v2961_v43 = vpop.eup %2960  ;;  %1979 = vst [vmem:[%s3608_s17 + $0x988] sm:$0xff] %v1261_v38  ;;  %v1265_v44 = vmul.f32 0.6931472, %v2959_v40  ;;  %2986 = vlog2.f32 %v459_v36  ;;  %v481_v38 = vld [vmem:[%s3581_s30 + $0xab8] sm:$0xff] }
 0x178   : > { %v2963_v46 = vpop.eup %2962  ;;  %1980 = vst [vmem:[%s3608_s17 + $0x990] sm:$0xff] %v1263_v41  ;;  %v1267_v47 = vmul.f32 0.6931472, %v2961_v43  ;;  %2988 = vlog2.f32 %v460_v39  ;;  %v482_v41 = vld [vmem:[%s3581_s30 + $0xac0] sm:$0xff] }
 0x179   : > { %v2965_v49 = vpop.eup %2964  ;;  %1981 = vst [vmem:[%s3608_s17 + $0x998] sm:$0xff] %v1265_v44  ;;  %v1269_v50 = vmul.f32 0.6931472, %v2963_v46  ;;  %2990 = vlog2.f32 %v461_v42  ;;  %v483_v44 = vld [vmem:[%s3581_s30 + $0xac8] sm:$0xff] }
 0x17a   : > { %v2967_v52 = vpop.eup %2966  ;;  %1982 = vst [vmem:[%s3608_s17 + $0x9a0] sm:$0xff] %v1267_v47  ;;  %v1271_v53 = vmul.f32 0.6931472, %v2965_v49  ;;  %2992 = vlog2.f32 %v462_v45  ;;  %v484_v47 = vld [vmem:[%s3581_s30 + $0xad0] sm:$0xff] }
 0x17b   : > { %v2969_v55 = vpop.eup %2968  ;;  %1983 = vst [vmem:[%s3608_s17 + $0x9a8] sm:$0xff] %v1269_v50  ;;  %v1273_v56 = vmul.f32 0.6931472, %v2967_v52  ;;  %2994 = vlog2.f32 %v463_v48  ;;  %v485_v50 = vld [vmem:[%s3581_s30 + $0xad8] sm:$0xff] }
 0x17c   : > { %v2971_v58 = vpop.eup %2970  ;;  %1984 = vst [vmem:[%s3608_s17 + $0x9b0] sm:$0xff] %v1271_v53  ;;  %v1275_v59 = vmul.f32 0.6931472, %v2969_v55  ;;  %2996 = vlog2.f32 %v464_v51  ;;  %v486_v53 = vld [vmem:[%s3581_s30 + $0xae0] sm:$0xff] }
 0x17d   : > { %v2973_v61 = vpop.eup %2972  ;;  %1985 = vst [vmem:[%s3608_s17 + $0x9b8] sm:$0xff] %v1273_v56  ;;  %v1277_v62 = vmul.f32 0.6931472, %v2971_v58  ;;  %2998 = vlog2.f32 %v465_v54  ;;  %v487_v56 = vld [vmem:[%s3581_s30 + $0xae8] sm:$0xff] }
 0x17e   : > { %v2975_v0 = vpop.eup %2974  ;;  %1986 = vst [vmem:[%s3608_s17 + $0x9c0] sm:$0xff] %v1275_v59  ;;  %v1279_v1 = vmul.f32 0.6931472, %v2973_v61  ;;  %3000 = vlog2.f32 %v466_v57  ;;  %v488_v59 = vld [vmem:[%s3581_s30 + $0xaf0] sm:$0xff] }
 0x17f   : > { %v2977_v3 = vpop.eup %2976  ;;  %1987 = vst [vmem:[%s3608_s17 + $0x9c8] sm:$0xff] %v1277_v62  ;;  %v1281_v4 = vmul.f32 0.6931472, %v2975_v0  ;;  %3002 = vlog2.f32 %v467_v60  ;;  %v489_v62 = vld [vmem:[%s3581_s30 + $0xaf8] sm:$0xff] }
 0x180   : > { %v2979_v6 = vpop.eup %2978  ;;  %1988 = vst [vmem:[%s3608_s17 + $0x9d0] sm:$0xff] %v1279_v1  ;;  %v1283_v7 = vmul.f32 0.6931472, %v2977_v3  ;;  %3004 = vlog2.f32 %v468_v63  ;;  %v490_v1 = vld [vmem:[%s3581_s30 + $0xb00] sm:$0xff] }
 0x181   : > { %v2981_v9 = vpop.eup %2980  ;;  %1989 = vst [vmem:[%s3608_s17 + $0x9d8] sm:$0xff] %v1281_v4  ;;  %v1285_v10 = vmul.f32 0.6931472, %v2979_v6  ;;  %3006 = vlog2.f32 %v469_v2  ;;  %v491_v4 = vld [vmem:[%s3581_s30 + $0xb08] sm:$0xff] }
 0x182   : > { %v2983_v12 = vpop.eup %2982  ;;  %1990 = vst [vmem:[%s3608_s17 + $0x9e0] sm:$0xff] %v1283_v7  ;;  %v1287_v13 = vmul.f32 0.6931472, %v2981_v9  ;;  %3008 = vlog2.f32 %v470_v5  ;;  %v492_v7 = vld [vmem:[%s3581_s30 + $0xb10] sm:$0xff] }
 0x183   : > { %v2985_v15 = vpop.eup %2984  ;;  %1991 = vst [vmem:[%s3608_s17 + $0x9e8] sm:$0xff] %v1285_v10  ;;  %v1289_v16 = vmul.f32 0.6931472, %v2983_v12  ;;  %3010 = vlog2.f32 %v471_v8  ;;  %v493_v10 = vld [vmem:[%s3581_s30 + $0xb18] sm:$0xff] }
 0x184   : > { %v2987_v18 = vpop.eup %2986  ;;  %1992 = vst [vmem:[%s3608_s17 + $0x9f0] sm:$0xff] %v1287_v13  ;;  %v1291_v19 = vmul.f32 0.6931472, %v2985_v15  ;;  %3012 = vlog2.f32 %v472_v11  ;;  %v494_v13 = vld [vmem:[%s3581_s30 + $0xb20] sm:$0xff] }
 0x185   : > { %v2989_v21 = vpop.eup %2988  ;;  %1993 = vst [vmem:[%s3608_s17 + $0x9f8] sm:$0xff] %v1289_v16  ;;  %v1293_v22 = vmul.f32 0.6931472, %v2987_v18  ;;  %3014 = vlog2.f32 %v473_v14  ;;  %v495_v16 = vld [vmem:[%s3581_s30 + $0xb28] sm:$0xff] }
 0x186   : > { %v2991_v24 = vpop.eup %2990  ;;  %1994 = vst [vmem:[%s3608_s17 + $0xa00] sm:$0xff] %v1291_v19  ;;  %v1295_v25 = vmul.f32 0.6931472, %v2989_v21  ;;  %3016 = vlog2.f32 %v474_v17  ;;  %v496_v19 = vld [vmem:[%s3581_s30 + $0xb30] sm:$0xff] }
 0x187   : > { %v2993_v27 = vpop.eup %2992  ;;  %1995 = vst [vmem:[%s3608_s17 + $0xa08] sm:$0xff] %v1293_v22  ;;  %v1297_v28 = vmul.f32 0.6931472, %v2991_v24  ;;  %3018 = vlog2.f32 %v475_v20  ;;  %v497_v22 = vld [vmem:[%s3581_s30 + $0xb38] sm:$0xff] }
 0x188   : > { %v2995_v30 = vpop.eup %2994  ;;  %1996 = vst [vmem:[%s3608_s17 + $0xa10] sm:$0xff] %v1295_v25  ;;  %v1299_v31 = vmul.f32 0.6931472, %v2993_v27  ;;  %3020 = vlog2.f32 %v476_v23  ;;  %v498_v25 = vld [vmem:[%s3581_s30 + $0xb40] sm:$0xff] }
 0x189   : > { %v2997_v33 = vpop.eup %2996  ;;  %1997 = vst [vmem:[%s3608_s17 + $0xa18] sm:$0xff] %v1297_v28  ;;  %v1301_v34 = vmul.f32 0.6931472, %v2995_v30  ;;  %3022 = vlog2.f32 %v477_v26  ;;  %v499_v28 = vld [vmem:[%s3581_s30 + $0xb48] sm:$0xff] }
 0x18a   : > { %v2999_v36 = vpop.eup %2998  ;;  %1998 = vst [vmem:[%s3608_s17 + $0xa20] sm:$0xff] %v1299_v31  ;;  %v1303_v37 = vmul.f32 0.6931472, %v2997_v33  ;;  %3024 = vlog2.f32 %v478_v29  ;;  %v500_v31 = vld [vmem:[%s3581_s30 + $0xb50] sm:$0xff] }
 0x18b   : > { %v3001_v39 = vpop.eup %3000  ;;  %1999 = vst [vmem:[%s3608_s17 + $0xa28] sm:$0xff] %v1301_v34  ;;  %v1305_v40 = vmul.f32 0.6931472, %v2999_v36  ;;  %3026 = vlog2.f32 %v479_v32  ;;  %v501_v34 = vld [vmem:[%s3581_s30 + $0xb58] sm:$0xff] }
 0x18c   : > { %v3003_v42 = vpop.eup %3002  ;;  %2000 = vst [vmem:[%s3608_s17 + $0xa30] sm:$0xff] %v1303_v37  ;;  %v1307_v43 = vmul.f32 0.6931472, %v3001_v39  ;;  %3028 = vlog2.f32 %v480_v35  ;;  %v502_v37 = vld [vmem:[%s3581_s30 + $0xb60] sm:$0xff] }
 0x18d   : > { %v3005_v45 = vpop.eup %3004  ;;  %2001 = vst [vmem:[%s3608_s17 + $0xa38] sm:$0xff] %v1305_v40  ;;  %v1309_v46 = vmul.f32 0.6931472, %v3003_v42  ;;  %3030 = vlog2.f32 %v481_v38  ;;  %v503_v40 = vld [vmem:[%s3581_s30 + $0xb68] sm:$0xff] }
 0x18e   : > { %v3007_v48 = vpop.eup %3006  ;;  %2002 = vst [vmem:[%s3608_s17 + $0xa40] sm:$0xff] %v1307_v43  ;;  %v1311_v49 = vmul.f32 0.6931472, %v3005_v45  ;;  %3032 = vlog2.f32 %v482_v41  ;;  %v504_v43 = vld [vmem:[%s3581_s30 + $0xb70] sm:$0xff] }
 0x18f   : > { %v3009_v51 = vpop.eup %3008  ;;  %2003 = vst [vmem:[%s3608_s17 + $0xa48] sm:$0xff] %v1309_v46  ;;  %v1313_v52 = vmul.f32 0.6931472, %v3007_v48  ;;  %3034 = vlog2.f32 %v483_v44  ;;  %v505_v46 = vld [vmem:[%s3581_s30 + $0xb78] sm:$0xff] }
 0x190   : > { %v3011_v54 = vpop.eup %3010  ;;  %2004 = vst [vmem:[%s3608_s17 + $0xa50] sm:$0xff] %v1311_v49  ;;  %v1315_v55 = vmul.f32 0.6931472, %v3009_v51  ;;  %3036 = vlog2.f32 %v484_v47  ;;  %v506_v49 = vld [vmem:[%s3581_s30 + $0xb80] sm:$0xff] }
 0x191   : > { %v3013_v57 = vpop.eup %3012  ;;  %2005 = vst [vmem:[%s3608_s17 + $0xa58] sm:$0xff] %v1313_v52  ;;  %v1317_v58 = vmul.f32 0.6931472, %v3011_v54  ;;  %3038 = vlog2.f32 %v485_v50  ;;  %v507_v52 = vld [vmem:[%s3581_s30 + $0xb88] sm:$0xff] }
 0x192   : > { %v3015_v60 = vpop.eup %3014  ;;  %2006 = vst [vmem:[%s3608_s17 + $0xa60] sm:$0xff] %v1315_v55  ;;  %v1319_v61 = vmul.f32 0.6931472, %v3013_v57  ;;  %3040 = vlog2.f32 %v486_v53  ;;  %v508_v55 = vld [vmem:[%s3581_s30 + $0xb90] sm:$0xff] }
 0x193   : > { %v3017_v63 = vpop.eup %3016  ;;  %2007 = vst [vmem:[%s3608_s17 + $0xa68] sm:$0xff] %v1317_v58  ;;  %v1321_v0 = vmul.f32 0.6931472, %v3015_v60  ;;  %3042 = vlog2.f32 %v487_v56  ;;  %v509_v58 = vld [vmem:[%s3581_s30 + $0xb98] sm:$0xff] }
 0x194   : > { %v3019_v2 = vpop.eup %3018  ;;  %2008 = vst [vmem:[%s3608_s17 + $0xa70] sm:$0xff] %v1319_v61  ;;  %v1323_v3 = vmul.f32 0.6931472, %v3017_v63  ;;  %3044 = vlog2.f32 %v488_v59  ;;  %v510_v61 = vld [vmem:[%s3581_s30 + $0xba0] sm:$0xff] }
 0x195   : > { %v3021_v5 = vpop.eup %3020  ;;  %2009 = vst [vmem:[%s3608_s17 + $0xa78] sm:$0xff] %v1321_v0  ;;  %v1325_v6 = vmul.f32 0.6931472, %v3019_v2  ;;  %3046 = vlog2.f32 %v489_v62  ;;  %v511_v0 = vld [vmem:[%s3581_s30 + $0xba8] sm:$0xff] }
 0x196   : > { %v3023_v8 = vpop.eup %3022  ;;  %2010 = vst [vmem:[%s3608_s17 + $0xa80] sm:$0xff] %v1323_v3  ;;  %v1327_v9 = vmul.f32 0.6931472, %v3021_v5  ;;  %3048 = vlog2.f32 %v490_v1  ;;  %v512_v3 = vld [vmem:[%s3581_s30 + $0xbb0] sm:$0xff] }
 0x197   : > { %v3025_v11 = vpop.eup %3024  ;;  %2011 = vst [vmem:[%s3608_s17 + $0xa88] sm:$0xff] %v1325_v6  ;;  %v1329_v12 = vmul.f32 0.6931472, %v3023_v8  ;;  %3050 = vlog2.f32 %v491_v4  ;;  %v513_v6 = vld [vmem:[%s3581_s30 + $0xbb8] sm:$0xff] }
 0x198   : > { %v3027_v14 = vpop.eup %3026  ;;  %2012 = vst [vmem:[%s3608_s17 + $0xa90] sm:$0xff] %v1327_v9  ;;  %v1331_v15 = vmul.f32 0.6931472, %v3025_v11  ;;  %3052 = vlog2.f32 %v492_v7  ;;  %v514_v9 = vld [vmem:[%s3581_s30 + $0xbc0] sm:$0xff] }
 0x199   : > { %v3029_v17 = vpop.eup %3028  ;;  %2013 = vst [vmem:[%s3608_s17 + $0xa98] sm:$0xff] %v1329_v12  ;;  %v1333_v18 = vmul.f32 0.6931472, %v3027_v14  ;;  %3054 = vlog2.f32 %v493_v10  ;;  %v515_v12 = vld [vmem:[%s3581_s30 + $0xbc8] sm:$0xff] }
 0x19a   : > { %v3031_v20 = vpop.eup %3030  ;;  %2014 = vst [vmem:[%s3608_s17 + $0xaa0] sm:$0xff] %v1331_v15  ;;  %v1335_v21 = vmul.f32 0.6931472, %v3029_v17  ;;  %3056 = vlog2.f32 %v494_v13  ;;  %v516_v15 = vld [vmem:[%s3581_s30 + $0xbd0] sm:$0xff] }
 0x19b   : > { %v3033_v23 = vpop.eup %3032  ;;  %2015 = vst [vmem:[%s3608_s17 + $0xaa8] sm:$0xff] %v1333_v18  ;;  %v1337_v24 = vmul.f32 0.6931472, %v3031_v20  ;;  %3058 = vlog2.f32 %v495_v16  ;;  %v517_v18 = vld [vmem:[%s3581_s30 + $0xbd8] sm:$0xff] }
 0x19c   : > { %v3035_v26 = vpop.eup %3034  ;;  %2016 = vst [vmem:[%s3608_s17 + $0xab0] sm:$0xff] %v1335_v21  ;;  %v1339_v27 = vmul.f32 0.6931472, %v3033_v23  ;;  %3060 = vlog2.f32 %v496_v19  ;;  %v518_v21 = vld [vmem:[%s3581_s30 + $0xbe0] sm:$0xff] }
 0x19d   : > { %v3037_v29 = vpop.eup %3036  ;;  %2017 = vst [vmem:[%s3608_s17 + $0xab8] sm:$0xff] %v1337_v24  ;;  %v1341_v30 = vmul.f32 0.6931472, %v3035_v26  ;;  %3062 = vlog2.f32 %v497_v22  ;;  %v519_v24 = vld [vmem:[%s3581_s30 + $0xbe8] sm:$0xff] }
 0x19e   : > { %v3039_v32 = vpop.eup %3038  ;;  %2018 = vst [vmem:[%s3608_s17 + $0xac0] sm:$0xff] %v1339_v27  ;;  %v1343_v33 = vmul.f32 0.6931472, %v3037_v29  ;;  %3064 = vlog2.f32 %v498_v25  ;;  %v520_v27 = vld [vmem:[%s3581_s30 + $0xbf0] sm:$0xff] }
 0x19f   : > { %v3041_v35 = vpop.eup %3040  ;;  %2019 = vst [vmem:[%s3608_s17 + $0xac8] sm:$0xff] %v1341_v30  ;;  %v1345_v36 = vmul.f32 0.6931472, %v3039_v32  ;;  %3066 = vlog2.f32 %v499_v28  ;;  %v521_v30 = vld [vmem:[%s3581_s30 + $0xbf8] sm:$0xff] }
 0x1a0   : > { %v3043_v38 = vpop.eup %3042  ;;  %2020 = vst [vmem:[%s3608_s17 + $0xad0] sm:$0xff] %v1343_v33  ;;  %v1347_v39 = vmul.f32 0.6931472, %v3041_v35  ;;  %3068 = vlog2.f32 %v500_v31  ;;  %v522_v33 = vld [vmem:[%s3581_s30 + $0xc00] sm:$0xff] }
 0x1a1   : > { %v3045_v41 = vpop.eup %3044  ;;  %2021 = vst [vmem:[%s3608_s17 + $0xad8] sm:$0xff] %v1345_v36  ;;  %v1349_v42 = vmul.f32 0.6931472, %v3043_v38  ;;  %3070 = vlog2.f32 %v501_v34  ;;  %v523_v36 = vld [vmem:[%s3581_s30 + $0xc08] sm:$0xff] }
 0x1a2   : > { %v3047_v44 = vpop.eup %3046  ;;  %2022 = vst [vmem:[%s3608_s17 + $0xae0] sm:$0xff] %v1347_v39  ;;  %v1351_v45 = vmul.f32 0.6931472, %v3045_v41  ;;  %3072 = vlog2.f32 %v502_v37  ;;  %v524_v39 = vld [vmem:[%s3581_s30 + $0xc10] sm:$0xff] }
 0x1a3   : > { %v3049_v47 = vpop.eup %3048  ;;  %2023 = vst [vmem:[%s3608_s17 + $0xae8] sm:$0xff] %v1349_v42  ;;  %v1353_v48 = vmul.f32 0.6931472, %v3047_v44  ;;  %3074 = vlog2.f32 %v503_v40  ;;  %v525_v42 = vld [vmem:[%s3581_s30 + $0xc18] sm:$0xff] }
 0x1a4   : > { %v3051_v50 = vpop.eup %3050  ;;  %2024 = vst [vmem:[%s3608_s17 + $0xaf0] sm:$0xff] %v1351_v45  ;;  %v1355_v51 = vmul.f32 0.6931472, %v3049_v47  ;;  %3076 = vlog2.f32 %v504_v43  ;;  %v526_v45 = vld [vmem:[%s3581_s30 + $0xc20] sm:$0xff] }
 0x1a5   : > { %v3053_v53 = vpop.eup %3052  ;;  %2025 = vst [vmem:[%s3608_s17 + $0xaf8] sm:$0xff] %v1353_v48  ;;  %v1357_v54 = vmul.f32 0.6931472, %v3051_v50  ;;  %3078 = vlog2.f32 %v505_v46  ;;  %v527_v48 = vld [vmem:[%s3581_s30 + $0xc28] sm:$0xff] }
 0x1a6   : > { %v3055_v56 = vpop.eup %3054  ;;  %2026 = vst [vmem:[%s3608_s17 + $0xb00] sm:$0xff] %v1355_v51  ;;  %v1359_v57 = vmul.f32 0.6931472, %v3053_v53  ;;  %3080 = vlog2.f32 %v506_v49  ;;  %v528_v51 = vld [vmem:[%s3581_s30 + $0xc30] sm:$0xff] }
 0x1a7   : > { %v3057_v59 = vpop.eup %3056  ;;  %2027 = vst [vmem:[%s3608_s17 + $0xb08] sm:$0xff] %v1357_v54  ;;  %v1361_v60 = vmul.f32 0.6931472, %v3055_v56  ;;  %3082 = vlog2.f32 %v507_v52  ;;  %v529_v54 = vld [vmem:[%s3581_s30 + $0xc38] sm:$0xff] }
 0x1a8   : > { %v3059_v62 = vpop.eup %3058  ;;  %2028 = vst [vmem:[%s3608_s17 + $0xb10] sm:$0xff] %v1359_v57  ;;  %v1363_v63 = vmul.f32 0.6931472, %v3057_v59  ;;  %3084 = vlog2.f32 %v508_v55  ;;  %v530_v57 = vld [vmem:[%s3581_s30 + $0xc40] sm:$0xff] }
 0x1a9   : > { %v3061_v1 = vpop.eup %3060  ;;  %2029 = vst [vmem:[%s3608_s17 + $0xb18] sm:$0xff] %v1361_v60  ;;  %v1365_v2 = vmul.f32 0.6931472, %v3059_v62  ;;  %3086 = vlog2.f32 %v509_v58  ;;  %v531_v60 = vld [vmem:[%s3581_s30 + $0xc48] sm:$0xff] }
 0x1aa   : > { %v3063_v4 = vpop.eup %3062  ;;  %2030 = vst [vmem:[%s3608_s17 + $0xb20] sm:$0xff] %v1363_v63  ;;  %v1367_v5 = vmul.f32 0.6931472, %v3061_v1  ;;  %3088 = vlog2.f32 %v510_v61  ;;  %v532_v63 = vld [vmem:[%s3581_s30 + $0xc50] sm:$0xff] }
 0x1ab   : > { %v3065_v7 = vpop.eup %3064  ;;  %2031 = vst [vmem:[%s3608_s17 + $0xb28] sm:$0xff] %v1365_v2  ;;  %v1369_v8 = vmul.f32 0.6931472, %v3063_v4  ;;  %3090 = vlog2.f32 %v511_v0  ;;  %v533_v2 = vld [vmem:[%s3581_s30 + $0xc58] sm:$0xff] }
 0x1ac   : > { %v3067_v10 = vpop.eup %3066  ;;  %2032 = vst [vmem:[%s3608_s17 + $0xb30] sm:$0xff] %v1367_v5  ;;  %v1371_v11 = vmul.f32 0.6931472, %v3065_v7  ;;  %3092 = vlog2.f32 %v512_v3  ;;  %v534_v5 = vld [vmem:[%s3581_s30 + $0xc60] sm:$0xff] }
 0x1ad   : > { %v3069_v13 = vpop.eup %3068  ;;  %2033 = vst [vmem:[%s3608_s17 + $0xb38] sm:$0xff] %v1369_v8  ;;  %v1373_v14 = vmul.f32 0.6931472, %v3067_v10  ;;  %3094 = vlog2.f32 %v513_v6  ;;  %v535_v8 = vld [vmem:[%s3581_s30 + $0xc68] sm:$0xff] }
 0x1ae   : > { %v3071_v16 = vpop.eup %3070  ;;  %2034 = vst [vmem:[%s3608_s17 + $0xb40] sm:$0xff] %v1371_v11  ;;  %v1375_v17 = vmul.f32 0.6931472, %v3069_v13  ;;  %3096 = vlog2.f32 %v514_v9  ;;  %v536_v11 = vld [vmem:[%s3581_s30 + $0xc70] sm:$0xff] }
 0x1af   : > { %v3073_v19 = vpop.eup %3072  ;;  %2035 = vst [vmem:[%s3608_s17 + $0xb48] sm:$0xff] %v1373_v14  ;;  %v1377_v20 = vmul.f32 0.6931472, %v3071_v16  ;;  %3098 = vlog2.f32 %v515_v12  ;;  %v537_v14 = vld [vmem:[%s3581_s30 + $0xc78] sm:$0xff] }
 0x1b0   : > { %v3075_v22 = vpop.eup %3074  ;;  %2036 = vst [vmem:[%s3608_s17 + $0xb50] sm:$0xff] %v1375_v17  ;;  %v1379_v23 = vmul.f32 0.6931472, %v3073_v19  ;;  %3100 = vlog2.f32 %v516_v15  ;;  %v538_v17 = vld [vmem:[%s3581_s30 + $0xc80] sm:$0xff] }
 0x1b1   : > { %v3077_v25 = vpop.eup %3076  ;;  %2037 = vst [vmem:[%s3608_s17 + $0xb58] sm:$0xff] %v1377_v20  ;;  %v1381_v26 = vmul.f32 0.6931472, %v3075_v22  ;;  %3102 = vlog2.f32 %v517_v18  ;;  %v539_v20 = vld [vmem:[%s3581_s30 + $0xc88] sm:$0xff] }
 0x1b2   : > { %v3079_v28 = vpop.eup %3078  ;;  %2038 = vst [vmem:[%s3608_s17 + $0xb60] sm:$0xff] %v1379_v23  ;;  %v1383_v29 = vmul.f32 0.6931472, %v3077_v25  ;;  %3104 = vlog2.f32 %v518_v21  ;;  %v540_v23 = vld [vmem:[%s3581_s30 + $0xc90] sm:$0xff] }
 0x1b3   : > { %v3081_v31 = vpop.eup %3080  ;;  %2039 = vst [vmem:[%s3608_s17 + $0xb68] sm:$0xff] %v1381_v26  ;;  %v1385_v32 = vmul.f32 0.6931472, %v3079_v28  ;;  %3106 = vlog2.f32 %v519_v24  ;;  %v541_v26 = vld [vmem:[%s3581_s30 + $0xc98] sm:$0xff] }
 0x1b4   : > { %v3083_v34 = vpop.eup %3082  ;;  %2040 = vst [vmem:[%s3608_s17 + $0xb70] sm:$0xff] %v1383_v29  ;;  %v1387_v35 = vmul.f32 0.6931472, %v3081_v31  ;;  %3108 = vlog2.f32 %v520_v27  ;;  %v542_v29 = vld [vmem:[%s3581_s30 + $0xca0] sm:$0xff] }
 0x1b5   : > { %v3085_v37 = vpop.eup %3084  ;;  %2041 = vst [vmem:[%s3608_s17 + $0xb78] sm:$0xff] %v1385_v32  ;;  %v1389_v38 = vmul.f32 0.6931472, %v3083_v34  ;;  %3110 = vlog2.f32 %v521_v30  ;;  %v543_v32 = vld [vmem:[%s3581_s30 + $0xca8] sm:$0xff] }
 0x1b6   : > { %v3087_v40 = vpop.eup %3086  ;;  %2042 = vst [vmem:[%s3608_s17 + $0xb80] sm:$0xff] %v1387_v35  ;;  %v1391_v41 = vmul.f32 0.6931472, %v3085_v37  ;;  %3112 = vlog2.f32 %v522_v33  ;;  %v544_v35 = vld [vmem:[%s3581_s30 + $0xcb0] sm:$0xff] }
 0x1b7   : > { %v3089_v43 = vpop.eup %3088  ;;  %2043 = vst [vmem:[%s3608_s17 + $0xb88] sm:$0xff] %v1389_v38  ;;  %v1393_v44 = vmul.f32 0.6931472, %v3087_v40  ;;  %3114 = vlog2.f32 %v523_v36  ;;  %v545_v38 = vld [vmem:[%s3581_s30 + $0xcb8] sm:$0xff] }
 0x1b8   : > { %v3091_v46 = vpop.eup %3090  ;;  %2044 = vst [vmem:[%s3608_s17 + $0xb90] sm:$0xff] %v1391_v41  ;;  %v1395_v47 = vmul.f32 0.6931472, %v3089_v43  ;;  %3116 = vlog2.f32 %v524_v39  ;;  %v546_v41 = vld [vmem:[%s3581_s30 + $0xcc0] sm:$0xff] }
 0x1b9   : > { %v3093_v49 = vpop.eup %3092  ;;  %2045 = vst [vmem:[%s3608_s17 + $0xb98] sm:$0xff] %v1393_v44  ;;  %v1397_v50 = vmul.f32 0.6931472, %v3091_v46  ;;  %3118 = vlog2.f32 %v525_v42  ;;  %v547_v44 = vld [vmem:[%s3581_s30 + $0xcc8] sm:$0xff] }
 0x1ba   : > { %v3095_v52 = vpop.eup %3094  ;;  %2046 = vst [vmem:[%s3608_s17 + $0xba0] sm:$0xff] %v1395_v47  ;;  %v1399_v53 = vmul.f32 0.6931472, %v3093_v49  ;;  %3120 = vlog2.f32 %v526_v45  ;;  %v548_v47 = vld [vmem:[%s3581_s30 + $0xcd0] sm:$0xff] }
 0x1bb   : > { %v3097_v55 = vpop.eup %3096  ;;  %2047 = vst [vmem:[%s3608_s17 + $0xba8] sm:$0xff] %v1397_v50  ;;  %v1401_v56 = vmul.f32 0.6931472, %v3095_v52  ;;  %3122 = vlog2.f32 %v527_v48  ;;  %v549_v50 = vld [vmem:[%s3581_s30 + $0xcd8] sm:$0xff] }
 0x1bc   : > { %v3099_v58 = vpop.eup %3098  ;;  %2048 = vst [vmem:[%s3608_s17 + $0xbb0] sm:$0xff] %v1399_v53  ;;  %v1403_v59 = vmul.f32 0.6931472, %v3097_v55  ;;  %3124 = vlog2.f32 %v528_v51  ;;  %v550_v53 = vld [vmem:[%s3581_s30 + $0xce0] sm:$0xff] }
 0x1bd   : > { %v3101_v61 = vpop.eup %3100  ;;  %2049 = vst [vmem:[%s3608_s17 + $0xbb8] sm:$0xff] %v1401_v56  ;;  %v1405_v62 = vmul.f32 0.6931472, %v3099_v58  ;;  %3126 = vlog2.f32 %v529_v54  ;;  %v551_v56 = vld [vmem:[%s3581_s30 + $0xce8] sm:$0xff] }
 0x1be   : > { %v3103_v0 = vpop.eup %3102  ;;  %2050 = vst [vmem:[%s3608_s17 + $0xbc0] sm:$0xff] %v1403_v59  ;;  %v1407_v1 = vmul.f32 0.6931472, %v3101_v61  ;;  %3128 = vlog2.f32 %v530_v57  ;;  %v552_v59 = vld [vmem:[%s3581_s30 + $0xcf0] sm:$0xff] }
 0x1bf   : > { %v3105_v3 = vpop.eup %3104  ;;  %2051 = vst [vmem:[%s3608_s17 + $0xbc8] sm:$0xff] %v1405_v62  ;;  %v1409_v4 = vmul.f32 0.6931472, %v3103_v0  ;;  %3130 = vlog2.f32 %v531_v60  ;;  %v553_v62 = vld [vmem:[%s3581_s30 + $0xcf8] sm:$0xff] }
 0x1c0   : > { %v3107_v6 = vpop.eup %3106  ;;  %2052 = vst [vmem:[%s3608_s17 + $0xbd0] sm:$0xff] %v1407_v1  ;;  %v1411_v7 = vmul.f32 0.6931472, %v3105_v3  ;;  %3132 = vlog2.f32 %v532_v63  ;;  %v554_v1 = vld [vmem:[%s3581_s30 + $0xd00] sm:$0xff] }
 0x1c1   : > { %v3109_v9 = vpop.eup %3108  ;;  %2053 = vst [vmem:[%s3608_s17 + $0xbd8] sm:$0xff] %v1409_v4  ;;  %v1413_v10 = vmul.f32 0.6931472, %v3107_v6  ;;  %3134 = vlog2.f32 %v533_v2  ;;  %v555_v4 = vld [vmem:[%s3581_s30 + $0xd08] sm:$0xff] }
 0x1c2   : > { %v3111_v12 = vpop.eup %3110  ;;  %2054 = vst [vmem:[%s3608_s17 + $0xbe0] sm:$0xff] %v1411_v7  ;;  %v1415_v13 = vmul.f32 0.6931472, %v3109_v9  ;;  %3136 = vlog2.f32 %v534_v5  ;;  %v556_v7 = vld [vmem:[%s3581_s30 + $0xd10] sm:$0xff] }
 0x1c3   : > { %v3113_v15 = vpop.eup %3112  ;;  %2055 = vst [vmem:[%s3608_s17 + $0xbe8] sm:$0xff] %v1413_v10  ;;  %v1417_v16 = vmul.f32 0.6931472, %v3111_v12  ;;  %3138 = vlog2.f32 %v535_v8  ;;  %v557_v10 = vld [vmem:[%s3581_s30 + $0xd18] sm:$0xff] }
 0x1c4   : > { %v3115_v18 = vpop.eup %3114  ;;  %2056 = vst [vmem:[%s3608_s17 + $0xbf0] sm:$0xff] %v1415_v13  ;;  %v1419_v19 = vmul.f32 0.6931472, %v3113_v15  ;;  %3140 = vlog2.f32 %v536_v11  ;;  %v558_v13 = vld [vmem:[%s3581_s30 + $0xd20] sm:$0xff] }
 0x1c5   : > { %v3117_v21 = vpop.eup %3116  ;;  %2057 = vst [vmem:[%s3608_s17 + $0xbf8] sm:$0xff] %v1417_v16  ;;  %v1421_v22 = vmul.f32 0.6931472, %v3115_v18  ;;  %3142 = vlog2.f32 %v537_v14  ;;  %v559_v16 = vld [vmem:[%s3581_s30 + $0xd28] sm:$0xff] }
 0x1c6   : > { %v3119_v24 = vpop.eup %3118  ;;  %2058 = vst [vmem:[%s3608_s17 + $0xc00] sm:$0xff] %v1419_v19  ;;  %v1423_v25 = vmul.f32 0.6931472, %v3117_v21  ;;  %3144 = vlog2.f32 %v538_v17  ;;  %v560_v19 = vld [vmem:[%s3581_s30 + $0xd30] sm:$0xff] }
 0x1c7   : > { %v3121_v27 = vpop.eup %3120  ;;  %2059 = vst [vmem:[%s3608_s17 + $0xc08] sm:$0xff] %v1421_v22  ;;  %v1425_v28 = vmul.f32 0.6931472, %v3119_v24  ;;  %3146 = vlog2.f32 %v539_v20  ;;  %v561_v22 = vld [vmem:[%s3581_s30 + $0xd38] sm:$0xff] }
 0x1c8   : > { %v3123_v30 = vpop.eup %3122  ;;  %2060 = vst [vmem:[%s3608_s17 + $0xc10] sm:$0xff] %v1423_v25  ;;  %v1427_v31 = vmul.f32 0.6931472, %v3121_v27  ;;  %3148 = vlog2.f32 %v540_v23  ;;  %v562_v25 = vld [vmem:[%s3581_s30 + $0xd40] sm:$0xff] }
 0x1c9   : > { %v3125_v33 = vpop.eup %3124  ;;  %2061 = vst [vmem:[%s3608_s17 + $0xc18] sm:$0xff] %v1425_v28  ;;  %v1429_v34 = vmul.f32 0.6931472, %v3123_v30  ;;  %3150 = vlog2.f32 %v541_v26  ;;  %v563_v28 = vld [vmem:[%s3581_s30 + $0xd48] sm:$0xff] }
 0x1ca   : > { %v3127_v36 = vpop.eup %3126  ;;  %2062 = vst [vmem:[%s3608_s17 + $0xc20] sm:$0xff] %v1427_v31  ;;  %v1431_v37 = vmul.f32 0.6931472, %v3125_v33  ;;  %3152 = vlog2.f32 %v542_v29  ;;  %v564_v31 = vld [vmem:[%s3581_s30 + $0xd50] sm:$0xff] }
 0x1cb   : > { %v3129_v39 = vpop.eup %3128  ;;  %2063 = vst [vmem:[%s3608_s17 + $0xc28] sm:$0xff] %v1429_v34  ;;  %v1433_v40 = vmul.f32 0.6931472, %v3127_v36  ;;  %3154 = vlog2.f32 %v543_v32  ;;  %v565_v34 = vld [vmem:[%s3581_s30 + $0xd58] sm:$0xff] }
 0x1cc   : > { %v3131_v42 = vpop.eup %3130  ;;  %2064 = vst [vmem:[%s3608_s17 + $0xc30] sm:$0xff] %v1431_v37  ;;  %v1435_v43 = vmul.f32 0.6931472, %v3129_v39  ;;  %3156 = vlog2.f32 %v544_v35  ;;  %v566_v37 = vld [vmem:[%s3581_s30 + $0xd60] sm:$0xff] }
 0x1cd   : > { %v3133_v45 = vpop.eup %3132  ;;  %2065 = vst [vmem:[%s3608_s17 + $0xc38] sm:$0xff] %v1433_v40  ;;  %v1437_v46 = vmul.f32 0.6931472, %v3131_v42  ;;  %3158 = vlog2.f32 %v545_v38  ;;  %v567_v40 = vld [vmem:[%s3581_s30 + $0xd68] sm:$0xff] }
 0x1ce   : > { %v3135_v48 = vpop.eup %3134  ;;  %2066 = vst [vmem:[%s3608_s17 + $0xc40] sm:$0xff] %v1435_v43  ;;  %v1439_v49 = vmul.f32 0.6931472, %v3133_v45  ;;  %3160 = vlog2.f32 %v546_v41  ;;  %v568_v43 = vld [vmem:[%s3581_s30 + $0xd70] sm:$0xff] }
 0x1cf   : > { %v3137_v51 = vpop.eup %3136  ;;  %2067 = vst [vmem:[%s3608_s17 + $0xc48] sm:$0xff] %v1437_v46  ;;  %v1441_v52 = vmul.f32 0.6931472, %v3135_v48  ;;  %3162 = vlog2.f32 %v547_v44  ;;  %v569_v46 = vld [vmem:[%s3581_s30 + $0xd78] sm:$0xff] }
 0x1d0   : > { %v3139_v54 = vpop.eup %3138  ;;  %2068 = vst [vmem:[%s3608_s17 + $0xc50] sm:$0xff] %v1439_v49  ;;  %v1443_v55 = vmul.f32 0.6931472, %v3137_v51  ;;  %3164 = vlog2.f32 %v548_v47  ;;  %v570_v49 = vld [vmem:[%s3581_s30 + $0xd80] sm:$0xff] }
 0x1d1   : > { %v3141_v57 = vpop.eup %3140  ;;  %2069 = vst [vmem:[%s3608_s17 + $0xc58] sm:$0xff] %v1441_v52  ;;  %v1445_v58 = vmul.f32 0.6931472, %v3139_v54  ;;  %3166 = vlog2.f32 %v549_v50  ;;  %v571_v52 = vld [vmem:[%s3581_s30 + $0xd88] sm:$0xff] }
 0x1d2   : > { %v3143_v60 = vpop.eup %3142  ;;  %2070 = vst [vmem:[%s3608_s17 + $0xc60] sm:$0xff] %v1443_v55  ;;  %v1447_v61 = vmul.f32 0.6931472, %v3141_v57  ;;  %3168 = vlog2.f32 %v550_v53  ;;  %v572_v55 = vld [vmem:[%s3581_s30 + $0xd90] sm:$0xff] }
 0x1d3   : > { %v3145_v63 = vpop.eup %3144  ;;  %2071 = vst [vmem:[%s3608_s17 + $0xc68] sm:$0xff] %v1445_v58  ;;  %v1449_v0 = vmul.f32 0.6931472, %v3143_v60  ;;  %3170 = vlog2.f32 %v551_v56  ;;  %v573_v58 = vld [vmem:[%s3581_s30 + $0xd98] sm:$0xff] }
 0x1d4   : > { %v3147_v2 = vpop.eup %3146  ;;  %2072 = vst [vmem:[%s3608_s17 + $0xc70] sm:$0xff] %v1447_v61  ;;  %v1451_v3 = vmul.f32 0.6931472, %v3145_v63  ;;  %3172 = vlog2.f32 %v552_v59  ;;  %v574_v61 = vld [vmem:[%s3581_s30 + $0xda0] sm:$0xff] }
 0x1d5   : > { %v3149_v5 = vpop.eup %3148  ;;  %2073 = vst [vmem:[%s3608_s17 + $0xc78] sm:$0xff] %v1449_v0  ;;  %v1453_v6 = vmul.f32 0.6931472, %v3147_v2  ;;  %3174 = vlog2.f32 %v553_v62  ;;  %v575_v0 = vld [vmem:[%s3581_s30 + $0xda8] sm:$0xff] }
 0x1d6   : > { %v3151_v8 = vpop.eup %3150  ;;  %2074 = vst [vmem:[%s3608_s17 + $0xc80] sm:$0xff] %v1451_v3  ;;  %v1455_v9 = vmul.f32 0.6931472, %v3149_v5  ;;  %3176 = vlog2.f32 %v554_v1  ;;  %v576_v3 = vld [vmem:[%s3581_s30 + $0xdb0] sm:$0xff] }
 0x1d7   : > { %v3153_v11 = vpop.eup %3152  ;;  %2075 = vst [vmem:[%s3608_s17 + $0xc88] sm:$0xff] %v1453_v6  ;;  %v1457_v12 = vmul.f32 0.6931472, %v3151_v8  ;;  %3178 = vlog2.f32 %v555_v4  ;;  %v577_v6 = vld [vmem:[%s3581_s30 + $0xdb8] sm:$0xff] }
 0x1d8   : > { %v3155_v14 = vpop.eup %3154  ;;  %2076 = vst [vmem:[%s3608_s17 + $0xc90] sm:$0xff] %v1455_v9  ;;  %v1459_v15 = vmul.f32 0.6931472, %v3153_v11  ;;  %3180 = vlog2.f32 %v556_v7  ;;  %v578_v9 = vld [vmem:[%s3581_s30 + $0xdc0] sm:$0xff] }
 0x1d9   : > { %v3157_v17 = vpop.eup %3156  ;;  %2077 = vst [vmem:[%s3608_s17 + $0xc98] sm:$0xff] %v1457_v12  ;;  %v1461_v18 = vmul.f32 0.6931472, %v3155_v14  ;;  %3182 = vlog2.f32 %v557_v10  ;;  %v579_v12 = vld [vmem:[%s3581_s30 + $0xdc8] sm:$0xff] }
 0x1da   : > { %v3159_v20 = vpop.eup %3158  ;;  %2078 = vst [vmem:[%s3608_s17 + $0xca0] sm:$0xff] %v1459_v15  ;;  %v1463_v21 = vmul.f32 0.6931472, %v3157_v17  ;;  %3184 = vlog2.f32 %v558_v13  ;;  %v580_v15 = vld [vmem:[%s3581_s30 + $0xdd0] sm:$0xff] }
 0x1db   : > { %v3161_v23 = vpop.eup %3160  ;;  %2079 = vst [vmem:[%s3608_s17 + $0xca8] sm:$0xff] %v1461_v18  ;;  %v1465_v24 = vmul.f32 0.6931472, %v3159_v20  ;;  %3186 = vlog2.f32 %v559_v16  ;;  %v581_v18 = vld [vmem:[%s3581_s30 + $0xdd8] sm:$0xff] }
 0x1dc   : > { %v3163_v26 = vpop.eup %3162  ;;  %2080 = vst [vmem:[%s3608_s17 + $0xcb0] sm:$0xff] %v1463_v21  ;;  %v1467_v27 = vmul.f32 0.6931472, %v3161_v23  ;;  %3188 = vlog2.f32 %v560_v19  ;;  %v582_v21 = vld [vmem:[%s3581_s30 + $0xde0] sm:$0xff] }
 0x1dd   : > { %v3165_v29 = vpop.eup %3164  ;;  %2081 = vst [vmem:[%s3608_s17 + $0xcb8] sm:$0xff] %v1465_v24  ;;  %v1469_v30 = vmul.f32 0.6931472, %v3163_v26  ;;  %3190 = vlog2.f32 %v561_v22  ;;  %v583_v24 = vld [vmem:[%s3581_s30 + $0xde8] sm:$0xff] }
 0x1de   : > { %v3167_v32 = vpop.eup %3166  ;;  %2082 = vst [vmem:[%s3608_s17 + $0xcc0] sm:$0xff] %v1467_v27  ;;  %v1471_v33 = vmul.f32 0.6931472, %v3165_v29  ;;  %3192 = vlog2.f32 %v562_v25  ;;  %v584_v27 = vld [vmem:[%s3581_s30 + $0xdf0] sm:$0xff] }
 0x1df   : > { %v3169_v35 = vpop.eup %3168  ;;  %2083 = vst [vmem:[%s3608_s17 + $0xcc8] sm:$0xff] %v1469_v30  ;;  %v1473_v36 = vmul.f32 0.6931472, %v3167_v32  ;;  %3194 = vlog2.f32 %v563_v28  ;;  %v585_v30 = vld [vmem:[%s3581_s30 + $0xdf8] sm:$0xff] }
 0x1e0   : > { %v3171_v38 = vpop.eup %3170  ;;  %2084 = vst [vmem:[%s3608_s17 + $0xcd0] sm:$0xff] %v1471_v33  ;;  %v1475_v39 = vmul.f32 0.6931472, %v3169_v35  ;;  %3196 = vlog2.f32 %v564_v31  ;;  %v586_v33 = vld [vmem:[%s3581_s30 + $0xe00] sm:$0xff] }
 0x1e1   : > { %v3173_v41 = vpop.eup %3172  ;;  %2085 = vst [vmem:[%s3608_s17 + $0xcd8] sm:$0xff] %v1473_v36  ;;  %v1477_v42 = vmul.f32 0.6931472, %v3171_v38  ;;  %3198 = vlog2.f32 %v565_v34  ;;  %v587_v36 = vld [vmem:[%s3581_s30 + $0xe08] sm:$0xff] }
 0x1e2   : > { %v3175_v44 = vpop.eup %3174  ;;  %2086 = vst [vmem:[%s3608_s17 + $0xce0] sm:$0xff] %v1475_v39  ;;  %v1479_v45 = vmul.f32 0.6931472, %v3173_v41  ;;  %3200 = vlog2.f32 %v566_v37  ;;  %v588_v39 = vld [vmem:[%s3581_s30 + $0xe10] sm:$0xff] }
 0x1e3   : > { %v3177_v47 = vpop.eup %3176  ;;  %2087 = vst [vmem:[%s3608_s17 + $0xce8] sm:$0xff] %v1477_v42  ;;  %v1481_v48 = vmul.f32 0.6931472, %v3175_v44  ;;  %3202 = vlog2.f32 %v567_v40  ;;  %v589_v42 = vld [vmem:[%s3581_s30 + $0xe18] sm:$0xff] }
 0x1e4   : > { %v3179_v50 = vpop.eup %3178  ;;  %2088 = vst [vmem:[%s3608_s17 + $0xcf0] sm:$0xff] %v1479_v45  ;;  %v1483_v51 = vmul.f32 0.6931472, %v3177_v47  ;;  %3204 = vlog2.f32 %v568_v43  ;;  %v590_v45 = vld [vmem:[%s3581_s30 + $0xe20] sm:$0xff] }
 0x1e5   : > { %v3181_v53 = vpop.eup %3180  ;;  %2089 = vst [vmem:[%s3608_s17 + $0xcf8] sm:$0xff] %v1481_v48  ;;  %v1485_v54 = vmul.f32 0.6931472, %v3179_v50  ;;  %3206 = vlog2.f32 %v569_v46  ;;  %v591_v48 = vld [vmem:[%s3581_s30 + $0xe28] sm:$0xff] }
 0x1e6   : > { %v3183_v56 = vpop.eup %3182  ;;  %2090 = vst [vmem:[%s3608_s17 + $0xd00] sm:$0xff] %v1483_v51  ;;  %v1487_v57 = vmul.f32 0.6931472, %v3181_v53  ;;  %3208 = vlog2.f32 %v570_v49  ;;  %v592_v51 = vld [vmem:[%s3581_s30 + $0xe30] sm:$0xff] }
 0x1e7   : > { %v3185_v59 = vpop.eup %3184  ;;  %2091 = vst [vmem:[%s3608_s17 + $0xd08] sm:$0xff] %v1485_v54  ;;  %v1489_v60 = vmul.f32 0.6931472, %v3183_v56  ;;  %3210 = vlog2.f32 %v571_v52  ;;  %v593_v54 = vld [vmem:[%s3581_s30 + $0xe38] sm:$0xff] }
 0x1e8   : > { %v3187_v62 = vpop.eup %3186  ;;  %2092 = vst [vmem:[%s3608_s17 + $0xd10] sm:$0xff] %v1487_v57  ;;  %v1491_v63 = vmul.f32 0.6931472, %v3185_v59  ;;  %3212 = vlog2.f32 %v572_v55  ;;  %v594_v57 = vld [vmem:[%s3581_s30 + $0xe40] sm:$0xff] }
 0x1e9   : > { %v3189_v1 = vpop.eup %3188  ;;  %2093 = vst [vmem:[%s3608_s17 + $0xd18] sm:$0xff] %v1489_v60  ;;  %v1493_v2 = vmul.f32 0.6931472, %v3187_v62  ;;  %3214 = vlog2.f32 %v573_v58  ;;  %v595_v60 = vld [vmem:[%s3581_s30 + $0xe48] sm:$0xff] }
 0x1ea   : > { %v3191_v4 = vpop.eup %3190  ;;  %2094 = vst [vmem:[%s3608_s17 + $0xd20] sm:$0xff] %v1491_v63  ;;  %v1495_v5 = vmul.f32 0.6931472, %v3189_v1  ;;  %3216 = vlog2.f32 %v574_v61  ;;  %v596_v63 = vld [vmem:[%s3581_s30 + $0xe50] sm:$0xff] }
 0x1eb   : > { %v3193_v7 = vpop.eup %3192  ;;  %2095 = vst [vmem:[%s3608_s17 + $0xd28] sm:$0xff] %v1493_v2  ;;  %v1497_v8 = vmul.f32 0.6931472, %v3191_v4  ;;  %3218 = vlog2.f32 %v575_v0  ;;  %v597_v2 = vld [vmem:[%s3581_s30 + $0xe58] sm:$0xff] }
 0x1ec   : > { %v3195_v10 = vpop.eup %3194  ;;  %2096 = vst [vmem:[%s3608_s17 + $0xd30] sm:$0xff] %v1495_v5  ;;  %v1499_v11 = vmul.f32 0.6931472, %v3193_v7  ;;  %3220 = vlog2.f32 %v576_v3  ;;  %v598_v5 = vld [vmem:[%s3581_s30 + $0xe60] sm:$0xff] }
 0x1ed   : > { %v3197_v13 = vpop.eup %3196  ;;  %2097 = vst [vmem:[%s3608_s17 + $0xd38] sm:$0xff] %v1497_v8  ;;  %v1501_v14 = vmul.f32 0.6931472, %v3195_v10  ;;  %3222 = vlog2.f32 %v577_v6  ;;  %v599_v8 = vld [vmem:[%s3581_s30 + $0xe68] sm:$0xff] }
 0x1ee   : > { %v3199_v16 = vpop.eup %3198  ;;  %2098 = vst [vmem:[%s3608_s17 + $0xd40] sm:$0xff] %v1499_v11  ;;  %v1503_v17 = vmul.f32 0.6931472, %v3197_v13  ;;  %3224 = vlog2.f32 %v578_v9  ;;  %v600_v11 = vld [vmem:[%s3581_s30 + $0xe70] sm:$0xff] }
 0x1ef   : > { %v3201_v19 = vpop.eup %3200  ;;  %2099 = vst [vmem:[%s3608_s17 + $0xd48] sm:$0xff] %v1501_v14  ;;  %v1505_v20 = vmul.f32 0.6931472, %v3199_v16  ;;  %3226 = vlog2.f32 %v579_v12  ;;  %v601_v14 = vld [vmem:[%s3581_s30 + $0xe78] sm:$0xff] }
 0x1f0   : > { %v3203_v22 = vpop.eup %3202  ;;  %2100 = vst [vmem:[%s3608_s17 + $0xd50] sm:$0xff] %v1503_v17  ;;  %v1507_v23 = vmul.f32 0.6931472, %v3201_v19  ;;  %3228 = vlog2.f32 %v580_v15  ;;  %v602_v17 = vld [vmem:[%s3581_s30 + $0xe80] sm:$0xff] }
 0x1f1   : > { %v3205_v25 = vpop.eup %3204  ;;  %2101 = vst [vmem:[%s3608_s17 + $0xd58] sm:$0xff] %v1505_v20  ;;  %v1509_v26 = vmul.f32 0.6931472, %v3203_v22  ;;  %3230 = vlog2.f32 %v581_v18  ;;  %v603_v20 = vld [vmem:[%s3581_s30 + $0xe88] sm:$0xff] }
 0x1f2   : > { %v3207_v28 = vpop.eup %3206  ;;  %2102 = vst [vmem:[%s3608_s17 + $0xd60] sm:$0xff] %v1507_v23  ;;  %v1511_v29 = vmul.f32 0.6931472, %v3205_v25  ;;  %3232 = vlog2.f32 %v582_v21  ;;  %v604_v23 = vld [vmem:[%s3581_s30 + $0xe90] sm:$0xff] }
 0x1f3   : > { %v3209_v31 = vpop.eup %3208  ;;  %2103 = vst [vmem:[%s3608_s17 + $0xd68] sm:$0xff] %v1509_v26  ;;  %v1513_v32 = vmul.f32 0.6931472, %v3207_v28  ;;  %3234 = vlog2.f32 %v583_v24  ;;  %v605_v26 = vld [vmem:[%s3581_s30 + $0xe98] sm:$0xff] }
 0x1f4   : > { %v3211_v34 = vpop.eup %3210  ;;  %2104 = vst [vmem:[%s3608_s17 + $0xd70] sm:$0xff] %v1511_v29  ;;  %v1515_v35 = vmul.f32 0.6931472, %v3209_v31  ;;  %3236 = vlog2.f32 %v584_v27  ;;  %v606_v29 = vld [vmem:[%s3581_s30 + $0xea0] sm:$0xff] }
 0x1f5   : > { %v3213_v37 = vpop.eup %3212  ;;  %2105 = vst [vmem:[%s3608_s17 + $0xd78] sm:$0xff] %v1513_v32  ;;  %v1517_v38 = vmul.f32 0.6931472, %v3211_v34  ;;  %3238 = vlog2.f32 %v585_v30  ;;  %v607_v32 = vld [vmem:[%s3581_s30 + $0xea8] sm:$0xff] }
 0x1f6   : > { %v3215_v40 = vpop.eup %3214  ;;  %2106 = vst [vmem:[%s3608_s17 + $0xd80] sm:$0xff] %v1515_v35  ;;  %v1519_v41 = vmul.f32 0.6931472, %v3213_v37  ;;  %3240 = vlog2.f32 %v586_v33  ;;  %v608_v35 = vld [vmem:[%s3581_s30 + $0xeb0] sm:$0xff] }
 0x1f7   : > { %v3217_v43 = vpop.eup %3216  ;;  %2107 = vst [vmem:[%s3608_s17 + $0xd88] sm:$0xff] %v1517_v38  ;;  %v1521_v44 = vmul.f32 0.6931472, %v3215_v40  ;;  %3242 = vlog2.f32 %v587_v36  ;;  %v609_v38 = vld [vmem:[%s3581_s30 + $0xeb8] sm:$0xff] }
 0x1f8   : > { %v3219_v46 = vpop.eup %3218  ;;  %2108 = vst [vmem:[%s3608_s17 + $0xd90] sm:$0xff] %v1519_v41  ;;  %v1523_v47 = vmul.f32 0.6931472, %v3217_v43  ;;  %3244 = vlog2.f32 %v588_v39  ;;  %v610_v41 = vld [vmem:[%s3581_s30 + $0xec0] sm:$0xff] }
 0x1f9   : > { %v3221_v49 = vpop.eup %3220  ;;  %2109 = vst [vmem:[%s3608_s17 + $0xd98] sm:$0xff] %v1521_v44  ;;  %v1525_v50 = vmul.f32 0.6931472, %v3219_v46  ;;  %3246 = vlog2.f32 %v589_v42  ;;  %v611_v44 = vld [vmem:[%s3581_s30 + $0xec8] sm:$0xff] }
 0x1fa   : > { %v3223_v52 = vpop.eup %3222  ;;  %2110 = vst [vmem:[%s3608_s17 + $0xda0] sm:$0xff] %v1523_v47  ;;  %v1527_v53 = vmul.f32 0.6931472, %v3221_v49  ;;  %3248 = vlog2.f32 %v590_v45  ;;  %v612_v47 = vld [vmem:[%s3581_s30 + $0xed0] sm:$0xff] }
 0x1fb   : > { %v3225_v55 = vpop.eup %3224  ;;  %2111 = vst [vmem:[%s3608_s17 + $0xda8] sm:$0xff] %v1525_v50  ;;  %v1529_v56 = vmul.f32 0.6931472, %v3223_v52  ;;  %3250 = vlog2.f32 %v591_v48  ;;  %v613_v50 = vld [vmem:[%s3581_s30 + $0xed8] sm:$0xff] }
 0x1fc   : > { %v3227_v58 = vpop.eup %3226  ;;  %2112 = vst [vmem:[%s3608_s17 + $0xdb0] sm:$0xff] %v1527_v53  ;;  %v1531_v59 = vmul.f32 0.6931472, %v3225_v55  ;;  %3252 = vlog2.f32 %v592_v51  ;;  %v614_v53 = vld [vmem:[%s3581_s30 + $0xee0] sm:$0xff] }
 0x1fd   : > { %v3229_v61 = vpop.eup %3228  ;;  %2113 = vst [vmem:[%s3608_s17 + $0xdb8] sm:$0xff] %v1529_v56  ;;  %v1533_v62 = vmul.f32 0.6931472, %v3227_v58  ;;  %3254 = vlog2.f32 %v593_v54  ;;  %v615_v56 = vld [vmem:[%s3581_s30 + $0xee8] sm:$0xff] }
 0x1fe   : > { %v3231_v0 = vpop.eup %3230  ;;  %2114 = vst [vmem:[%s3608_s17 + $0xdc0] sm:$0xff] %v1531_v59  ;;  %v1535_v1 = vmul.f32 0.6931472, %v3229_v61  ;;  %3256 = vlog2.f32 %v594_v57  ;;  %v616_v59 = vld [vmem:[%s3581_s30 + $0xef0] sm:$0xff] }
 0x1ff   : > { %v3233_v3 = vpop.eup %3232  ;;  %2115 = vst [vmem:[%s3608_s17 + $0xdc8] sm:$0xff] %v1533_v62  ;;  %v1537_v4 = vmul.f32 0.6931472, %v3231_v0  ;;  %3258 = vlog2.f32 %v595_v60  ;;  %v617_v62 = vld [vmem:[%s3581_s30 + $0xef8] sm:$0xff] }
 0x200   : > { %v3235_v6 = vpop.eup %3234  ;;  %2116 = vst [vmem:[%s3608_s17 + $0xdd0] sm:$0xff] %v1535_v1  ;;  %v1539_v7 = vmul.f32 0.6931472, %v3233_v3  ;;  %3260 = vlog2.f32 %v596_v63  ;;  %v618_v1 = vld [vmem:[%s3581_s30 + $0xf00] sm:$0xff] }
 0x201   : > { %v3237_v9 = vpop.eup %3236  ;;  %2117 = vst [vmem:[%s3608_s17 + $0xdd8] sm:$0xff] %v1537_v4  ;;  %v1541_v10 = vmul.f32 0.6931472, %v3235_v6  ;;  %3262 = vlog2.f32 %v597_v2  ;;  %v619_v4 = vld [vmem:[%s3581_s30 + $0xf08] sm:$0xff] }
 0x202   : > { %v3239_v12 = vpop.eup %3238  ;;  %2118 = vst [vmem:[%s3608_s17 + $0xde0] sm:$0xff] %v1539_v7  ;;  %v1543_v13 = vmul.f32 0.6931472, %v3237_v9  ;;  %3264 = vlog2.f32 %v598_v5  ;;  %v620_v7 = vld [vmem:[%s3581_s30 + $0xf10] sm:$0xff] }
 0x203   : > { %v3241_v15 = vpop.eup %3240  ;;  %2119 = vst [vmem:[%s3608_s17 + $0xde8] sm:$0xff] %v1541_v10  ;;  %v1545_v16 = vmul.f32 0.6931472, %v3239_v12  ;;  %3266 = vlog2.f32 %v599_v8  ;;  %v621_v10 = vld [vmem:[%s3581_s30 + $0xf18] sm:$0xff] }
 0x204   : > { %v3243_v18 = vpop.eup %3242  ;;  %2120 = vst [vmem:[%s3608_s17 + $0xdf0] sm:$0xff] %v1543_v13  ;;  %v1547_v19 = vmul.f32 0.6931472, %v3241_v15  ;;  %3268 = vlog2.f32 %v600_v11  ;;  %v622_v13 = vld [vmem:[%s3581_s30 + $0xf20] sm:$0xff] }
 0x205   : > { %v3245_v21 = vpop.eup %3244  ;;  %2121 = vst [vmem:[%s3608_s17 + $0xdf8] sm:$0xff] %v1545_v16  ;;  %v1549_v22 = vmul.f32 0.6931472, %v3243_v18  ;;  %3270 = vlog2.f32 %v601_v14  ;;  %v623_v16 = vld [vmem:[%s3581_s30 + $0xf28] sm:$0xff] }
 0x206   : > { %v3247_v24 = vpop.eup %3246  ;;  %2122 = vst [vmem:[%s3608_s17 + $0xe00] sm:$0xff] %v1547_v19  ;;  %v1551_v25 = vmul.f32 0.6931472, %v3245_v21  ;;  %3272 = vlog2.f32 %v602_v17  ;;  %v624_v19 = vld [vmem:[%s3581_s30 + $0xf30] sm:$0xff] }
 0x207   : > { %v3249_v27 = vpop.eup %3248  ;;  %2123 = vst [vmem:[%s3608_s17 + $0xe08] sm:$0xff] %v1549_v22  ;;  %v1553_v28 = vmul.f32 0.6931472, %v3247_v24  ;;  %3274 = vlog2.f32 %v603_v20  ;;  %v625_v22 = vld [vmem:[%s3581_s30 + $0xf38] sm:$0xff] }
 0x208   : > { %v3251_v30 = vpop.eup %3250  ;;  %2124 = vst [vmem:[%s3608_s17 + $0xe10] sm:$0xff] %v1551_v25  ;;  %v1555_v31 = vmul.f32 0.6931472, %v3249_v27  ;;  %3276 = vlog2.f32 %v604_v23  ;;  %v626_v25 = vld [vmem:[%s3581_s30 + $0xf40] sm:$0xff] }
 0x209   : > { %v3253_v33 = vpop.eup %3252  ;;  %2125 = vst [vmem:[%s3608_s17 + $0xe18] sm:$0xff] %v1553_v28  ;;  %v1557_v34 = vmul.f32 0.6931472, %v3251_v30  ;;  %3278 = vlog2.f32 %v605_v26  ;;  %v627_v28 = vld [vmem:[%s3581_s30 + $0xf48] sm:$0xff] }
 0x20a   : > { %v3255_v36 = vpop.eup %3254  ;;  %2126 = vst [vmem:[%s3608_s17 + $0xe20] sm:$0xff] %v1555_v31  ;;  %v1559_v37 = vmul.f32 0.6931472, %v3253_v33  ;;  %3280 = vlog2.f32 %v606_v29  ;;  %v628_v31 = vld [vmem:[%s3581_s30 + $0xf50] sm:$0xff] }
 0x20b   : > { %v3257_v39 = vpop.eup %3256  ;;  %2127 = vst [vmem:[%s3608_s17 + $0xe28] sm:$0xff] %v1557_v34  ;;  %v1561_v40 = vmul.f32 0.6931472, %v3255_v36  ;;  %3282 = vlog2.f32 %v607_v32  ;;  %v629_v34 = vld [vmem:[%s3581_s30 + $0xf58] sm:$0xff] }
 0x20c   : > { %v3259_v42 = vpop.eup %3258  ;;  %2128 = vst [vmem:[%s3608_s17 + $0xe30] sm:$0xff] %v1559_v37  ;;  %v1563_v43 = vmul.f32 0.6931472, %v3257_v39  ;;  %3284 = vlog2.f32 %v608_v35  ;;  %v630_v37 = vld [vmem:[%s3581_s30 + $0xf60] sm:$0xff] }
 0x20d   : > { %v3261_v45 = vpop.eup %3260  ;;  %2129 = vst [vmem:[%s3608_s17 + $0xe38] sm:$0xff] %v1561_v40  ;;  %v1565_v46 = vmul.f32 0.6931472, %v3259_v42  ;;  %3286 = vlog2.f32 %v609_v38  ;;  %v631_v40 = vld [vmem:[%s3581_s30 + $0xf68] sm:$0xff] }
 0x20e   : > { %v3263_v48 = vpop.eup %3262  ;;  %2130 = vst [vmem:[%s3608_s17 + $0xe40] sm:$0xff] %v1563_v43  ;;  %v1567_v49 = vmul.f32 0.6931472, %v3261_v45  ;;  %3288 = vlog2.f32 %v610_v41  ;;  %v632_v43 = vld [vmem:[%s3581_s30 + $0xf70] sm:$0xff] }
 0x20f   : > { %v3265_v51 = vpop.eup %3264  ;;  %2131 = vst [vmem:[%s3608_s17 + $0xe48] sm:$0xff] %v1565_v46  ;;  %v1569_v52 = vmul.f32 0.6931472, %v3263_v48  ;;  %3290 = vlog2.f32 %v611_v44  ;;  %v633_v46 = vld [vmem:[%s3581_s30 + $0xf78] sm:$0xff] }
 0x210   : > { %v3267_v54 = vpop.eup %3266  ;;  %2132 = vst [vmem:[%s3608_s17 + $0xe50] sm:$0xff] %v1567_v49  ;;  %v1571_v55 = vmul.f32 0.6931472, %v3265_v51  ;;  %3292 = vlog2.f32 %v612_v47  ;;  %v634_v49 = vld [vmem:[%s3581_s30 + $0xf80] sm:$0xff] }
 0x211   : > { %v3269_v57 = vpop.eup %3268  ;;  %2133 = vst [vmem:[%s3608_s17 + $0xe58] sm:$0xff] %v1569_v52  ;;  %v1573_v58 = vmul.f32 0.6931472, %v3267_v54  ;;  %3294 = vlog2.f32 %v613_v50  ;;  %v635_v52 = vld [vmem:[%s3581_s30 + $0xf88] sm:$0xff] }
 0x212   : > { %v3271_v60 = vpop.eup %3270  ;;  %2134 = vst [vmem:[%s3608_s17 + $0xe60] sm:$0xff] %v1571_v55  ;;  %v1575_v61 = vmul.f32 0.6931472, %v3269_v57  ;;  %3296 = vlog2.f32 %v614_v53  ;;  %v636_v55 = vld [vmem:[%s3581_s30 + $0xf90] sm:$0xff] }
 0x213   : > { %v3273_v63 = vpop.eup %3272  ;;  %2135 = vst [vmem:[%s3608_s17 + $0xe68] sm:$0xff] %v1573_v58  ;;  %v1577_v0 = vmul.f32 0.6931472, %v3271_v60  ;;  %3298 = vlog2.f32 %v615_v56  ;;  %v637_v58 = vld [vmem:[%s3581_s30 + $0xf98] sm:$0xff] }
 0x214   : > { %v3275_v2 = vpop.eup %3274  ;;  %2136 = vst [vmem:[%s3608_s17 + $0xe70] sm:$0xff] %v1575_v61  ;;  %v1579_v3 = vmul.f32 0.6931472, %v3273_v63  ;;  %3300 = vlog2.f32 %v616_v59  ;;  %v638_v61 = vld [vmem:[%s3581_s30 + $0xfa0] sm:$0xff] }
 0x215   : > { %v3277_v5 = vpop.eup %3276  ;;  %2137 = vst [vmem:[%s3608_s17 + $0xe78] sm:$0xff] %v1577_v0  ;;  %v1581_v6 = vmul.f32 0.6931472, %v3275_v2  ;;  %3302 = vlog2.f32 %v617_v62  ;;  %v639_v0 = vld [vmem:[%s3581_s30 + $0xfa8] sm:$0xff] }
 0x216   : > { %v3279_v8 = vpop.eup %3278  ;;  %2138 = vst [vmem:[%s3608_s17 + $0xe80] sm:$0xff] %v1579_v3  ;;  %v1583_v9 = vmul.f32 0.6931472, %v3277_v5  ;;  %3304 = vlog2.f32 %v618_v1  ;;  %v640_v3 = vld [vmem:[%s3581_s30 + $0xfb0] sm:$0xff] }
 0x217   : > { %v3281_v11 = vpop.eup %3280  ;;  %2139 = vst [vmem:[%s3608_s17 + $0xe88] sm:$0xff] %v1581_v6  ;;  %v1585_v12 = vmul.f32 0.6931472, %v3279_v8  ;;  %3306 = vlog2.f32 %v619_v4  ;;  %v641_v6 = vld [vmem:[%s3581_s30 + $0xfb8] sm:$0xff] }
 0x218   : > { %v3283_v14 = vpop.eup %3282  ;;  %2140 = vst [vmem:[%s3608_s17 + $0xe90] sm:$0xff] %v1583_v9  ;;  %v1587_v15 = vmul.f32 0.6931472, %v3281_v11  ;;  %3308 = vlog2.f32 %v620_v7  ;;  %v642_v9 = vld [vmem:[%s3581_s30 + $0xfc0] sm:$0xff] }
 0x219   : > { %v3285_v17 = vpop.eup %3284  ;;  %2141 = vst [vmem:[%s3608_s17 + $0xe98] sm:$0xff] %v1585_v12  ;;  %v1589_v18 = vmul.f32 0.6931472, %v3283_v14  ;;  %3310 = vlog2.f32 %v621_v10  ;;  %v643_v12 = vld [vmem:[%s3581_s30 + $0xfc8] sm:$0xff] }
 0x21a   : > { %v3287_v20 = vpop.eup %3286  ;;  %2142 = vst [vmem:[%s3608_s17 + $0xea0] sm:$0xff] %v1587_v15  ;;  %v1591_v21 = vmul.f32 0.6931472, %v3285_v17  ;;  %3312 = vlog2.f32 %v622_v13  ;;  %v644_v15 = vld [vmem:[%s3581_s30 + $0xfd0] sm:$0xff] }
 0x21b   : > { %v3289_v23 = vpop.eup %3288  ;;  %2143 = vst [vmem:[%s3608_s17 + $0xea8] sm:$0xff] %v1589_v18  ;;  %v1593_v24 = vmul.f32 0.6931472, %v3287_v20  ;;  %3314 = vlog2.f32 %v623_v16  ;;  %v645_v18 = vld [vmem:[%s3581_s30 + $0xfd8] sm:$0xff] }
 0x21c   : > { %v3291_v26 = vpop.eup %3290  ;;  %2144 = vst [vmem:[%s3608_s17 + $0xeb0] sm:$0xff] %v1591_v21  ;;  %v1595_v27 = vmul.f32 0.6931472, %v3289_v23  ;;  %3316 = vlog2.f32 %v624_v19  ;;  %v646_v21 = vld [vmem:[%s3581_s30 + $0xfe0] sm:$0xff] }
 0x21d   : > { %v3293_v29 = vpop.eup %3292  ;;  %2145 = vst [vmem:[%s3608_s17 + $0xeb8] sm:$0xff] %v1593_v24  ;;  %v1597_v30 = vmul.f32 0.6931472, %v3291_v26  ;;  %3318 = vlog2.f32 %v625_v22  ;;  %v647_v24 = vld [vmem:[%s3581_s30 + $0xfe8] sm:$0xff] }
 0x21e   : > { %v3295_v32 = vpop.eup %3294  ;;  %2146 = vst [vmem:[%s3608_s17 + $0xec0] sm:$0xff] %v1595_v27  ;;  %v1599_v33 = vmul.f32 0.6931472, %v3293_v29  ;;  %3320 = vlog2.f32 %v626_v25  ;;  %v648_v27 = vld [vmem:[%s3581_s30 + $0xff0] sm:$0xff] }
 0x21f   : > { %v3297_v35 = vpop.eup %3296  ;;  %2147 = vst [vmem:[%s3608_s17 + $0xec8] sm:$0xff] %v1597_v30  ;;  %v1601_v36 = vmul.f32 0.6931472, %v3295_v32  ;;  %3322 = vlog2.f32 %v627_v28  ;;  %v649_v30 = vld [vmem:[%s3581_s30 + $0xff8] sm:$0xff] }
 0x220   : > { %v3299_v38 = vpop.eup %3298  ;;  %2148 = vst [vmem:[%s3608_s17 + $0xed0] sm:$0xff] %v1599_v33  ;;  %v1603_v39 = vmul.f32 0.6931472, %v3297_v35  ;;  %3324 = vlog2.f32 %v628_v31 }
 0x221   : > { %v3301_v41 = vpop.eup %3300  ;;  %2149 = vst [vmem:[%s3608_s17 + $0xed8] sm:$0xff] %v1601_v36  ;;  %v1605_v42 = vmul.f32 0.6931472, %v3299_v38  ;;  %3326 = vlog2.f32 %v629_v34 }
 0x222   : > { %v3303_v44 = vpop.eup %3302  ;;  %2150 = vst [vmem:[%s3608_s17 + $0xee0] sm:$0xff] %v1603_v39  ;;  %v1607_v45 = vmul.f32 0.6931472, %v3301_v41  ;;  %3328 = vlog2.f32 %v630_v37 }
 0x223   : > { %v3305_v47 = vpop.eup %3304  ;;  %2151 = vst [vmem:[%s3608_s17 + $0xee8] sm:$0xff] %v1605_v42  ;;  %v1609_v48 = vmul.f32 0.6931472, %v3303_v44  ;;  %3330 = vlog2.f32 %v631_v40 }
 0x224   : > { %v3307_v50 = vpop.eup %3306  ;;  %2152 = vst [vmem:[%s3608_s17 + $0xef0] sm:$0xff] %v1607_v45  ;;  %v1611_v51 = vmul.f32 0.6931472, %v3305_v47  ;;  %3332 = vlog2.f32 %v632_v43 }
 0x225   : > { %v3309_v53 = vpop.eup %3308  ;;  %2153 = vst [vmem:[%s3608_s17 + $0xef8] sm:$0xff] %v1609_v48  ;;  %v1613_v54 = vmul.f32 0.6931472, %v3307_v50  ;;  %3334 = vlog2.f32 %v633_v46 }
 0x226   : > { %v3311_v56 = vpop.eup %3310  ;;  %2154 = vst [vmem:[%s3608_s17 + $0xf00] sm:$0xff] %v1611_v51  ;;  %v1615_v57 = vmul.f32 0.6931472, %v3309_v53  ;;  %3336 = vlog2.f32 %v634_v49 }
 0x227   : > { %v3313_v59 = vpop.eup %3312  ;;  %2155 = vst [vmem:[%s3608_s17 + $0xf08] sm:$0xff] %v1613_v54  ;;  %v1617_v60 = vmul.f32 0.6931472, %v3311_v56  ;;  %3338 = vlog2.f32 %v635_v52 }
 0x228   : > { %v3315_v62 = vpop.eup %3314  ;;  %2156 = vst [vmem:[%s3608_s17 + $0xf10] sm:$0xff] %v1615_v57  ;;  %v1619_v63 = vmul.f32 0.6931472, %v3313_v59  ;;  %3340 = vlog2.f32 %v636_v55 }
 0x229   : > { %v3317_v1 = vpop.eup %3316  ;;  %2157 = vst [vmem:[%s3608_s17 + $0xf18] sm:$0xff] %v1617_v60  ;;  %v1621_v2 = vmul.f32 0.6931472, %v3315_v62  ;;  %3342 = vlog2.f32 %v637_v58 }
 0x22a   : > { %v3319_v4 = vpop.eup %3318  ;;  %2158 = vst [vmem:[%s3608_s17 + $0xf20] sm:$0xff] %v1619_v63  ;;  %v1623_v5 = vmul.f32 0.6931472, %v3317_v1  ;;  %3344 = vlog2.f32 %v638_v61 }
 0x22b   : > { %v3321_v7 = vpop.eup %3320  ;;  %2159 = vst [vmem:[%s3608_s17 + $0xf28] sm:$0xff] %v1621_v2  ;;  %v1625_v8 = vmul.f32 0.6931472, %v3319_v4  ;;  %3346 = vlog2.f32 %v639_v0 }
 0x22c   : > { %v3323_v10 = vpop.eup %3322  ;;  %2160 = vst [vmem:[%s3608_s17 + $0xf30] sm:$0xff] %v1623_v5  ;;  %v1627_v11 = vmul.f32 0.6931472, %v3321_v7  ;;  %3348 = vlog2.f32 %v640_v3 }
 0x22d   : > { %v3325_v13 = vpop.eup %3324  ;;  %2161 = vst [vmem:[%s3608_s17 + $0xf38] sm:$0xff] %v1625_v8  ;;  %v1629_v14 = vmul.f32 0.6931472, %v3323_v10  ;;  %3350 = vlog2.f32 %v641_v6 }
 0x22e   : > { %v3327_v16 = vpop.eup %3326  ;;  %2162 = vst [vmem:[%s3608_s17 + $0xf40] sm:$0xff] %v1627_v11  ;;  %v1631_v17 = vmul.f32 0.6931472, %v3325_v13  ;;  %3352 = vlog2.f32 %v642_v9 }
 0x22f   : > { %v3329_v19 = vpop.eup %3328  ;;  %2163 = vst [vmem:[%s3608_s17 + $0xf48] sm:$0xff] %v1629_v14  ;;  %v1633_v20 = vmul.f32 0.6931472, %v3327_v16  ;;  %3354 = vlog2.f32 %v643_v12 }
 0x230   : > { %v3331_v22 = vpop.eup %3330  ;;  %2164 = vst [vmem:[%s3608_s17 + $0xf50] sm:$0xff] %v1631_v17  ;;  %v1635_v23 = vmul.f32 0.6931472, %v3329_v19  ;;  %3356 = vlog2.f32 %v644_v15 }
 0x231   : > { %v3333_v25 = vpop.eup %3332  ;;  %2165 = vst [vmem:[%s3608_s17 + $0xf58] sm:$0xff] %v1633_v20  ;;  %v1637_v26 = vmul.f32 0.6931472, %v3331_v22  ;;  %3358 = vlog2.f32 %v645_v18 }
 0x232   : > { %v3335_v28 = vpop.eup %3334  ;;  %2166 = vst [vmem:[%s3608_s17 + $0xf60] sm:$0xff] %v1635_v23  ;;  %v1639_v29 = vmul.f32 0.6931472, %v3333_v25  ;;  %3360 = vlog2.f32 %v646_v21 }
 0x233   : > { %v3337_v31 = vpop.eup %3336  ;;  %2167 = vst [vmem:[%s3608_s17 + $0xf68] sm:$0xff] %v1637_v26  ;;  %v1641_v32 = vmul.f32 0.6931472, %v3335_v28  ;;  %3362 = vlog2.f32 %v647_v24 }
 0x234   : > { %v3339_v33 = vpop.eup %3338  ;;  %2168 = vst [vmem:[%s3608_s17 + $0xf70] sm:$0xff] %v1639_v29  ;;  %v1643_v34 = vmul.f32 0.6931472, %v3337_v31  ;;  %3364 = vlog2.f32 %v648_v27 }
 0x235   : > { %v3341_v35 = vpop.eup %3340  ;;  %2169 = vst [vmem:[%s3608_s17 + $0xf78] sm:$0xff] %v1641_v32  ;;  %v1645_v36 = vmul.f32 0.6931472, %v3339_v33  ;;  %3366 = vlog2.f32 %v649_v30 }
 0x236   : > { %v3343_v37 = vpop.eup %3342  ;;  %2170 = vst [vmem:[%s3608_s17 + $0xf80] sm:$0xff] %v1643_v34  ;;  %v1647_v38 = vmul.f32 0.6931472, %v3341_v35 }
 0x237   : > { %v3345_v39 = vpop.eup %3344  ;;  %2171 = vst [vmem:[%s3608_s17 + $0xf88] sm:$0xff] %v1645_v36  ;;  %v1649_v40 = vmul.f32 0.6931472, %v3343_v37 }
 0x238   : > { %v3347_v41 = vpop.eup %3346  ;;  %2172 = vst [vmem:[%s3608_s17 + $0xf90] sm:$0xff] %v1647_v38  ;;  %v1651_v42 = vmul.f32 0.6931472, %v3345_v39 }
 0x239   : > { %v3349_v43 = vpop.eup %3348  ;;  %2173 = vst [vmem:[%s3608_s17 + $0xf98] sm:$0xff] %v1649_v40  ;;  %v1653_v44 = vmul.f32 0.6931472, %v3347_v41 }
 0x23a   : > { %v3351_v45 = vpop.eup %3350  ;;  %2174 = vst [vmem:[%s3608_s17 + $0xfa0] sm:$0xff] %v1651_v42  ;;  %v1655_v46 = vmul.f32 0.6931472, %v3349_v43 }
 0x23b   : > { %v3353_v47 = vpop.eup %3352  ;;  %2175 = vst [vmem:[%s3608_s17 + $0xfa8] sm:$0xff] %v1653_v44  ;;  %v1657_v48 = vmul.f32 0.6931472, %v3351_v45 }
 0x23c   : > { %v3355_v49 = vpop.eup %3354  ;;  %2176 = vst [vmem:[%s3608_s17 + $0xfb0] sm:$0xff] %v1655_v46  ;;  %v1659_v50 = vmul.f32 0.6931472, %v3353_v47 }
 0x23d   : > { %v3357_v51 = vpop.eup %3356  ;;  %2177 = vst [vmem:[%s3608_s17 + $0xfb8] sm:$0xff] %v1657_v48  ;;  %v1661_v52 = vmul.f32 0.6931472, %v3355_v49 }
 0x23e   : > { %v3359_v53 = vpop.eup %3358  ;;  %2178 = vst [vmem:[%s3608_s17 + $0xfc0] sm:$0xff] %v1659_v50  ;;  %v1663_v54 = vmul.f32 0.6931472, %v3357_v51 }
 0x23f   : > { %v3361_v55 = vpop.eup %3360  ;;  %2179 = vst [vmem:[%s3608_s17 + $0xfc8] sm:$0xff] %v1661_v52  ;;  %v1665_v56 = vmul.f32 0.6931472, %v3359_v53 }
 0x240   : > { %v3363_v57 = vpop.eup %3362  ;;  %2180 = vst [vmem:[%s3608_s17 + $0xfd0] sm:$0xff] %v1663_v54  ;;  %v1667_v58 = vmul.f32 0.6931472, %v3361_v55 }
 0x241   : > { %v3365_v59 = vpop.eup %3364  ;;  %2181 = vst [vmem:[%s3608_s17 + $0xfd8] sm:$0xff] %v1665_v56  ;;  %v1669_v60 = vmul.f32 0.6931472, %v3363_v57 }
 0x242   : > { %v3367_v61 = vpop.eup %3366  ;;  %2182 = vst [vmem:[%s3608_s17 + $0xfe0] sm:$0xff] %v1667_v58  ;;  %v1671_v62 = vmul.f32 0.6931472, %v3365_v59 }
 0x243   : > { %2183 = vst [vmem:[%s3608_s17 + $0xfe8] sm:$0xff] %v1669_v60  ;;  %v1673_v63 = vmul.f32 0.6931472, %v3367_v61 }
 0x244   : > { %2184 = vst [vmem:[%s3608_s17 + $0xff0] sm:$0xff] %v1671_v62 }
 0x245   : > { %2185 = vst [vmem:[%s3608_s17 + $0xff8] sm:$0xff] %v1673_v63 }
 0x246   : > { %3409 = shalt.err (!%p3406_p10)
}
 0x247   : > { %s3410_s13 = scalar_lea.hbm %s4617_s2, 65536  ;;  %s3414_s20 = scalar_lea.hbm %s4666_s1, 131072 }
 0x248   : > { %p3411_p0 = scmp.ne.s32.totalorder %s4617_s2, %s3410_s13  ;;  %p3415_p1 = scmp.lt.s32.totalorder %s4617_s2, %s4666_s1 }
 0x249   : > { %p3416_p3 = scmp.lt.s32.totalorder %s3414_s20, %s3410_s13 }
 0x24a   : > { %p3412_p2 = pnand %p3411_p0, %p4675_p12 }
 0x24b   : > { %p3417_p6 = por %p3416_p3, %p3415_p1 }
 0x24c   : > { %p3413_p9 = pneg %p3412_p2 }
 0x24e   : > { %p3418_p11 = pnand %p3417_p6, %p3413_p9 }
 0x250   : > { %3421 = shalt.err (!%p3418_p11)
}
 0x251   : > { %s3466_s24 = smov 8192   ;;  %s3467_s26 = smov 512  }
 0x252   : > { %2296 = dma.vmem_to_hbm [thread:$0]  (%p4675_p12), %s4619_s27, 65536, %s4617_s2, %s2187_s10, %s3466_s24, %s3466_s24, %s3467_s26  }
 0x253 PF: > { %s2216_s30 = sand.u32 1, %s3448_s6   ;;  %p4676_p13 = scmp.ne.s32.totalorder %s4672_s19, 0 }
 0x254   : > { %p4677_p4 = scmp.ge.s32.totalorder %s3460_s9, 2  ;;  %s2217_s17 = scalar_lea.sflag [#allocation4], %s2216_s30 }
 0x256   : > { %p2303_p5 = pnand %p4677_p4, %p4676_p13 }
 0x258   : > { %p2304_p7 = pneg %p2303_p5 }
 0x25a   : > { %3443 = dma.done.wait (%p2304_p7), %s2217_s17, 65536  }
 0x25b   : > { %3445 = vsyncadd (%p2304_p7), %s2217_s17, 4294901760  ;;  %p14_p8 = scmp.ge.s32.totalorder %s3503_s12, 4   ;;  %s4678_s6 = smov %s3452_s7 }
 0x25c   : > { %s4679_s7 = smov %s3456_s8  ;;  %s4680_s8 = smov %s3515_s15 }
 0x25d   : > { %s4681_s9 = smov %s3503_s12  ;;  %16 = sbr.rel (!%p14_p8) target bundleno = 5 (0x5), region = 69 }
 0x262   :  { %2222 = vsyncpa [#allocation3], 1 }
 0x263   :  { %2224 = vsyncpa [#allocation3 + $0x1], 1 }
 0x264   :  { %2225 = vsyncpa [#allocation4], 1 }
 0x265   :  { %2227 = vsyncpa [#allocation4 + $0x1], 1 }

</bundles_post_ra>
